<compile_context>
chip_gen: v7x
topology: tpu7x:2x2x1
jax: 0.10.0
libtpu: 0.0.40
codegen_flags: <defaults>
</compile_context>

<pallas_src>
import jax
import jax.numpy as jnp
from jax.experimental import pallas as pl
from jax.experimental.pallas import tpu as pltpu

S = 30             # number of graph states (matches `for state in range(30)`)
T = 20             # number of time steps  (v_values = x[:, 2:22]); even -> clean step pairs
B = 5              # number of sequences decoded (matches `for datano in range(5)`)
GAMMA_LANES = 128  # lane-dense output row width; first T lanes hold the argmaxes
GAMMA_ROWS = 8     # sublane-dense output; first B rows valid
TBL_STRIDE = 32    # sublane offset between packed tables (multiple of 8)


def viterbi_kernel(scal_ref, starts_ref, v_ref, a_ref, tables_ref, gamma_ref):
    # scalars (SMEM): [w1, w2, c1, c2, 1/(2*std_v^2), 1/(2*std_a^2)]
    w1 = scal_ref[0]
    w2 = scal_ref[1]
    c1 = scal_ref[2]
    c2 = scal_ref[3]
    inv2sv2 = scal_ref[4]
    inv2sa2 = scal_ref[5]

    wc = w1 * c1 + w2 * c2     # scalar
    kdv = w1 * inv2sv2         # scalar
    kav = w2 * inv2sa2         # scalar

    # packed graph tables (single VMEM slab)
    dist = tables_ref[0:S, :]                                    # dist[l, j] (symmetric)
    orient = tables_ref[TBL_STRIDE:TBL_STRIDE + S, :]            # orient[l, j]
    orient_t = tables_ref[2 * TBL_STRIDE:2 * TBL_STRIDE + S, :]  # orient[j, l]
    conn = tables_ref[3 * TBL_STRIDE:3 * TBL_STRIDE + S, :]      # 1.0 iff same component

    # --- hoisted (v,a)-independent algebra (computed once, before the batch loop) ---
    #   F(v,a)[l,j] = conn*(wc - kdv*(v-dist)^2 - kav*(a-orient)^2)
    #              = C0 + v*D2 + a*O2 - (kdv*v^2 + kav*a^2)*conn
    Kd = conn * kdv
    Ka = conn * kav
    base = conn * wc - Kd * (dist * dist)
    C0 = base - Ka * (orient * orient)         # even-step orientation: [l sublanes, j lanes]
    C0_t = base - Ka * (orient_t * orient_t)   # odd-step (transposed) orientation
    D2 = 2.0 * (Kd * dist)                     # symmetric
    O2 = 2.0 * (Ka * orient)
    O2_t = 2.0 * (Ka * orient_t)

    idx_col = jax.lax.broadcasted_iota(jnp.int32, (S, 1), 0)
    idx_row = jax.lax.broadcasted_iota(jnp.int32, (1, S), 1)
    lane_iota = jax.lax.broadcasted_iota(jnp.int32, (1, GAMMA_LANES), 1)
    sub_iota = jax.lax.broadcasted_iota(jnp.int32, (GAMMA_ROWS, GAMMA_LANES), 0)

    def argmax_col(col):
        # argmax over l of an (S,1) column; ties -> lowest index (matches strict `>` scan)
        m = jnp.max(col, axis=0, keepdims=True)
        return jnp.min(jnp.where(col >= m, idx_col, S), axis=0, keepdims=True)   # (1,1)

    def argmax_row(row):
        # argmax over l of a (1,S) row; ties -> lowest index
        m = jnp.max(row, axis=1, keepdims=True)
        return jnp.min(jnp.where(row >= m, idx_row, S), axis=1, keepdims=True)   # (1,1)

    def batch_body(b, gamma_buf):
        start_b = starts_ref[b]
        # Viterbi init (PyTorch i==0 term): delta_0[j] = F_obs0[j, start_b], a (1,S) row over j.
        # dist/conn are symmetric so their row `start_b` doubles as the column;
        # orient is not, so its pre-transposed copy supplies orient[j, start_b].
        d_row = tables_ref[pl.ds(start_b, 1), :]
        o_row = tables_ref[pl.ds(2 * TBL_STRIDE + start_b, 1), :]
        c_row = tables_ref[pl.ds(3 * TBL_STRIDE + start_b, 1), :]
        v0 = v_ref[b, 0]
        a0 = a_ref[b, 0]
        dv0 = v0 - d_row
        da0 = a0 - o_row
        init_row = c_row * (wc - kdv * (dv0 * dv0) - kav * (da0 * da0))

        grow0 = jnp.zeros((1, GAMMA_LANES), jnp.int32)

        def pair_body(i, carry):
            prev_row, grow = carry             # prev_row: (1,S) over prev-state j (lanes)

            # --- even step s0 = 2*i : F[l, j], l on sublanes, j on lanes ---
            s0 = 2 * i
            v = v_ref[b, s0]
            a = a_ref[b, s0]
            t_sc = kdv * v * v + kav * a * a                      # scalar unit
            f = C0 + v * D2 + a * O2 - t_sc * conn
            delta_col = jnp.max(f + prev_row, axis=1, keepdims=True)       # (S,1) over l
            grow = jnp.where(lane_iota == s0, argmax_col(delta_col), grow)

            # --- odd step s1 = 2*i+1 : transposed orientation F^T[j, l] ---
            s1 = s0 + 1
            v = v_ref[b, s1]
            a = a_ref[b, s1]
            t_sc = kdv * v * v + kav * a * a
            ft = C0_t + v * D2 + a * O2_t - t_sc * conn
            delta_row = jnp.max(ft + delta_col, axis=0, keepdims=True)     # (1,S) over l
            grow = jnp.where(lane_iota == s1, argmax_row(delta_row), grow)

            return delta_row, grow

        _, grow = jax.lax.fori_loop(0, T // 2, pair_body, (init_row, grow0),
                                    unroll=True)
        # stash this batch's argmaxes on sublane b of the register-resident buffer
        return jnp.where(sub_iota == b, grow, gamma_buf)

    # TODO(synk): on v7x the batch loop could become a grid=(B,) "parallel" axis to use both
    # TensorCores; kept as an in-kernel fori_loop since on v5e/v6e a grid is serial overhead.
    gamma = jax.lax.fori_loop(0, B, batch_body,
                              jnp.zeros((GAMMA_ROWS, GAMMA_LANES), jnp.int32))
    gamma_ref[...] = gamma     # single unmasked (8,128) store


def build_graph_tables(node_x, node_y, node_gid):
    """Static floor-plan tables packed into one VMEM slab.

    Depends only on the graph (not on x/w1/w2) -- build once and cache across calls.
    """
    node_x = node_x.astype(jnp.float32)
    node_y = node_y.astype(jnp.float32)
    dx = node_x[:, None] - node_x[None, :]          # x_l - x_j
    dy = node_y[:, None] - node_y[None, :]          # y_l - y_j
    dist = jnp.sqrt(dx * dx + dy * dy).astype(jnp.float32)
    orient = jnp.arctan2(dy, dx).astype(jnp.float32)
    conn = (node_gid[:, None] == node_gid[None, :]).astype(jnp.float32)
    packed = jnp.zeros((4 * TBL_STRIDE, S), jnp.float32)
    packed = packed.at[0:S].set(dist)
    packed = packed.at[TBL_STRIDE:TBL_STRIDE + S].set(orient)
    packed = packed.at[2 * TBL_STRIDE:2 * TBL_STRIDE + S].set(orient.T)
    packed = packed.at[3 * TBL_STRIDE:3 * TBL_STRIDE + S].set(conn)
    return packed


def layer1_forward(x, w1, w2, node_x, node_y, node_gid, tables=None):
    """JAX/Pallas equivalent of Layer1.forward. Returns gammas as (B, T) int32."""
    if tables is None:
        tables = build_graph_tables(node_x, node_y, node_gid)

    startx = x[:, 0]
    starty = x[:, 1]
    v_values = x[:, 2:22].astype(jnp.float32)
    v_angles = x[:, 22:42].astype(jnp.float32)

    # --- glue: calcNearestState (ties -> last node, matching the `<=` scan) ---
    d = (node_y[None, :] / 2.5 - starty[:, None]) ** 2 + (node_x[None, :] / 2.5 - startx[:, None]) ** 2
    minv = jnp.min(d, axis=1, keepdims=True)
    starts = jnp.max(jnp.where(d <= minv, jnp.arange(S)[None, :], -1), axis=1).astype(jnp.int32)

    # --- glue: scalar constants (torch.std is unbiased over all elements) ---
    sv = jnp.std(v_values, ddof=1)
    sa = jnp.std(v_angles, ddof=1)
    two_pi = jnp.float32(2.0 * jnp.pi)
    c1 = jnp.log(1.0 / (sv * jnp.sqrt(two_pi)))
    c2 = jnp.log(1.0 / (sa * jnp.sqrt(two_pi)))
    scal = jnp.stack([w1, w2, c1, c2,
                      1.0 / (2.0 * sv * sv),
                      1.0 / (2.0 * sa * sa)]).astype(jnp.float32)

    gammas_rows = pl.pallas_call(
        viterbi_kernel,
        out_shape=jax.ShapeDtypeStruct((GAMMA_ROWS, GAMMA_LANES), jnp.int32),
        in_specs=[
            pl.BlockSpec(memory_space=pltpu.MemorySpace.SMEM),   # scal
            pl.BlockSpec(memory_space=pltpu.MemorySpace.SMEM),   # starts
            pl.BlockSpec(memory_space=pltpu.MemorySpace.SMEM),   # v_values
            pl.BlockSpec(memory_space=pltpu.MemorySpace.SMEM),   # v_angles
            pl.BlockSpec(memory_space=pltpu.MemorySpace.VMEM),   # packed graph tables
        ],
        out_specs=pl.BlockSpec(memory_space=pltpu.MemorySpace.VMEM),
    )(scal, starts, v_values[:B], v_angles[:B], tables)

    return gammas_rows[:B, :T]


if __name__ == "__main__":
    key = jax.random.PRNGKey(0)
    kx, ky, kw1, kw2, ksx, ksy, kv, ka = jax.random.split(key, 8)

    # synthetic deterministic floor-plan graph: 30 nodes, 3 connected components of 10 nodes
    # TODO(synk): original code loads the graph from part_1_output/floor_plan_graph.csv; synthesized here.
    node_x = jax.random.uniform(kx, (S,), minval=0.0, maxval=100.0).astype(jnp.float32)
    node_y = jax.random.uniform(ky, (S,), minval=0.0, maxval=100.0).astype(jnp.float32)
    node_gid = (jnp.arange(S) // 10).astype(jnp.int32)

    # module parameters (torch.nn.Parameter(torch.randn(())) analogues)
    w1 = jax.random.normal(kw1, ()).astype(jnp.float32)
    w2 = jax.random.normal(kw2, ()).astype(jnp.float32)

    # input x: (5, 42) = [startx, starty, 20 velocity magnitudes, 20 velocity angles]
    startx = jax.random.uniform(ksx, (B, 1), minval=0.0, maxval=40.0)
    starty = jax.random.uniform(ksy, (B, 1), minval=0.0, maxval=40.0)
    vvals = jax.random.uniform(kv, (B, T), minval=0.5, maxval=20.0)
    vangs = jax.random.uniform(ka, (B, T), minval=-jnp.pi, maxval=jnp.pi)
    x = jnp.concatenate([startx, starty, vvals, vangs], axis=1).astype(jnp.float32)

    # static graph tables built once (cacheable across forward calls)
    tables = jax.block_until_ready(build_graph_tables(node_x, node_y, node_gid))

    gammas = layer1_forward(x, w1, w2, node_x, node_y, node_gid, tables=tables)
    gammas = jax.block_until_ready(gammas)
    assert gammas.shape == (B, T) and gammas.dtype == jnp.int32
    assert bool(jnp.all((gammas >= 0) & (gammas < S)))
    print("KERNEL_OK")
</pallas_src>

<mosaic_0001>
module attributes {stable_mosaic.version = 11 : i64} {
  func.func @viterbi_kernel(%arg0: memref<6xf32, #tpu.memory_space<smem>>, %arg1: memref<5xi32, #tpu.memory_space<smem>>, %arg2: memref<5x20xf32, #tpu.memory_space<smem>>, %arg3: memref<5x20xf32, #tpu.memory_space<smem>>, %arg4: memref<128x30xf32, #tpu.memory_space<vmem>>, %arg5: memref<8x128xi32, #tpu.memory_space<vmem>>) attributes {dimension_semantics = [], scalar_prefetch = 0 : i64, scratch_operands = 0 : i64, tpu.core_type = #tpu.core_type<tc>} {
    %c0 = arith.constant 0 : index
    %0 = memref.load %arg0[%c0] : memref<6xf32, #tpu.memory_space<smem>>
    %c1 = arith.constant 1 : index
    %1 = memref.load %arg0[%c1] : memref<6xf32, #tpu.memory_space<smem>>
    %c2 = arith.constant 2 : index
    %2 = memref.load %arg0[%c2] : memref<6xf32, #tpu.memory_space<smem>>
    %c3 = arith.constant 3 : index
    %3 = memref.load %arg0[%c3] : memref<6xf32, #tpu.memory_space<smem>>
    %c4 = arith.constant 4 : index
    %4 = memref.load %arg0[%c4] : memref<6xf32, #tpu.memory_space<smem>>
    %c5 = arith.constant 5 : index
    %5 = memref.load %arg0[%c5] : memref<6xf32, #tpu.memory_space<smem>>
    %6 = arith.mulf %0, %2 : f32
    %7 = arith.mulf %1, %3 : f32
    %8 = arith.addf %6, %7 : f32
    %9 = arith.mulf %0, %4 : f32
    %10 = arith.mulf %1, %5 : f32
    %c0_0 = arith.constant 0 : index
    %c0_1 = arith.constant 0 : index
    %11 = vector.load %arg4[%c0_0, %c0_1] : memref<128x30xf32, #tpu.memory_space<vmem>>, vector<30x30xf32>
    %c32 = arith.constant 32 : index
    %c0_2 = arith.constant 0 : index
    %12 = vector.load %arg4[%c32, %c0_2] : memref<128x30xf32, #tpu.memory_space<vmem>>, vector<30x30xf32>
    %c64 = arith.constant 64 : index
    %c0_3 = arith.constant 0 : index
    %13 = vector.load %arg4[%c64, %c0_3] : memref<128x30xf32, #tpu.memory_space<vmem>>, vector<30x30xf32>
    %c96 = arith.constant 96 : index
    %c0_4 = arith.constant 0 : index
    %14 = vector.load %arg4[%c96, %c0_4] : memref<128x30xf32, #tpu.memory_space<vmem>>, vector<30x30xf32>
    %15 = vector.broadcast %9 : f32 to vector<30x30xf32>
    %16 = arith.mulf %14, %15 : vector<30x30xf32>
    %17 = vector.broadcast %10 : f32 to vector<30x30xf32>
    %18 = arith.mulf %14, %17 : vector<30x30xf32>
    %19 = vector.broadcast %8 : f32 to vector<30x30xf32>
    %20 = arith.mulf %14, %19 : vector<30x30xf32>
    %21 = arith.mulf %11, %11 : vector<30x30xf32>
    %22 = arith.mulf %16, %21 : vector<30x30xf32>
    %23 = arith.subf %20, %22 : vector<30x30xf32>
    %24 = arith.mulf %12, %12 : vector<30x30xf32>
    %25 = arith.mulf %18, %24 : vector<30x30xf32>
    %26 = arith.subf %23, %25 : vector<30x30xf32>
    %27 = arith.mulf %13, %13 : vector<30x30xf32>
    %28 = arith.mulf %18, %27 : vector<30x30xf32>
    %29 = arith.subf %23, %28 : vector<30x30xf32>
    %30 = arith.mulf %16, %11 : vector<30x30xf32>
    %cst = arith.constant 2.000000e+00 : f32
    %31 = vector.broadcast %cst : f32 to vector<30x30xf32>
    %32 = arith.mulf %31, %30 : vector<30x30xf32>
    %33 = arith.mulf %18, %12 : vector<30x30xf32>
    %cst_5 = arith.constant 2.000000e+00 : f32
    %34 = vector.broadcast %cst_5 : f32 to vector<30x30xf32>
    %35 = arith.mulf %34, %33 : vector<30x30xf32>
    %36 = arith.mulf %18, %13 : vector<30x30xf32>
    %cst_6 = arith.constant 2.000000e+00 : f32
    %37 = vector.broadcast %cst_6 : f32 to vector<30x30xf32>
    %38 = arith.mulf %37, %36 : vector<30x30xf32>
    %39 = tpu.iota {dimensions = array<i32: 0>} : vector<30x1xi32>
    %40 = tpu.iota {dimensions = array<i32: 1>} : vector<1x30xi32>
    %41 = tpu.iota {dimensions = array<i32: 1>} : vector<1x128xi32>
    %42 = tpu.iota {dimensions = array<i32: 0>} : vector<8x128xi32>
    %c0_i32 = arith.constant 0 : i32
    %43 = vector.broadcast %c0_i32 : i32 to vector<8x128xi32>
    %c0_i32_7 = arith.constant 0 : i32
    %c5_i32 = arith.constant 5 : i32
    %44 = arith.addi %c0_i32_7, %c5_i32 : i32
    %c1_i32 = arith.constant 1 : i32
    %45 = scf.for %arg6 = %c0_i32_7 to %44 step %c1_i32 iter_args(%arg7 = %43) -> (vector<8x128xi32>)  : i32 {
      %47 = arith.index_cast %arg6 : i32 to index
      %48 = memref.load %arg1[%47] : memref<5xi32, #tpu.memory_space<smem>>
      %49 = arith.index_cast %48 : i32 to index
      %c0_11 = arith.constant 0 : index
      %50 = vector.load %arg4[%49, %c0_11] : memref<128x30xf32, #tpu.memory_space<vmem>>, vector<1x30xf32>
      %c64_i32 = arith.constant 64 : i32
      %51 = arith.addi %c64_i32, %48 : i32
      %52 = arith.index_cast %51 : i32 to index
      %c0_12 = arith.constant 0 : index
      %53 = vector.load %arg4[%52, %c0_12] : memref<128x30xf32, #tpu.memory_space<vmem>>, vector<1x30xf32>
      %c96_i32 = arith.constant 96 : i32
      %54 = arith.addi %c96_i32, %48 : i32
      %55 = arith.index_cast %54 : i32 to index
      %c0_13 = arith.constant 0 : index
      %56 = vector.load %arg4[%55, %c0_13] : memref<128x30xf32, #tpu.memory_space<vmem>>, vector<1x30xf32>
      %57 = arith.index_cast %arg6 : i32 to index
      %c0_14 = arith.constant 0 : index
      %58 = memref.load %arg2[%57, %c0_14] : memref<5x20xf32, #tpu.memory_space<smem>>
      %59 = arith.index_cast %arg6 : i32 to index
      %c0_15 = arith.constant 0 : index
      %60 = memref.load %arg3[%59, %c0_15] : memref<5x20xf32, #tpu.memory_space<smem>>
      %61 = vector.broadcast %58 : f32 to vector<1x30xf32>
      %62 = arith.subf %61, %50 : vector<1x30xf32>
      %63 = vector.broadcast %60 : f32 to vector<1x30xf32>
      %64 = arith.subf %63, %53 : vector<1x30xf32>
      %65 = arith.mulf %62, %62 : vector<1x30xf32>
      %66 = vector.broadcast %9 : f32 to vector<1x30xf32>
      %67 = arith.mulf %66, %65 : vector<1x30xf32>
      %68 = vector.broadcast %8 : f32 to vector<1x30xf32>
      %69 = arith.subf %68, %67 : vector<1x30xf32>
      %70 = arith.mulf %64, %64 : vector<1x30xf32>
      %71 = vector.broadcast %10 : f32 to vector<1x30xf32>
      %72 = arith.mulf %71, %70 : vector<1x30xf32>
      %73 = arith.subf %69, %72 : vector<1x30xf32>
      %74 = arith.mulf %56, %73 : vector<1x30xf32>
      %c0_i32_16 = arith.constant 0 : i32
      %75 = vector.broadcast %c0_i32_16 : i32 to vector<1x128xi32>
      %c0_i32_17 = arith.constant 0 : i32
      %c2_i32 = arith.constant 2 : i32
      %76 = arith.muli %c2_i32, %c0_i32_17 : i32
      %77 = arith.index_cast %arg6 : i32 to index
      %78 = arith.index_cast %76 : i32 to index
      %79 = memref.load %arg2[%77, %78] : memref<5x20xf32, #tpu.memory_space<smem>>
      %80 = arith.index_cast %arg6 : i32 to index
      %81 = arith.index_cast %76 : i32 to index
      %82 = memref.load %arg3[%80, %81] : memref<5x20xf32, #tpu.memory_space<smem>>
      %83 = arith.mulf %9, %79 : f32
      %84 = arith.mulf %83, %79 : f32
      %85 = arith.mulf %10, %82 : f32
      %86 = arith.mulf %85, %82 : f32
      %87 = arith.addf %84, %86 : f32
      %88 = vector.broadcast %79 : f32 to vector<30x30xf32>
      %89 = arith.mulf %88, %32 : vector<30x30xf32>
      %90 = arith.addf %26, %89 : vector<30x30xf32>
      %91 = vector.broadcast %82 : f32 to vector<30x30xf32>
      %92 = arith.mulf %91, %35 : vector<30x30xf32>
      %93 = arith.addf %90, %92 : vector<30x30xf32>
      %94 = vector.broadcast %87 : f32 to vector<30x30xf32>
      %95 = arith.mulf %94, %14 : vector<30x30xf32>
      %96 = arith.subf %93, %95 : vector<30x30xf32>
      %97 = vector.broadcast %74 : vector<1x30xf32> to vector<30x30xf32>
      %98 = arith.addf %96, %97 : vector<30x30xf32>
      %cst_18 = arith.constant dense<0xFF800000> : vector<30xf32>
      %99 = vector.multi_reduction <maximumf>, %98, %cst_18 [1] : vector<30x30xf32> to vector<30xf32>
      %100 = vector.shape_cast %99 : vector<30xf32> to vector<30x1xf32>
      %101 = vector.broadcast %76 : i32 to vector<1x128xi32>
      %102 = arith.cmpi eq, %41, %101 : vector<1x128xi32>
      %cst_19 = arith.constant dense<0xFF800000> : vector<1xf32>
      %103 = vector.multi_reduction <maximumf>, %100, %cst_19 [0] : vector<30x1xf32> to vector<1xf32>
      %104 = vector.shape_cast %103 : vector<1xf32> to vector<1x1xf32>
      %105 = vector.broadcast %104 : vector<1x1xf32> to vector<30x1xf32>
      %106 = arith.cmpf oge, %100, %105 : vector<30x1xf32>
      %c30_i32 = arith.constant 30 : i32
      %107 = vector.broadcast %c30_i32 : i32 to vector<30x1xi32>
      %108 = arith.select %106, %39, %107 : vector<30x1xi1>, vector<30x1xi32>
      %cst_20 = arith.constant dense<2147483647> : vector<1xi32>
      %109 = vector.multi_reduction <minsi>, %108, %cst_20 [0] : vector<30x1xi32> to vector<1xi32>
      %110 = vector.shape_cast %109 : vector<1xi32> to vector<1x1xi32>
      %111 = vector.shape_cast %110 : vector<1x1xi32> to vector<1x1xi32>
      %112 = vector.broadcast %111 : vector<1x1xi32> to vector<1x128xi32>
      %113 = arith.select %102, %112, %75 : vector<1x128xi1>, vector<1x128xi32>
      %c1_i32_21 = arith.constant 1 : i32
      %114 = arith.addi %76, %c1_i32_21 : i32
      %115 = arith.index_cast %arg6 : i32 to index
      %116 = arith.index_cast %114 : i32 to index
      %117 = memref.load %arg2[%115, %116] : memref<5x20xf32, #tpu.memory_space<smem>>
      %118 = arith.index_cast %arg6 : i32 to index
      %119 = arith.index_cast %114 : i32 to index
      %120 = memref.load %arg3[%118, %119] : memref<5x20xf32, #tpu.memory_space<smem>>
      %121 = arith.mulf %9, %117 : f32
      %122 = arith.mulf %121, %117 : f32
      %123 = arith.mulf %10, %120 : f32
      %124 = arith.mulf %123, %120 : f32
      %125 = arith.addf %122, %124 : f32
      %126 = vector.broadcast %117 : f32 to vector<30x30xf32>
      %127 = arith.mulf %126, %32 : vector<30x30xf32>
      %128 = arith.addf %29, %127 : vector<30x30xf32>
      %129 = vector.broadcast %120 : f32 to vector<30x30xf32>
      %130 = arith.mulf %129, %38 : vector<30x30xf32>
      %131 = arith.addf %128, %130 : vector<30x30xf32>
      %132 = vector.broadcast %125 : f32 to vector<30x30xf32>
      %133 = arith.mulf %132, %14 : vector<30x30xf32>
      %134 = arith.subf %131, %133 : vector<30x30xf32>
      %135 = vector.broadcast %100 : vector<30x1xf32> to vector<30x30xf32>
      %136 = arith.addf %134, %135 : vector<30x30xf32>
      %cst_22 = arith.constant dense<0xFF800000> : vector<30xf32>
      %137 = vector.multi_reduction <maximumf>, %136, %cst_22 [0] : vector<30x30xf32> to vector<30xf32>
      %138 = vector.shape_cast %137 : vector<30xf32> to vector<1x30xf32>
      %139 = vector.broadcast %114 : i32 to vector<1x128xi32>
      %140 = arith.cmpi eq, %41, %139 : vector<1x128xi32>
      %cst_23 = arith.constant dense<0xFF800000> : vector<1xf32>
      %141 = vector.multi_reduction <maximumf>, %138, %cst_23 [1] : vector<1x30xf32> to vector<1xf32>
      %142 = vector.shape_cast %141 : vector<1xf32> to vector<1x1xf32>
      %143 = vector.broadcast %142 : vector<1x1xf32> to vector<1x30xf32>
      %144 = arith.cmpf oge, %138, %143 : vector<1x30xf32>
      %c30_i32_24 = arith.constant 30 : i32
      %145 = vector.broadcast %c30_i32_24 : i32 to vector<1x30xi32>
      %146 = arith.select %144, %40, %145 : vector<1x30xi1>, vector<1x30xi32>
      %cst_25 = arith.constant dense<2147483647> : vector<1xi32>
      %147 = vector.multi_reduction <minsi>, %146, %cst_25 [1] : vector<1x30xi32> to vector<1xi32>
      %148 = vector.shape_cast %147 : vector<1xi32> to vector<1x1xi32>
      %149 = vector.shape_cast %148 : vector<1x1xi32> to vector<1x1xi32>
      %150 = vector.broadcast %149 : vector<1x1xi32> to vector<1x128xi32>
      %151 = arith.select %140, %150, %113 : vector<1x128xi1>, vector<1x128xi32>
      %c1_i32_26 = arith.constant 1 : i32
      %c2_i32_27 = arith.constant 2 : i32
      %152 = arith.muli %c2_i32_27, %c1_i32_26 : i32
      %153 = arith.index_cast %arg6 : i32 to index
      %154 = arith.index_cast %152 : i32 to index
      %155 = memref.load %arg2[%153, %154] : memref<5x20xf32, #tpu.memory_space<smem>>
      %156 = arith.index_cast %arg6 : i32 to index
      %157 = arith.index_cast %152 : i32 to index
      %158 = memref.load %arg3[%156, %157] : memref<5x20xf32, #tpu.memory_space<smem>>
      %159 = arith.mulf %9, %155 : f32
      %160 = arith.mulf %159, %155 : f32
      %161 = arith.mulf %10, %158 : f32
      %162 = arith.mulf %161, %158 : f32
      %163 = arith.addf %160, %162 : f32
      %164 = vector.broadcast %155 : f32 to vector<30x30xf32>
      %165 = arith.mulf %164, %32 : vector<30x30xf32>
      %166 = arith.addf %26, %165 : vector<30x30xf32>
      %167 = vector.broadcast %158 : f32 to vector<30x30xf32>
      %168 = arith.mulf %167, %35 : vector<30x30xf32>
      %169 = arith.addf %166, %168 : vector<30x30xf32>
      %170 = vector.broadcast %163 : f32 to vector<30x30xf32>
      %171 = arith.mulf %170, %14 : vector<30x30xf32>
      %172 = arith.subf %169, %171 : vector<30x30xf32>
      %173 = vector.broadcast %138 : vector<1x30xf32> to vector<30x30xf32>
      %174 = arith.addf %172, %173 : vector<30x30xf32>
      %cst_28 = arith.constant dense<0xFF800000> : vector<30xf32>
      %175 = vector.multi_reduction <maximumf>, %174, %cst_28 [1] : vector<30x30xf32> to vector<30xf32>
      %176 = vector.shape_cast %175 : vector<30xf32> to vector<30x1xf32>
      %177 = vector.broadcast %152 : i32 to vector<1x128xi32>
      %178 = arith.cmpi eq, %41, %177 : vector<1x128xi32>
      %cst_29 = arith.constant dense<0xFF800000> : vector<1xf32>
      %179 = vector.multi_reduction <maximumf>, %176, %cst_29 [0] : vector<30x1xf32> to vector<1xf32>
      %180 = vector.shape_cast %179 : vector<1xf32> to vector<1x1xf32>
      %181 = vector.broadcast %180 : vector<1x1xf32> to vector<30x1xf32>
      %182 = arith.cmpf oge, %176, %181 : vector<30x1xf32>
      %c30_i32_30 = arith.constant 30 : i32
      %183 = vector.broadcast %c30_i32_30 : i32 to vector<30x1xi32>
      %184 = arith.select %182, %39, %183 : vector<30x1xi1>, vector<30x1xi32>
      %cst_31 = arith.constant dense<2147483647> : vector<1xi32>
      %185 = vector.multi_reduction <minsi>, %184, %cst_31 [0] : vector<30x1xi32> to vector<1xi32>
      %186 = vector.shape_cast %185 : vector<1xi32> to vector<1x1xi32>
      %187 = vector.shape_cast %186 : vector<1x1xi32> to vector<1x1xi32>
      %188 = vector.broadcast %187 : vector<1x1xi32> to vector<1x128xi32>
      %189 = arith.select %178, %188, %151 : vector<1x128xi1>, vector<1x128xi32>
      %c1_i32_32 = arith.constant 1 : i32
      %190 = arith.addi %152, %c1_i32_32 : i32
      %191 = arith.index_cast %arg6 : i32 to index
      %192 = arith.index_cast %190 : i32 to index
      %193 = memref.load %arg2[%191, %192] : memref<5x20xf32, #tpu.memory_space<smem>>
      %194 = arith.index_cast %arg6 : i32 to index
      %195 = arith.index_cast %190 : i32 to index
      %196 = memref.load %arg3[%194, %195] : memref<5x20xf32, #tpu.memory_space<smem>>
      %197 = arith.mulf %9, %193 : f32
      %198 = arith.mulf %197, %193 : f32
      %199 = arith.mulf %10, %196 : f32
      %200 = arith.mulf %199, %196 : f32
      %201 = arith.addf %198, %200 : f32
      %202 = vector.broadcast %193 : f32 to vector<30x30xf32>
      %203 = arith.mulf %202, %32 : vector<30x30xf32>
      %204 = arith.addf %29, %203 : vector<30x30xf32>
      %205 = vector.broadcast %196 : f32 to vector<30x30xf32>
      %206 = arith.mulf %205, %38 : vector<30x30xf32>
      %207 = arith.addf %204, %206 : vector<30x30xf32>
      %208 = vector.broadcast %201 : f32 to vector<30x30xf32>
      %209 = arith.mulf %208, %14 : vector<30x30xf32>
      %210 = arith.subf %207, %209 : vector<30x30xf32>
      %211 = vector.broadcast %176 : vector<30x1xf32> to vector<30x30xf32>
      %212 = arith.addf %210, %211 : vector<30x30xf32>
      %cst_33 = arith.constant dense<0xFF800000> : vector<30xf32>
      %213 = vector.multi_reduction <maximumf>, %212, %cst_33 [0] : vector<30x30xf32> to vector<30xf32>
      %214 = vector.shape_cast %213 : vector<30xf32> to vector<1x30xf32>
      %215 = vector.broadcast %190 : i32 to vector<1x128xi32>
      %216 = arith.cmpi eq, %41, %215 : vector<1x128xi32>
      %cst_34 = arith.constant dense<0xFF800000> : vector<1xf32>
      %217 = vector.multi_reduction <maximumf>, %214, %cst_34 [1] : vector<1x30xf32> to vector<1xf32>
      %218 = vector.shape_cast %217 : vector<1xf32> to vector<1x1xf32>
      %219 = vector.broadcast %218 : vector<1x1xf32> to vector<1x30xf32>
      %220 = arith.cmpf oge, %214, %219 : vector<1x30xf32>
      %c30_i32_35 = arith.constant 30 : i32
      %221 = vector.broadcast %c30_i32_35 : i32 to vector<1x30xi32>
      %222 = arith.select %220, %40, %221 : vector<1x30xi1>, vector<1x30xi32>
      %cst_36 = arith.constant dense<2147483647> : vector<1xi32>
      %223 = vector.multi_reduction <minsi>, %222, %cst_36 [1] : vector<1x30xi32> to vector<1xi32>
      %224 = vector.shape_cast %223 : vector<1xi32> to vector<1x1xi32>
      %225 = vector.shape_cast %224 : vector<1x1xi32> to vector<1x1xi32>
      %226 = vector.broadcast %225 : vector<1x1xi32> to vector<1x128xi32>
      %227 = arith.select %216, %226, %189 : vector<1x128xi1>, vector<1x128xi32>
      %c2_i32_37 = arith.constant 2 : i32
      %c2_i32_38 = arith.constant 2 : i32
      %228 = arith.muli %c2_i32_38, %c2_i32_37 : i32
      %229 = arith.index_cast %arg6 : i32 to index
      %230 = arith.index_cast %228 : i32 to index
      %231 = memref.load %arg2[%229, %230] : memref<5x20xf32, #tpu.memory_space<smem>>
      %232 = arith.index_cast %arg6 : i32 to index
      %233 = arith.index_cast %228 : i32 to index
      %234 = memref.load %arg3[%232, %233] : memref<5x20xf32, #tpu.memory_space<smem>>
      %235 = arith.mulf %9, %231 : f32
      %236 = arith.mulf %235, %231 : f32
      %237 = arith.mulf %10, %234 : f32
      %238 = arith.mulf %237, %234 : f32
      %239 = arith.addf %236, %238 : f32
      %240 = vector.broadcast %231 : f32 to vector<30x30xf32>
      %241 = arith.mulf %240, %32 : vector<30x30xf32>
      %242 = arith.addf %26, %241 : vector<30x30xf32>
      %243 = vector.broadcast %234 : f32 to vector<30x30xf32>
      %244 = arith.mulf %243, %35 : vector<30x30xf32>
      %245 = arith.addf %242, %244 : vector<30x30xf32>
      %246 = vector.broadcast %239 : f32 to vector<30x30xf32>
      %247 = arith.mulf %246, %14 : vector<30x30xf32>
      %248 = arith.subf %245, %247 : vector<30x30xf32>
      %249 = vector.broadcast %214 : vector<1x30xf32> to vector<30x30xf32>
      %250 = arith.addf %248, %249 : vector<30x30xf32>
      %cst_39 = arith.constant dense<0xFF800000> : vector<30xf32>
      %251 = vector.multi_reduction <maximumf>, %250, %cst_39 [1] : vector<30x30xf32> to vector<30xf32>
      %252 = vector.shape_cast %251 : vector<30xf32> to vector<30x1xf32>
      %253 = vector.broadcast %228 : i32 to vector<1x128xi32>
      %254 = arith.cmpi eq, %41, %253 : vector<1x128xi32>
      %cst_40 = arith.constant dense<0xFF800000> : vector<1xf32>
      %255 = vector.multi_reduction <maximumf>, %252, %cst_40 [0] : vector<30x1xf32> to vector<1xf32>
      %256 = vector.shape_cast %255 : vector<1xf32> to vector<1x1xf32>
      %257 = vector.broadcast %256 : vector<1x1xf32> to vector<30x1xf32>
      %258 = arith.cmpf oge, %252, %257 : vector<30x1xf32>
      %c30_i32_41 = arith.constant 30 : i32
      %259 = vector.broadcast %c30_i32_41 : i32 to vector<30x1xi32>
      %260 = arith.select %258, %39, %259 : vector<30x1xi1>, vector<30x1xi32>
      %cst_42 = arith.constant dense<2147483647> : vector<1xi32>
      %261 = vector.multi_reduction <minsi>, %260, %cst_42 [0] : vector<30x1xi32> to vector<1xi32>
      %262 = vector.shape_cast %261 : vector<1xi32> to vector<1x1xi32>
      %263 = vector.shape_cast %262 : vector<1x1xi32> to vector<1x1xi32>
      %264 = vector.broadcast %263 : vector<1x1xi32> to vector<1x128xi32>
      %265 = arith.select %254, %264, %227 : vector<1x128xi1>, vector<1x128xi32>
      %c1_i32_43 = arith.constant 1 : i32
      %266 = arith.addi %228, %c1_i32_43 : i32
      %267 = arith.index_cast %arg6 : i32 to index
      %268 = arith.index_cast %266 : i32 to index
      %269 = memref.load %arg2[%267, %268] : memref<5x20xf32, #tpu.memory_space<smem>>
      %270 = arith.index_cast %arg6 : i32 to index
      %271 = arith.index_cast %266 : i32 to index
      %272 = memref.load %arg3[%270, %271] : memref<5x20xf32, #tpu.memory_space<smem>>
      %273 = arith.mulf %9, %269 : f32
      %274 = arith.mulf %273, %269 : f32
      %275 = arith.mulf %10, %272 : f32
      %276 = arith.mulf %275, %272 : f32
      %277 = arith.addf %274, %276 : f32
      %278 = vector.broadcast %269 : f32 to vector<30x30xf32>
      %279 = arith.mulf %278, %32 : vector<30x30xf32>
      %280 = arith.addf %29, %279 : vector<30x30xf32>
      %281 = vector.broadcast %272 : f32 to vector<30x30xf32>
      %282 = arith.mulf %281, %38 : vector<30x30xf32>
      %283 = arith.addf %280, %282 : vector<30x30xf32>
      %284 = vector.broadcast %277 : f32 to vector<30x30xf32>
      %285 = arith.mulf %284, %14 : vector<30x30xf32>
      %286 = arith.subf %283, %285 : vector<30x30xf32>
      %287 = vector.broadcast %252 : vector<30x1xf32> to vector<30x30xf32>
      %288 = arith.addf %286, %287 : vector<30x30xf32>
      %cst_44 = arith.constant dense<0xFF800000> : vector<30xf32>
      %289 = vector.multi_reduction <maximumf>, %288, %cst_44 [0] : vector<30x30xf32> to vector<30xf32>
      %290 = vector.shape_cast %289 : vector<30xf32> to vector<1x30xf32>
      %291 = vector.broadcast %266 : i32 to vector<1x128xi32>
      %292 = arith.cmpi eq, %41, %291 : vector<1x128xi32>
      %cst_45 = arith.constant dense<0xFF800000> : vector<1xf32>
      %293 = vector.multi_reduction <maximumf>, %290, %cst_45 [1] : vector<1x30xf32> to vector<1xf32>
      %294 = vector.shape_cast %293 : vector<1xf32> to vector<1x1xf32>
      %295 = vector.broadcast %294 : vector<1x1xf32> to vector<1x30xf32>
      %296 = arith.cmpf oge, %290, %295 : vector<1x30xf32>
      %c30_i32_46 = arith.constant 30 : i32
      %297 = vector.broadcast %c30_i32_46 : i32 to vector<1x30xi32>
      %298 = arith.select %296, %40, %297 : vector<1x30xi1>, vector<1x30xi32>
      %cst_47 = arith.constant dense<2147483647> : vector<1xi32>
      %299 = vector.multi_reduction <minsi>, %298, %cst_47 [1] : vector<1x30xi32> to vector<1xi32>
      %300 = vector.shape_cast %299 : vector<1xi32> to vector<1x1xi32>
      %301 = vector.shape_cast %300 : vector<1x1xi32> to vector<1x1xi32>
      %302 = vector.broadcast %301 : vector<1x1xi32> to vector<1x128xi32>
      %303 = arith.select %292, %302, %265 : vector<1x128xi1>, vector<1x128xi32>
      %c3_i32 = arith.constant 3 : i32
      %c2_i32_48 = arith.constant 2 : i32
      %304 = arith.muli %c2_i32_48, %c3_i32 : i32
      %305 = arith.index_cast %arg6 : i32 to index
      %306 = arith.index_cast %304 : i32 to index
      %307 = memref.load %arg2[%305, %306] : memref<5x20xf32, #tpu.memory_space<smem>>
      %308 = arith.index_cast %arg6 : i32 to index
      %309 = arith.index_cast %304 : i32 to index
      %310 = memref.load %arg3[%308, %309] : memref<5x20xf32, #tpu.memory_space<smem>>
      %311 = arith.mulf %9, %307 : f32
      %312 = arith.mulf %311, %307 : f32
      %313 = arith.mulf %10, %310 : f32
      %314 = arith.mulf %313, %310 : f32
      %315 = arith.addf %312, %314 : f32
      %316 = vector.broadcast %307 : f32 to vector<30x30xf32>
      %317 = arith.mulf %316, %32 : vector<30x30xf32>
      %318 = arith.addf %26, %317 : vector<30x30xf32>
      %319 = vector.broadcast %310 : f32 to vector<30x30xf32>
      %320 = arith.mulf %319, %35 : vector<30x30xf32>
      %321 = arith.addf %318, %320 : vector<30x30xf32>
      %322 = vector.broadcast %315 : f32 to vector<30x30xf32>
      %323 = arith.mulf %322, %14 : vector<30x30xf32>
      %324 = arith.subf %321, %323 : vector<30x30xf32>
      %325 = vector.broadcast %290 : vector<1x30xf32> to vector<30x30xf32>
      %326 = arith.addf %324, %325 : vector<30x30xf32>
      %cst_49 = arith.constant dense<0xFF800000> : vector<30xf32>
      %327 = vector.multi_reduction <maximumf>, %326, %cst_49 [1] : vector<30x30xf32> to vector<30xf32>
      %328 = vector.shape_cast %327 : vector<30xf32> to vector<30x1xf32>
      %329 = vector.broadcast %304 : i32 to vector<1x128xi32>
      %330 = arith.cmpi eq, %41, %329 : vector<1x128xi32>
      %cst_50 = arith.constant dense<0xFF800000> : vector<1xf32>
      %331 = vector.multi_reduction <maximumf>, %328, %cst_50 [0] : vector<30x1xf32> to vector<1xf32>
      %332 = vector.shape_cast %331 : vector<1xf32> to vector<1x1xf32>
      %333 = vector.broadcast %332 : vector<1x1xf32> to vector<30x1xf32>
      %334 = arith.cmpf oge, %328, %333 : vector<30x1xf32>
      %c30_i32_51 = arith.constant 30 : i32
      %335 = vector.broadcast %c30_i32_51 : i32 to vector<30x1xi32>
      %336 = arith.select %334, %39, %335 : vector<30x1xi1>, vector<30x1xi32>
      %cst_52 = arith.constant dense<2147483647> : vector<1xi32>
      %337 = vector.multi_reduction <minsi>, %336, %cst_52 [0] : vector<30x1xi32> to vector<1xi32>
      %338 = vector.shape_cast %337 : vector<1xi32> to vector<1x1xi32>
      %339 = vector.shape_cast %338 : vector<1x1xi32> to vector<1x1xi32>
      %340 = vector.broadcast %339 : vector<1x1xi32> to vector<1x128xi32>
      %341 = arith.select %330, %340, %303 : vector<1x128xi1>, vector<1x128xi32>
      %c1_i32_53 = arith.constant 1 : i32
      %342 = arith.addi %304, %c1_i32_53 : i32
      %343 = arith.index_cast %arg6 : i32 to index
      %344 = arith.index_cast %342 : i32 to index
      %345 = memref.load %arg2[%343, %344] : memref<5x20xf32, #tpu.memory_space<smem>>
      %346 = arith.index_cast %arg6 : i32 to index
      %347 = arith.index_cast %342 : i32 to index
      %348 = memref.load %arg3[%346, %347] : memref<5x20xf32, #tpu.memory_space<smem>>
      %349 = arith.mulf %9, %345 : f32
      %350 = arith.mulf %349, %345 : f32
      %351 = arith.mulf %10, %348 : f32
      %352 = arith.mulf %351, %348 : f32
      %353 = arith.addf %350, %352 : f32
      %354 = vector.broadcast %345 : f32 to vector<30x30xf32>
      %355 = arith.mulf %354, %32 : vector<30x30xf32>
      %356 = arith.addf %29, %355 : vector<30x30xf32>
      %357 = vector.broadcast %348 : f32 to vector<30x30xf32>
      %358 = arith.mulf %357, %38 : vector<30x30xf32>
      %359 = arith.addf %356, %358 : vector<30x30xf32>
      %360 = vector.broadcast %353 : f32 to vector<30x30xf32>
      %361 = arith.mulf %360, %14 : vector<30x30xf32>
      %362 = arith.subf %359, %361 : vector<30x30xf32>
      %363 = vector.broadcast %328 : vector<30x1xf32> to vector<30x30xf32>
      %364 = arith.addf %362, %363 : vector<30x30xf32>
      %cst_54 = arith.constant dense<0xFF800000> : vector<30xf32>
      %365 = vector.multi_reduction <maximumf>, %364, %cst_54 [0] : vector<30x30xf32> to vector<30xf32>
      %366 = vector.shape_cast %365 : vector<30xf32> to vector<1x30xf32>
      %367 = vector.broadcast %342 : i32 to vector<1x128xi32>
      %368 = arith.cmpi eq, %41, %367 : vector<1x128xi32>
      %cst_55 = arith.constant dense<0xFF800000> : vector<1xf32>
      %369 = vector.multi_reduction <maximumf>, %366, %cst_55 [1] : vector<1x30xf32> to vector<1xf32>
      %370 = vector.shape_cast %369 : vector<1xf32> to vector<1x1xf32>
      %371 = vector.broadcast %370 : vector<1x1xf32> to vector<1x30xf32>
      %372 = arith.cmpf oge, %366, %371 : vector<1x30xf32>
      %c30_i32_56 = arith.constant 30 : i32
      %373 = vector.broadcast %c30_i32_56 : i32 to vector<1x30xi32>
      %374 = arith.select %372, %40, %373 : vector<1x30xi1>, vector<1x30xi32>
      %cst_57 = arith.constant dense<2147483647> : vector<1xi32>
      %375 = vector.multi_reduction <minsi>, %374, %cst_57 [1] : vector<1x30xi32> to vector<1xi32>
      %376 = vector.shape_cast %375 : vector<1xi32> to vector<1x1xi32>
      %377 = vector.shape_cast %376 : vector<1x1xi32> to vector<1x1xi32>
      %378 = vector.broadcast %377 : vector<1x1xi32> to vector<1x128xi32>
      %379 = arith.select %368, %378, %341 : vector<1x128xi1>, vector<1x128xi32>
      %c4_i32 = arith.constant 4 : i32
      %c2_i32_58 = arith.constant 2 : i32
      %380 = arith.muli %c2_i32_58, %c4_i32 : i32
      %381 = arith.index_cast %arg6 : i32 to index
      %382 = arith.index_cast %380 : i32 to index
      %383 = memref.load %arg2[%381, %382] : memref<5x20xf32, #tpu.memory_space<smem>>
      %384 = arith.index_cast %arg6 : i32 to index
      %385 = arith.index_cast %380 : i32 to index
      %386 = memref.load %arg3[%384, %385] : memref<5x20xf32, #tpu.memory_space<smem>>
      %387 = arith.mulf %9, %383 : f32
      %388 = arith.mulf %387, %383 : f32
      %389 = arith.mulf %10, %386 : f32
      %390 = arith.mulf %389, %386 : f32
      %391 = arith.addf %388, %390 : f32
      %392 = vector.broadcast %383 : f32 to vector<30x30xf32>
      %393 = arith.mulf %392, %32 : vector<30x30xf32>
      %394 = arith.addf %26, %393 : vector<30x30xf32>
      %395 = vector.broadcast %386 : f32 to vector<30x30xf32>
      %396 = arith.mulf %395, %35 : vector<30x30xf32>
      %397 = arith.addf %394, %396 : vector<30x30xf32>
      %398 = vector.broadcast %391 : f32 to vector<30x30xf32>
      %399 = arith.mulf %398, %14 : vector<30x30xf32>
      %400 = arith.subf %397, %399 : vector<30x30xf32>
      %401 = vector.broadcast %366 : vector<1x30xf32> to vector<30x30xf32>
      %402 = arith.addf %400, %401 : vector<30x30xf32>
      %cst_59 = arith.constant dense<0xFF800000> : vector<30xf32>
      %403 = vector.multi_reduction <maximumf>, %402, %cst_59 [1] : vector<30x30xf32> to vector<30xf32>
      %404 = vector.shape_cast %403 : vector<30xf32> to vector<30x1xf32>
      %405 = vector.broadcast %380 : i32 to vector<1x128xi32>
      %406 = arith.cmpi eq, %41, %405 : vector<1x128xi32>
      %cst_60 = arith.constant dense<0xFF800000> : vector<1xf32>
      %407 = vector.multi_reduction <maximumf>, %404, %cst_60 [0] : vector<30x1xf32> to vector<1xf32>
      %408 = vector.shape_cast %407 : vector<1xf32> to vector<1x1xf32>
      %409 = vector.broadcast %408 : vector<1x1xf32> to vector<30x1xf32>
      %410 = arith.cmpf oge, %404, %409 : vector<30x1xf32>
      %c30_i32_61 = arith.constant 30 : i32
      %411 = vector.broadcast %c30_i32_61 : i32 to vector<30x1xi32>
      %412 = arith.select %410, %39, %411 : vector<30x1xi1>, vector<30x1xi32>
      %cst_62 = arith.constant dense<2147483647> : vector<1xi32>
      %413 = vector.multi_reduction <minsi>, %412, %cst_62 [0] : vector<30x1xi32> to vector<1xi32>
      %414 = vector.shape_cast %413 : vector<1xi32> to vector<1x1xi32>
      %415 = vector.shape_cast %414 : vector<1x1xi32> to vector<1x1xi32>
      %416 = vector.broadcast %415 : vector<1x1xi32> to vector<1x128xi32>
      %417 = arith.select %406, %416, %379 : vector<1x128xi1>, vector<1x128xi32>
      %c1_i32_63 = arith.constant 1 : i32
      %418 = arith.addi %380, %c1_i32_63 : i32
      %419 = arith.index_cast %arg6 : i32 to index
      %420 = arith.index_cast %418 : i32 to index
      %421 = memref.load %arg2[%419, %420] : memref<5x20xf32, #tpu.memory_space<smem>>
      %422 = arith.index_cast %arg6 : i32 to index
      %423 = arith.index_cast %418 : i32 to index
      %424 = memref.load %arg3[%422, %423] : memref<5x20xf32, #tpu.memory_space<smem>>
      %425 = arith.mulf %9, %421 : f32
      %426 = arith.mulf %425, %421 : f32
      %427 = arith.mulf %10, %424 : f32
      %428 = arith.mulf %427, %424 : f32
      %429 = arith.addf %426, %428 : f32
      %430 = vector.broadcast %421 : f32 to vector<30x30xf32>
      %431 = arith.mulf %430, %32 : vector<30x30xf32>
      %432 = arith.addf %29, %431 : vector<30x30xf32>
      %433 = vector.broadcast %424 : f32 to vector<30x30xf32>
      %434 = arith.mulf %433, %38 : vector<30x30xf32>
      %435 = arith.addf %432, %434 : vector<30x30xf32>
      %436 = vector.broadcast %429 : f32 to vector<30x30xf32>
      %437 = arith.mulf %436, %14 : vector<30x30xf32>
      %438 = arith.subf %435, %437 : vector<30x30xf32>
      %439 = vector.broadcast %404 : vector<30x1xf32> to vector<30x30xf32>
      %440 = arith.addf %438, %439 : vector<30x30xf32>
      %cst_64 = arith.constant dense<0xFF800000> : vector<30xf32>
      %441 = vector.multi_reduction <maximumf>, %440, %cst_64 [0] : vector<30x30xf32> to vector<30xf32>
      %442 = vector.shape_cast %441 : vector<30xf32> to vector<1x30xf32>
      %443 = vector.broadcast %418 : i32 to vector<1x128xi32>
      %444 = arith.cmpi eq, %41, %443 : vector<1x128xi32>
      %cst_65 = arith.constant dense<0xFF800000> : vector<1xf32>
      %445 = vector.multi_reduction <maximumf>, %442, %cst_65 [1] : vector<1x30xf32> to vector<1xf32>
      %446 = vector.shape_cast %445 : vector<1xf32> to vector<1x1xf32>
      %447 = vector.broadcast %446 : vector<1x1xf32> to vector<1x30xf32>
      %448 = arith.cmpf oge, %442, %447 : vector<1x30xf32>
      %c30_i32_66 = arith.constant 30 : i32
      %449 = vector.broadcast %c30_i32_66 : i32 to vector<1x30xi32>
      %450 = arith.select %448, %40, %449 : vector<1x30xi1>, vector<1x30xi32>
      %cst_67 = arith.constant dense<2147483647> : vector<1xi32>
      %451 = vector.multi_reduction <minsi>, %450, %cst_67 [1] : vector<1x30xi32> to vector<1xi32>
      %452 = vector.shape_cast %451 : vector<1xi32> to vector<1x1xi32>
      %453 = vector.shape_cast %452 : vector<1x1xi32> to vector<1x1xi32>
      %454 = vector.broadcast %453 : vector<1x1xi32> to vector<1x128xi32>
      %455 = arith.select %444, %454, %417 : vector<1x128xi1>, vector<1x128xi32>
      %c5_i32_68 = arith.constant 5 : i32
      %c2_i32_69 = arith.constant 2 : i32
      %456 = arith.muli %c2_i32_69, %c5_i32_68 : i32
      %457 = arith.index_cast %arg6 : i32 to index
      %458 = arith.index_cast %456 : i32 to index
      %459 = memref.load %arg2[%457, %458] : memref<5x20xf32, #tpu.memory_space<smem>>
      %460 = arith.index_cast %arg6 : i32 to index
      %461 = arith.index_cast %456 : i32 to index
      %462 = memref.load %arg3[%460, %461] : memref<5x20xf32, #tpu.memory_space<smem>>
      %463 = arith.mulf %9, %459 : f32
      %464 = arith.mulf %463, %459 : f32
      %465 = arith.mulf %10, %462 : f32
      %466 = arith.mulf %465, %462 : f32
      %467 = arith.addf %464, %466 : f32
      %468 = vector.broadcast %459 : f32 to vector<30x30xf32>
      %469 = arith.mulf %468, %32 : vector<30x30xf32>
      %470 = arith.addf %26, %469 : vector<30x30xf32>
      %471 = vector.broadcast %462 : f32 to vector<30x30xf32>
      %472 = arith.mulf %471, %35 : vector<30x30xf32>
      %473 = arith.addf %470, %472 : vector<30x30xf32>
      %474 = vector.broadcast %467 : f32 to vector<30x30xf32>
      %475 = arith.mulf %474, %14 : vector<30x30xf32>
      %476 = arith.subf %473, %475 : vector<30x30xf32>
      %477 = vector.broadcast %442 : vector<1x30xf32> to vector<30x30xf32>
      %478 = arith.addf %476, %477 : vector<30x30xf32>
      %cst_70 = arith.constant dense<0xFF800000> : vector<30xf32>
      %479 = vector.multi_reduction <maximumf>, %478, %cst_70 [1] : vector<30x30xf32> to vector<30xf32>
      %480 = vector.shape_cast %479 : vector<30xf32> to vector<30x1xf32>
      %481 = vector.broadcast %456 : i32 to vector<1x128xi32>
      %482 = arith.cmpi eq, %41, %481 : vector<1x128xi32>
      %cst_71 = arith.constant dense<0xFF800000> : vector<1xf32>
      %483 = vector.multi_reduction <maximumf>, %480, %cst_71 [0] : vector<30x1xf32> to vector<1xf32>
      %484 = vector.shape_cast %483 : vector<1xf32> to vector<1x1xf32>
      %485 = vector.broadcast %484 : vector<1x1xf32> to vector<30x1xf32>
      %486 = arith.cmpf oge, %480, %485 : vector<30x1xf32>
      %c30_i32_72 = arith.constant 30 : i32
      %487 = vector.broadcast %c30_i32_72 : i32 to vector<30x1xi32>
      %488 = arith.select %486, %39, %487 : vector<30x1xi1>, vector<30x1xi32>
      %cst_73 = arith.constant dense<2147483647> : vector<1xi32>
      %489 = vector.multi_reduction <minsi>, %488, %cst_73 [0] : vector<30x1xi32> to vector<1xi32>
      %490 = vector.shape_cast %489 : vector<1xi32> to vector<1x1xi32>
      %491 = vector.shape_cast %490 : vector<1x1xi32> to vector<1x1xi32>
      %492 = vector.broadcast %491 : vector<1x1xi32> to vector<1x128xi32>
      %493 = arith.select %482, %492, %455 : vector<1x128xi1>, vector<1x128xi32>
      %c1_i32_74 = arith.constant 1 : i32
      %494 = arith.addi %456, %c1_i32_74 : i32
      %495 = arith.index_cast %arg6 : i32 to index
      %496 = arith.index_cast %494 : i32 to index
      %497 = memref.load %arg2[%495, %496] : memref<5x20xf32, #tpu.memory_space<smem>>
      %498 = arith.index_cast %arg6 : i32 to index
      %499 = arith.index_cast %494 : i32 to index
      %500 = memref.load %arg3[%498, %499] : memref<5x20xf32, #tpu.memory_space<smem>>
      %501 = arith.mulf %9, %497 : f32
      %502 = arith.mulf %501, %497 : f32
      %503 = arith.mulf %10, %500 : f32
      %504 = arith.mulf %503, %500 : f32
      %505 = arith.addf %502, %504 : f32
      %506 = vector.broadcast %497 : f32 to vector<30x30xf32>
      %507 = arith.mulf %506, %32 : vector<30x30xf32>
      %508 = arith.addf %29, %507 : vector<30x30xf32>
      %509 = vector.broadcast %500 : f32 to vector<30x30xf32>
      %510 = arith.mulf %509, %38 : vector<30x30xf32>
      %511 = arith.addf %508, %510 : vector<30x30xf32>
      %512 = vector.broadcast %505 : f32 to vector<30x30xf32>
      %513 = arith.mulf %512, %14 : vector<30x30xf32>
      %514 = arith.subf %511, %513 : vector<30x30xf32>
      %515 = vector.broadcast %480 : vector<30x1xf32> to vector<30x30xf32>
      %516 = arith.addf %514, %515 : vector<30x30xf32>
      %cst_75 = arith.constant dense<0xFF800000> : vector<30xf32>
      %517 = vector.multi_reduction <maximumf>, %516, %cst_75 [0] : vector<30x30xf32> to vector<30xf32>
      %518 = vector.shape_cast %517 : vector<30xf32> to vector<1x30xf32>
      %519 = vector.broadcast %494 : i32 to vector<1x128xi32>
      %520 = arith.cmpi eq, %41, %519 : vector<1x128xi32>
      %cst_76 = arith.constant dense<0xFF800000> : vector<1xf32>
      %521 = vector.multi_reduction <maximumf>, %518, %cst_76 [1] : vector<1x30xf32> to vector<1xf32>
      %522 = vector.shape_cast %521 : vector<1xf32> to vector<1x1xf32>
      %523 = vector.broadcast %522 : vector<1x1xf32> to vector<1x30xf32>
      %524 = arith.cmpf oge, %518, %523 : vector<1x30xf32>
      %c30_i32_77 = arith.constant 30 : i32
      %525 = vector.broadcast %c30_i32_77 : i32 to vector<1x30xi32>
      %526 = arith.select %524, %40, %525 : vector<1x30xi1>, vector<1x30xi32>
      %cst_78 = arith.constant dense<2147483647> : vector<1xi32>
      %527 = vector.multi_reduction <minsi>, %526, %cst_78 [1] : vector<1x30xi32> to vector<1xi32>
      %528 = vector.shape_cast %527 : vector<1xi32> to vector<1x1xi32>
      %529 = vector.shape_cast %528 : vector<1x1xi32> to vector<1x1xi32>
      %530 = vector.broadcast %529 : vector<1x1xi32> to vector<1x128xi32>
      %531 = arith.select %520, %530, %493 : vector<1x128xi1>, vector<1x128xi32>
      %c6_i32 = arith.constant 6 : i32
      %c2_i32_79 = arith.constant 2 : i32
      %532 = arith.muli %c2_i32_79, %c6_i32 : i32
      %533 = arith.index_cast %arg6 : i32 to index
      %534 = arith.index_cast %532 : i32 to index
      %535 = memref.load %arg2[%533, %534] : memref<5x20xf32, #tpu.memory_space<smem>>
      %536 = arith.index_cast %arg6 : i32 to index
      %537 = arith.index_cast %532 : i32 to index
      %538 = memref.load %arg3[%536, %537] : memref<5x20xf32, #tpu.memory_space<smem>>
      %539 = arith.mulf %9, %535 : f32
      %540 = arith.mulf %539, %535 : f32
      %541 = arith.mulf %10, %538 : f32
      %542 = arith.mulf %541, %538 : f32
      %543 = arith.addf %540, %542 : f32
      %544 = vector.broadcast %535 : f32 to vector<30x30xf32>
      %545 = arith.mulf %544, %32 : vector<30x30xf32>
      %546 = arith.addf %26, %545 : vector<30x30xf32>
      %547 = vector.broadcast %538 : f32 to vector<30x30xf32>
      %548 = arith.mulf %547, %35 : vector<30x30xf32>
      %549 = arith.addf %546, %548 : vector<30x30xf32>
      %550 = vector.broadcast %543 : f32 to vector<30x30xf32>
      %551 = arith.mulf %550, %14 : vector<30x30xf32>
      %552 = arith.subf %549, %551 : vector<30x30xf32>
      %553 = vector.broadcast %518 : vector<1x30xf32> to vector<30x30xf32>
      %554 = arith.addf %552, %553 : vector<30x30xf32>
      %cst_80 = arith.constant dense<0xFF800000> : vector<30xf32>
      %555 = vector.multi_reduction <maximumf>, %554, %cst_80 [1] : vector<30x30xf32> to vector<30xf32>
      %556 = vector.shape_cast %555 : vector<30xf32> to vector<30x1xf32>
      %557 = vector.broadcast %532 : i32 to vector<1x128xi32>
      %558 = arith.cmpi eq, %41, %557 : vector<1x128xi32>
      %cst_81 = arith.constant dense<0xFF800000> : vector<1xf32>
      %559 = vector.multi_reduction <maximumf>, %556, %cst_81 [0] : vector<30x1xf32> to vector<1xf32>
      %560 = vector.shape_cast %559 : vector<1xf32> to vector<1x1xf32>
      %561 = vector.broadcast %560 : vector<1x1xf32> to vector<30x1xf32>
      %562 = arith.cmpf oge, %556, %561 : vector<30x1xf32>
      %c30_i32_82 = arith.constant 30 : i32
      %563 = vector.broadcast %c30_i32_82 : i32 to vector<30x1xi32>
      %564 = arith.select %562, %39, %563 : vector<30x1xi1>, vector<30x1xi32>
      %cst_83 = arith.constant dense<2147483647> : vector<1xi32>
      %565 = vector.multi_reduction <minsi>, %564, %cst_83 [0] : vector<30x1xi32> to vector<1xi32>
      %566 = vector.shape_cast %565 : vector<1xi32> to vector<1x1xi32>
      %567 = vector.shape_cast %566 : vector<1x1xi32> to vector<1x1xi32>
      %568 = vector.broadcast %567 : vector<1x1xi32> to vector<1x128xi32>
      %569 = arith.select %558, %568, %531 : vector<1x128xi1>, vector<1x128xi32>
      %c1_i32_84 = arith.constant 1 : i32
      %570 = arith.addi %532, %c1_i32_84 : i32
      %571 = arith.index_cast %arg6 : i32 to index
      %572 = arith.index_cast %570 : i32 to index
      %573 = memref.load %arg2[%571, %572] : memref<5x20xf32, #tpu.memory_space<smem>>
      %574 = arith.index_cast %arg6 : i32 to index
      %575 = arith.index_cast %570 : i32 to index
      %576 = memref.load %arg3[%574, %575] : memref<5x20xf32, #tpu.memory_space<smem>>
      %577 = arith.mulf %9, %573 : f32
      %578 = arith.mulf %577, %573 : f32
      %579 = arith.mulf %10, %576 : f32
      %580 = arith.mulf %579, %576 : f32
      %581 = arith.addf %578, %580 : f32
      %582 = vector.broadcast %573 : f32 to vector<30x30xf32>
      %583 = arith.mulf %582, %32 : vector<30x30xf32>
      %584 = arith.addf %29, %583 : vector<30x30xf32>
      %585 = vector.broadcast %576 : f32 to vector<30x30xf32>
      %586 = arith.mulf %585, %38 : vector<30x30xf32>
      %587 = arith.addf %584, %586 : vector<30x30xf32>
      %588 = vector.broadcast %581 : f32 to vector<30x30xf32>
      %589 = arith.mulf %588, %14 : vector<30x30xf32>
      %590 = arith.subf %587, %589 : vector<30x30xf32>
      %591 = vector.broadcast %556 : vector<30x1xf32> to vector<30x30xf32>
      %592 = arith.addf %590, %591 : vector<30x30xf32>
      %cst_85 = arith.constant dense<0xFF800000> : vector<30xf32>
      %593 = vector.multi_reduction <maximumf>, %592, %cst_85 [0] : vector<30x30xf32> to vector<30xf32>
      %594 = vector.shape_cast %593 : vector<30xf32> to vector<1x30xf32>
      %595 = vector.broadcast %570 : i32 to vector<1x128xi32>
      %596 = arith.cmpi eq, %41, %595 : vector<1x128xi32>
      %cst_86 = arith.constant dense<0xFF800000> : vector<1xf32>
      %597 = vector.multi_reduction <maximumf>, %594, %cst_86 [1] : vector<1x30xf32> to vector<1xf32>
      %598 = vector.shape_cast %597 : vector<1xf32> to vector<1x1xf32>
      %599 = vector.broadcast %598 : vector<1x1xf32> to vector<1x30xf32>
      %600 = arith.cmpf oge, %594, %599 : vector<1x30xf32>
      %c30_i32_87 = arith.constant 30 : i32
      %601 = vector.broadcast %c30_i32_87 : i32 to vector<1x30xi32>
      %602 = arith.select %600, %40, %601 : vector<1x30xi1>, vector<1x30xi32>
      %cst_88 = arith.constant dense<2147483647> : vector<1xi32>
      %603 = vector.multi_reduction <minsi>, %602, %cst_88 [1] : vector<1x30xi32> to vector<1xi32>
      %604 = vector.shape_cast %603 : vector<1xi32> to vector<1x1xi32>
      %605 = vector.shape_cast %604 : vector<1x1xi32> to vector<1x1xi32>
      %606 = vector.broadcast %605 : vector<1x1xi32> to vector<1x128xi32>
      %607 = arith.select %596, %606, %569 : vector<1x128xi1>, vector<1x128xi32>
      %c7_i32 = arith.constant 7 : i32
      %c2_i32_89 = arith.constant 2 : i32
      %608 = arith.muli %c2_i32_89, %c7_i32 : i32
      %609 = arith.index_cast %arg6 : i32 to index
      %610 = arith.index_cast %608 : i32 to index
      %611 = memref.load %arg2[%609, %610] : memref<5x20xf32, #tpu.memory_space<smem>>
      %612 = arith.index_cast %arg6 : i32 to index
      %613 = arith.index_cast %608 : i32 to index
      %614 = memref.load %arg3[%612, %613] : memref<5x20xf32, #tpu.memory_space<smem>>
      %615 = arith.mulf %9, %611 : f32
      %616 = arith.mulf %615, %611 : f32
      %617 = arith.mulf %10, %614 : f32
      %618 = arith.mulf %617, %614 : f32
      %619 = arith.addf %616, %618 : f32
      %620 = vector.broadcast %611 : f32 to vector<30x30xf32>
      %621 = arith.mulf %620, %32 : vector<30x30xf32>
      %622 = arith.addf %26, %621 : vector<30x30xf32>
      %623 = vector.broadcast %614 : f32 to vector<30x30xf32>
      %624 = arith.mulf %623, %35 : vector<30x30xf32>
      %625 = arith.addf %622, %624 : vector<30x30xf32>
      %626 = vector.broadcast %619 : f32 to vector<30x30xf32>
      %627 = arith.mulf %626, %14 : vector<30x30xf32>
      %628 = arith.subf %625, %627 : vector<30x30xf32>
      %629 = vector.broadcast %594 : vector<1x30xf32> to vector<30x30xf32>
      %630 = arith.addf %628, %629 : vector<30x30xf32>
      %cst_90 = arith.constant dense<0xFF800000> : vector<30xf32>
      %631 = vector.multi_reduction <maximumf>, %630, %cst_90 [1] : vector<30x30xf32> to vector<30xf32>
      %632 = vector.shape_cast %631 : vector<30xf32> to vector<30x1xf32>
      %633 = vector.broadcast %608 : i32 to vector<1x128xi32>
      %634 = arith.cmpi eq, %41, %633 : vector<1x128xi32>
      %cst_91 = arith.constant dense<0xFF800000> : vector<1xf32>
      %635 = vector.multi_reduction <maximumf>, %632, %cst_91 [0] : vector<30x1xf32> to vector<1xf32>
      %636 = vector.shape_cast %635 : vector<1xf32> to vector<1x1xf32>
      %637 = vector.broadcast %636 : vector<1x1xf32> to vector<30x1xf32>
      %638 = arith.cmpf oge, %632, %637 : vector<30x1xf32>
      %c30_i32_92 = arith.constant 30 : i32
      %639 = vector.broadcast %c30_i32_92 : i32 to vector<30x1xi32>
      %640 = arith.select %638, %39, %639 : vector<30x1xi1>, vector<30x1xi32>
      %cst_93 = arith.constant dense<2147483647> : vector<1xi32>
      %641 = vector.multi_reduction <minsi>, %640, %cst_93 [0] : vector<30x1xi32> to vector<1xi32>
      %642 = vector.shape_cast %641 : vector<1xi32> to vector<1x1xi32>
      %643 = vector.shape_cast %642 : vector<1x1xi32> to vector<1x1xi32>
      %644 = vector.broadcast %643 : vector<1x1xi32> to vector<1x128xi32>
      %645 = arith.select %634, %644, %607 : vector<1x128xi1>, vector<1x128xi32>
      %c1_i32_94 = arith.constant 1 : i32
      %646 = arith.addi %608, %c1_i32_94 : i32
      %647 = arith.index_cast %arg6 : i32 to index
      %648 = arith.index_cast %646 : i32 to index
      %649 = memref.load %arg2[%647, %648] : memref<5x20xf32, #tpu.memory_space<smem>>
      %650 = arith.index_cast %arg6 : i32 to index
      %651 = arith.index_cast %646 : i32 to index
      %652 = memref.load %arg3[%650, %651] : memref<5x20xf32, #tpu.memory_space<smem>>
      %653 = arith.mulf %9, %649 : f32
      %654 = arith.mulf %653, %649 : f32
      %655 = arith.mulf %10, %652 : f32
      %656 = arith.mulf %655, %652 : f32
      %657 = arith.addf %654, %656 : f32
      %658 = vector.broadcast %649 : f32 to vector<30x30xf32>
      %659 = arith.mulf %658, %32 : vector<30x30xf32>
      %660 = arith.addf %29, %659 : vector<30x30xf32>
      %661 = vector.broadcast %652 : f32 to vector<30x30xf32>
      %662 = arith.mulf %661, %38 : vector<30x30xf32>
      %663 = arith.addf %660, %662 : vector<30x30xf32>
      %664 = vector.broadcast %657 : f32 to vector<30x30xf32>
      %665 = arith.mulf %664, %14 : vector<30x30xf32>
      %666 = arith.subf %663, %665 : vector<30x30xf32>
      %667 = vector.broadcast %632 : vector<30x1xf32> to vector<30x30xf32>
      %668 = arith.addf %666, %667 : vector<30x30xf32>
      %cst_95 = arith.constant dense<0xFF800000> : vector<30xf32>
      %669 = vector.multi_reduction <maximumf>, %668, %cst_95 [0] : vector<30x30xf32> to vector<30xf32>
      %670 = vector.shape_cast %669 : vector<30xf32> to vector<1x30xf32>
      %671 = vector.broadcast %646 : i32 to vector<1x128xi32>
      %672 = arith.cmpi eq, %41, %671 : vector<1x128xi32>
      %cst_96 = arith.constant dense<0xFF800000> : vector<1xf32>
      %673 = vector.multi_reduction <maximumf>, %670, %cst_96 [1] : vector<1x30xf32> to vector<1xf32>
      %674 = vector.shape_cast %673 : vector<1xf32> to vector<1x1xf32>
      %675 = vector.broadcast %674 : vector<1x1xf32> to vector<1x30xf32>
      %676 = arith.cmpf oge, %670, %675 : vector<1x30xf32>
      %c30_i32_97 = arith.constant 30 : i32
      %677 = vector.broadcast %c30_i32_97 : i32 to vector<1x30xi32>
      %678 = arith.select %676, %40, %677 : vector<1x30xi1>, vector<1x30xi32>
      %cst_98 = arith.constant dense<2147483647> : vector<1xi32>
      %679 = vector.multi_reduction <minsi>, %678, %cst_98 [1] : vector<1x30xi32> to vector<1xi32>
      %680 = vector.shape_cast %679 : vector<1xi32> to vector<1x1xi32>
      %681 = vector.shape_cast %680 : vector<1x1xi32> to vector<1x1xi32>
      %682 = vector.broadcast %681 : vector<1x1xi32> to vector<1x128xi32>
      %683 = arith.select %672, %682, %645 : vector<1x128xi1>, vector<1x128xi32>
      %c8_i32 = arith.constant 8 : i32
      %c2_i32_99 = arith.constant 2 : i32
      %684 = arith.muli %c2_i32_99, %c8_i32 : i32
      %685 = arith.index_cast %arg6 : i32 to index
      %686 = arith.index_cast %684 : i32 to index
      %687 = memref.load %arg2[%685, %686] : memref<5x20xf32, #tpu.memory_space<smem>>
      %688 = arith.index_cast %arg6 : i32 to index
      %689 = arith.index_cast %684 : i32 to index
      %690 = memref.load %arg3[%688, %689] : memref<5x20xf32, #tpu.memory_space<smem>>
      %691 = arith.mulf %9, %687 : f32
      %692 = arith.mulf %691, %687 : f32
      %693 = arith.mulf %10, %690 : f32
      %694 = arith.mulf %693, %690 : f32
      %695 = arith.addf %692, %694 : f32
      %696 = vector.broadcast %687 : f32 to vector<30x30xf32>
      %697 = arith.mulf %696, %32 : vector<30x30xf32>
      %698 = arith.addf %26, %697 : vector<30x30xf32>
      %699 = vector.broadcast %690 : f32 to vector<30x30xf32>
      %700 = arith.mulf %699, %35 : vector<30x30xf32>
      %701 = arith.addf %698, %700 : vector<30x30xf32>
      %702 = vector.broadcast %695 : f32 to vector<30x30xf32>
      %703 = arith.mulf %702, %14 : vector<30x30xf32>
      %704 = arith.subf %701, %703 : vector<30x30xf32>
      %705 = vector.broadcast %670 : vector<1x30xf32> to vector<30x30xf32>
      %706 = arith.addf %704, %705 : vector<30x30xf32>
      %cst_100 = arith.constant dense<0xFF800000> : vector<30xf32>
      %707 = vector.multi_reduction <maximumf>, %706, %cst_100 [1] : vector<30x30xf32> to vector<30xf32>
      %708 = vector.shape_cast %707 : vector<30xf32> to vector<30x1xf32>
      %709 = vector.broadcast %684 : i32 to vector<1x128xi32>
      %710 = arith.cmpi eq, %41, %709 : vector<1x128xi32>
      %cst_101 = arith.constant dense<0xFF800000> : vector<1xf32>
      %711 = vector.multi_reduction <maximumf>, %708, %cst_101 [0] : vector<30x1xf32> to vector<1xf32>
      %712 = vector.shape_cast %711 : vector<1xf32> to vector<1x1xf32>
      %713 = vector.broadcast %712 : vector<1x1xf32> to vector<30x1xf32>
      %714 = arith.cmpf oge, %708, %713 : vector<30x1xf32>
      %c30_i32_102 = arith.constant 30 : i32
      %715 = vector.broadcast %c30_i32_102 : i32 to vector<30x1xi32>
      %716 = arith.select %714, %39, %715 : vector<30x1xi1>, vector<30x1xi32>
      %cst_103 = arith.constant dense<2147483647> : vector<1xi32>
      %717 = vector.multi_reduction <minsi>, %716, %cst_103 [0] : vector<30x1xi32> to vector<1xi32>
      %718 = vector.shape_cast %717 : vector<1xi32> to vector<1x1xi32>
      %719 = vector.shape_cast %718 : vector<1x1xi32> to vector<1x1xi32>
      %720 = vector.broadcast %719 : vector<1x1xi32> to vector<1x128xi32>
      %721 = arith.select %710, %720, %683 : vector<1x128xi1>, vector<1x128xi32>
      %c1_i32_104 = arith.constant 1 : i32
      %722 = arith.addi %684, %c1_i32_104 : i32
      %723 = arith.index_cast %arg6 : i32 to index
      %724 = arith.index_cast %722 : i32 to index
      %725 = memref.load %arg2[%723, %724] : memref<5x20xf32, #tpu.memory_space<smem>>
      %726 = arith.index_cast %arg6 : i32 to index
      %727 = arith.index_cast %722 : i32 to index
      %728 = memref.load %arg3[%726, %727] : memref<5x20xf32, #tpu.memory_space<smem>>
      %729 = arith.mulf %9, %725 : f32
      %730 = arith.mulf %729, %725 : f32
      %731 = arith.mulf %10, %728 : f32
      %732 = arith.mulf %731, %728 : f32
      %733 = arith.addf %730, %732 : f32
      %734 = vector.broadcast %725 : f32 to vector<30x30xf32>
      %735 = arith.mulf %734, %32 : vector<30x30xf32>
      %736 = arith.addf %29, %735 : vector<30x30xf32>
      %737 = vector.broadcast %728 : f32 to vector<30x30xf32>
      %738 = arith.mulf %737, %38 : vector<30x30xf32>
      %739 = arith.addf %736, %738 : vector<30x30xf32>
      %740 = vector.broadcast %733 : f32 to vector<30x30xf32>
      %741 = arith.mulf %740, %14 : vector<30x30xf32>
      %742 = arith.subf %739, %741 : vector<30x30xf32>
      %743 = vector.broadcast %708 : vector<30x1xf32> to vector<30x30xf32>
      %744 = arith.addf %742, %743 : vector<30x30xf32>
      %cst_105 = arith.constant dense<0xFF800000> : vector<30xf32>
      %745 = vector.multi_reduction <maximumf>, %744, %cst_105 [0] : vector<30x30xf32> to vector<30xf32>
      %746 = vector.shape_cast %745 : vector<30xf32> to vector<1x30xf32>
      %747 = vector.broadcast %722 : i32 to vector<1x128xi32>
      %748 = arith.cmpi eq, %41, %747 : vector<1x128xi32>
      %cst_106 = arith.constant dense<0xFF800000> : vector<1xf32>
      %749 = vector.multi_reduction <maximumf>, %746, %cst_106 [1] : vector<1x30xf32> to vector<1xf32>
      %750 = vector.shape_cast %749 : vector<1xf32> to vector<1x1xf32>
      %751 = vector.broadcast %750 : vector<1x1xf32> to vector<1x30xf32>
      %752 = arith.cmpf oge, %746, %751 : vector<1x30xf32>
      %c30_i32_107 = arith.constant 30 : i32
      %753 = vector.broadcast %c30_i32_107 : i32 to vector<1x30xi32>
      %754 = arith.select %752, %40, %753 : vector<1x30xi1>, vector<1x30xi32>
      %cst_108 = arith.constant dense<2147483647> : vector<1xi32>
      %755 = vector.multi_reduction <minsi>, %754, %cst_108 [1] : vector<1x30xi32> to vector<1xi32>
      %756 = vector.shape_cast %755 : vector<1xi32> to vector<1x1xi32>
      %757 = vector.shape_cast %756 : vector<1x1xi32> to vector<1x1xi32>
      %758 = vector.broadcast %757 : vector<1x1xi32> to vector<1x128xi32>
      %759 = arith.select %748, %758, %721 : vector<1x128xi1>, vector<1x128xi32>
      %c9_i32 = arith.constant 9 : i32
      %c2_i32_109 = arith.constant 2 : i32
      %760 = arith.muli %c2_i32_109, %c9_i32 : i32
      %761 = arith.index_cast %arg6 : i32 to index
      %762 = arith.index_cast %760 : i32 to index
      %763 = memref.load %arg2[%761, %762] : memref<5x20xf32, #tpu.memory_space<smem>>
      %764 = arith.index_cast %arg6 : i32 to index
      %765 = arith.index_cast %760 : i32 to index
      %766 = memref.load %arg3[%764, %765] : memref<5x20xf32, #tpu.memory_space<smem>>
      %767 = arith.mulf %9, %763 : f32
      %768 = arith.mulf %767, %763 : f32
      %769 = arith.mulf %10, %766 : f32
      %770 = arith.mulf %769, %766 : f32
      %771 = arith.addf %768, %770 : f32
      %772 = vector.broadcast %763 : f32 to vector<30x30xf32>
      %773 = arith.mulf %772, %32 : vector<30x30xf32>
      %774 = arith.addf %26, %773 : vector<30x30xf32>
      %775 = vector.broadcast %766 : f32 to vector<30x30xf32>
      %776 = arith.mulf %775, %35 : vector<30x30xf32>
      %777 = arith.addf %774, %776 : vector<30x30xf32>
      %778 = vector.broadcast %771 : f32 to vector<30x30xf32>
      %779 = arith.mulf %778, %14 : vector<30x30xf32>
      %780 = arith.subf %777, %779 : vector<30x30xf32>
      %781 = vector.broadcast %746 : vector<1x30xf32> to vector<30x30xf32>
      %782 = arith.addf %780, %781 : vector<30x30xf32>
      %cst_110 = arith.constant dense<0xFF800000> : vector<30xf32>
      %783 = vector.multi_reduction <maximumf>, %782, %cst_110 [1] : vector<30x30xf32> to vector<30xf32>
      %784 = vector.shape_cast %783 : vector<30xf32> to vector<30x1xf32>
      %785 = vector.broadcast %760 : i32 to vector<1x128xi32>
      %786 = arith.cmpi eq, %41, %785 : vector<1x128xi32>
      %cst_111 = arith.constant dense<0xFF800000> : vector<1xf32>
      %787 = vector.multi_reduction <maximumf>, %784, %cst_111 [0] : vector<30x1xf32> to vector<1xf32>
      %788 = vector.shape_cast %787 : vector<1xf32> to vector<1x1xf32>
      %789 = vector.broadcast %788 : vector<1x1xf32> to vector<30x1xf32>
      %790 = arith.cmpf oge, %784, %789 : vector<30x1xf32>
      %c30_i32_112 = arith.constant 30 : i32
      %791 = vector.broadcast %c30_i32_112 : i32 to vector<30x1xi32>
      %792 = arith.select %790, %39, %791 : vector<30x1xi1>, vector<30x1xi32>
      %cst_113 = arith.constant dense<2147483647> : vector<1xi32>
      %793 = vector.multi_reduction <minsi>, %792, %cst_113 [0] : vector<30x1xi32> to vector<1xi32>
      %794 = vector.shape_cast %793 : vector<1xi32> to vector<1x1xi32>
      %795 = vector.shape_cast %794 : vector<1x1xi32> to vector<1x1xi32>
      %796 = vector.broadcast %795 : vector<1x1xi32> to vector<1x128xi32>
      %797 = arith.select %786, %796, %759 : vector<1x128xi1>, vector<1x128xi32>
      %c1_i32_114 = arith.constant 1 : i32
      %798 = arith.addi %760, %c1_i32_114 : i32
      %799 = arith.index_cast %arg6 : i32 to index
      %800 = arith.index_cast %798 : i32 to index
      %801 = memref.load %arg2[%799, %800] : memref<5x20xf32, #tpu.memory_space<smem>>
      %802 = arith.index_cast %arg6 : i32 to index
      %803 = arith.index_cast %798 : i32 to index
      %804 = memref.load %arg3[%802, %803] : memref<5x20xf32, #tpu.memory_space<smem>>
      %805 = arith.mulf %9, %801 : f32
      %806 = arith.mulf %805, %801 : f32
      %807 = arith.mulf %10, %804 : f32
      %808 = arith.mulf %807, %804 : f32
      %809 = arith.addf %806, %808 : f32
      %810 = vector.broadcast %801 : f32 to vector<30x30xf32>
      %811 = arith.mulf %810, %32 : vector<30x30xf32>
      %812 = arith.addf %29, %811 : vector<30x30xf32>
      %813 = vector.broadcast %804 : f32 to vector<30x30xf32>
      %814 = arith.mulf %813, %38 : vector<30x30xf32>
      %815 = arith.addf %812, %814 : vector<30x30xf32>
      %816 = vector.broadcast %809 : f32 to vector<30x30xf32>
      %817 = arith.mulf %816, %14 : vector<30x30xf32>
      %818 = arith.subf %815, %817 : vector<30x30xf32>
      %819 = vector.broadcast %784 : vector<30x1xf32> to vector<30x30xf32>
      %820 = arith.addf %818, %819 : vector<30x30xf32>
      %cst_115 = arith.constant dense<0xFF800000> : vector<30xf32>
      %821 = vector.multi_reduction <maximumf>, %820, %cst_115 [0] : vector<30x30xf32> to vector<30xf32>
      %822 = vector.shape_cast %821 : vector<30xf32> to vector<1x30xf32>
      %823 = vector.broadcast %798 : i32 to vector<1x128xi32>
      %824 = arith.cmpi eq, %41, %823 : vector<1x128xi32>
      %cst_116 = arith.constant dense<0xFF800000> : vector<1xf32>
      %825 = vector.multi_reduction <maximumf>, %822, %cst_116 [1] : vector<1x30xf32> to vector<1xf32>
      %826 = vector.shape_cast %825 : vector<1xf32> to vector<1x1xf32>
      %827 = vector.broadcast %826 : vector<1x1xf32> to vector<1x30xf32>
      %828 = arith.cmpf oge, %822, %827 : vector<1x30xf32>
      %c30_i32_117 = arith.constant 30 : i32
      %829 = vector.broadcast %c30_i32_117 : i32 to vector<1x30xi32>
      %830 = arith.select %828, %40, %829 : vector<1x30xi1>, vector<1x30xi32>
      %cst_118 = arith.constant dense<2147483647> : vector<1xi32>
      %831 = vector.multi_reduction <minsi>, %830, %cst_118 [1] : vector<1x30xi32> to vector<1xi32>
      %832 = vector.shape_cast %831 : vector<1xi32> to vector<1x1xi32>
      %833 = vector.shape_cast %832 : vector<1x1xi32> to vector<1x1xi32>
      %834 = vector.broadcast %833 : vector<1x1xi32> to vector<1x128xi32>
      %835 = arith.select %824, %834, %797 : vector<1x128xi1>, vector<1x128xi32>
      %c10_i32 = arith.constant 10 : i32
      %836 = vector.broadcast %arg6 : i32 to vector<8x128xi32>
      %837 = arith.cmpi eq, %42, %836 : vector<8x128xi32>
      %838 = vector.shape_cast %835 : vector<1x128xi32> to vector<1x128xi32>
      %839 = vector.broadcast %838 : vector<1x128xi32> to vector<8x128xi32>
      %840 = arith.select %837, %839, %arg7 : vector<8x128xi1>, vector<8x128xi32>
      scf.yield %840 : vector<8x128xi32>
    }
    %c5_i32_8 = arith.constant 5 : i32
    %c0_9 = arith.constant 0 : index
    %c0_10 = arith.constant 0 : index
    %46 = vector.load %arg5[%c0_9, %c0_10] : memref<8x128xi32, #tpu.memory_space<vmem>>, vector<8x128xi32>
    tpu.vector_store %arg5[%c0_9, %c0_10], %45 {strides = array<i32>} : memref<8x128xi32, #tpu.memory_space<vmem>>, vector<8x128xi32>,
    return
  }
}

</mosaic_0001>

<bundles_post_ra>
// kernel: tpu_custom_call.1
= control target key start
LH: loop header
LB: loop body
LE: loop exit
PB: predicated region body
PF: predicated region fallthrough
CT: control target
= control target key end

     0   :  { %10 = vsyncpa [#allocation4], 0  ;;  %s3260_s0 = inlined_call_operand.vmem [shape: f32[6], index: 0, kind: input, shape index: {}]   ;;  %s3261_s1 = inlined_call_operand.vmem [shape: s32[5], index: 1, kind: input, shape index: {}]   ;;  %s3262_s2 = inlined_call_operand.vmem [shape: f32[5,20], index: 2, kind: input, shape index: {}]   ;;  %s3263_s3 = inlined_call_operand.vmem [shape: f32[5,20], index: 3, kind: input, shape index: {}]   ;;  %s3264_s4 = inlined_call_operand.vmem [shape: f32[128,30], index: 4, kind: input, shape index: {}]   ;;  %s3265_s5 = inlined_call_operand.hbm [shape: s32[8,128], index: 5, kind: output, shape index: {}]  }
   0x1   :  { %11 = vsyncpa [#allocation6], 0 }
   0x2   :  { %12 = vsyncpa [#allocation9], 0  ;;  %s30_s20 = sshll.u32 %s3261_s1, 4  ;;  %s31_s20 = int_to_ptr.vmem [resolvable:$true] %s30_s20 }
   0x3   :  { %13 = vsyncpa [#allocation3], 0  ;;  %s20_s23 = sshll.u32 %s3260_s0, 4  ;;  %s1883_s24 = scalar_lea.vmem %s31_s20, 16  ;;  %s21_s23 = int_to_ptr.vmem [resolvable:$true] %s20_s23 }
   0x4   :  { %p1884_p0 = scmp.ne.s32.totalorder %s31_s20, %s1883_s24  ;;  %p1888_p1 = scmp.lt.s32.totalorder %s31_s20, %s31_s20 }
   0x5   :  { %p1889_p2 = scmp.lt.s32.totalorder %s1883_s24, %s1883_s24 }
   0x7   :  { %p1890_p3 = por %p1889_p2, %p1888_p1 }
   0x9   :  { %p1891_p4 = pnand %p1890_p3, %p1884_p0 }
   0xb   :  { %1894 = shalt.err (!%p1891_p4)
}
   0xc   :  { %s1977_s25 = smov [#allocation5]   ;;  %s1895_s26 = scalar_lea.vmem %s21_s23, 16 }
   0xd   :  { %33 = dma.vmem_to_smem %s31_s20, 16, %s1977_s25, [#allocation6]  }
   0xe   :  { %p1896_p5 = scmp.ne.s32.totalorder %s21_s23, %s1895_s26  ;;  %p1900_p6 = scmp.lt.s32.totalorder %s21_s23, %s21_s23 }
   0xf   :  { %p1901_p7 = scmp.lt.s32.totalorder %s1895_s26, %s1895_s26 }
  0x11   :  { %p1902_p8 = por %p1901_p7, %p1900_p6 }
  0x13   :  { %p1903_p9 = pnand %p1902_p8, %p1896_p5 }
  0x15   :  { %1906 = shalt.err (!%p1903_p9)
}
  0x16   :  { %s1978_s1 = smov [#allocation2]   ;;  %s40_s28 = sshll.u32 %s3262_s2, 4  ;;  %s41_s28 = int_to_ptr.vmem [resolvable:$true] %s40_s28 }
  0x17   :  { %23 = dma.vmem_to_smem %s21_s23, 16, %s1978_s1, [#allocation4]  }
  0x18   :  { %s50_s6 = sshll.u32 %s3263_s3, 4  ;;  %s1907_s7 = scalar_lea.vmem %s41_s28, 128  ;;  %s51_s6 = int_to_ptr.vmem [resolvable:$true] %s50_s6 }
  0x19   :  { %p1908_p10 = scmp.ne.s32.totalorder %s41_s28, %s1907_s7  ;;  %p1912_p11 = scmp.lt.s32.totalorder %s41_s28, %s41_s28 }
  0x1a   :  { %p1913_p12 = scmp.lt.s32.totalorder %s1907_s7, %s1907_s7 }
  0x1c   :  { %p1914_p13 = por %p1913_p12, %p1912_p11 }
  0x1e   :  { %p1915_p0 = pnand %p1914_p13, %p1908_p10 }
  0x20   :  { %1918 = shalt.err (!%p1915_p0)
}
  0x21   :  { %s1979_s8 = smov [#allocation7]   ;;  %s1919_s9 = scalar_lea.vmem %s51_s6, 128 }
  0x22   :  { %43 = dma.vmem_to_smem %s41_s28, 128, %s1979_s8, [#allocation6]  }
  0x23   :  { %p1920_p1 = scmp.ne.s32.totalorder %s51_s6, %s1919_s9  ;;  %p1924_p2 = scmp.lt.s32.totalorder %s51_s6, %s51_s6 }
  0x24   :  { %p1925_p3 = scmp.lt.s32.totalorder %s1919_s9, %s1919_s9 }
  0x26   :  { %p1926_p4 = por %p1925_p3, %p1924_p2 }
  0x28   :  { %p1927_p5 = pnand %p1926_p4, %p1920_p1 }
  0x2a   :  { %1930 = shalt.err (!%p1927_p5)
}
  0x2b   :  { %s1980_s2 = smov [#allocation8]  }
  0x2c   :  { %53 = dma.vmem_to_smem %s51_s6, 128, %s1980_s2, [#allocation9]  }
  0x2d   :  { %1961 = dma.done.wait [#allocation4], 16  }
  0x2e   :  { %1962 = vsyncadd [#allocation4], 4294967280 }
  0x2f   :  { %1963 = dma.done.wait [#allocation6], 144  }
  0x30   :  { %1964 = vsyncadd [#allocation6], 4294967152 }
  0x31   :  { %1965 = dma.done.wait [#allocation9], 128  }
  0x32   :  { %1966 = vsyncadd [#allocation9], 4294967168 }
  0x33   :  { %68 = sfence }
  0x34   :  { %s2024_s3 = sld [smem:[#allocation2]]  ;;  %s2026_s10 = sld [smem:[#allocation2 + $0x1]]  ;;  %v171_v0 = vlaneseq  ;;  %v2039_v3 = vld [vmem:[%s3264_s4] sm:$0xff]  ;;  %v2044_v4 = vld [vmem:[%s3264_s4 + $0x8] sm:$0xff]  ;;  %v2052_v6 = vld [vmem:[%s3264_s4 + $0x10] sm:$0xff] }
  0x35   :  { %s2028_s11 = sld [smem:[#allocation2 + $0x2]]  ;;  %s2030_s12 = sld [smem:[#allocation2 + $0x3]]  ;;  %v2057_v7 = vld [vmem:[%s3264_s4 + $0x18] sm:$0x3f]  ;;  %v2062_v8 = vld [vmem:[%s3264_s4 + $0x20] sm:$0xff]  ;;  %v2075_v11 = vld [vmem:[%s3264_s4 + $0x28] sm:$0xff]  ;;  %v111_v20 = vmul.f32 %v2039_v3, %v2039_v3  ;;  %v112_v21 = vmul.f32 %v2044_v4, %v2044_v4  ;;  %v113_v22 = vmul.f32 %v2052_v6, %v2052_v6 }
  0x36   :  { %s1857_s13 = sld [smem:[#allocation2 + $0x4]]  ;;  %s1858_s14 = sld [smem:[#allocation2 + $0x5]]  ;;  %v2032_v1 = vshrl.u32 %v171_v0, 7  ;;  %v2034_v2 = vand.u32 127, %v171_v0  ;;  %v2080_v12 = vld [vmem:[%s3264_s4 + $0x30] sm:$0xff]  ;;  %v2092_v14 = vld [vmem:[%s3264_s4 + $0x40] sm:$0xff]  ;;  %v114_v25 = vmul.f32 %v2057_v7, %v2057_v7  ;;  %v123_v26 = vmul.f32 %v2062_v8, %v2062_v8 }
  0x37   :  { %v2085_v13 = vld [vmem:[%s3264_s4 + $0x38] sm:$0x3f]  ;;  %v2097_v15 = vld [vmem:[%s3264_s4 + $0x48] sm:$0xff]  ;;  %v2102_v16 = vld [vmem:[%s3264_s4 + $0x60] sm:$0xff]  ;;  %v124_v27 = vmul.f32 %v2075_v11, %v2075_v11  ;;  %v125_v28 = vmul.f32 %v2080_v12, %v2080_v12  ;;  %v135_v31 = vmul.f32 %v2092_v14, %v2092_v14 }
  0x38   :  { %3289 = vst [vmem:[#allocation15_spill] sm:$0xff] %v2034_v2  ;;  %v2047_v5 = vadd.s32 8, %v2032_v1  ;;  %v2065_v9 = vadd.s32 16, %v2032_v1  ;;  %v2068_v10 = vadd.s32 24, %v2032_v1  ;;  %v2110_v17 = vld [vmem:[%s3264_s4 + $0x68] sm:$0xff]  ;;  %v2115_v18 = vld [vmem:[%s3264_s4 + $0x70] sm:$0xff]  ;;  %v126_v30 = vmul.f32 %v2085_v13, %v2085_v13 }
  0x39   :  { %v2120_v19 = vld [vmem:[%s3264_s4 + $0x78] sm:$0x3f]  ;;  %v2134_v23 = vld [vmem:[%s3264_s4 + $0x50] sm:$0xff]  ;;  %v136_v32 = vmul.f32 %v2097_v15, %v2097_v15 }
  0x3a   :  { %3290 = vst [vmem:[#allocation16_spill] sm:$0xff] %v2047_v5  ;;  %3291 = vst [vmem:[#allocation17_spill] sm:$0xff] %v2068_v10  ;;  %v2139_v24 = vld [vmem:[%s3264_s4 + $0x58] sm:$0x3f]  ;;  %v137_v39 = vmul.f32 %v2134_v23, %v2134_v23 }
  0x3b   :  { %s75_s25 = smul.f32 %s2028_s11, %s2024_s3  ;;  %v138_v40 = vmul.f32 %v2139_v24, %v2139_v24 }
  0x3c   :  { %s76_s30 = smul.f32 %s2030_s12, %s2026_s10 }
  0x3d   :  { %s2105_s15 = smul.f32 %s1857_s13, %s2024_s3 }
  0x3e   :  { %s77_s3 = sadd.f32 %s76_s30, %s75_s25  ;;  %s2129_s13 = smul.f32 %s1858_s14, %s2026_s10 }
  0x3f   :  { %v2150_v29 = vstv %s2105_s15  ;;  %s2245_s10 = smov 0  }
  0x40   :  { %3292 = vst [vmem:[#allocation18_spill] sm:$0xff] %v2150_v29  ;;  %v97_v33 = vmul.f32 %v2150_v29, %v2102_v16  ;;  %v98_v34 = vmul.f32 %v2150_v29, %v2110_v17  ;;  %v99_v35 = vmul.f32 %v2150_v29, %v2115_v18  ;;  %v100_v36 = vmul.f32 %v2150_v29, %v2120_v19 }
  0x41   :  { %v2167_v37 = vstv %s2129_s13  ;;  %v2169_v38 = vstv %s77_s3 }
  0x42   :  { %3293 = vst [vmem:[#allocation19_spill] sm:$0xff] %v2167_v37  ;;  %3294 = vst [vmem:[#allocation20_spill] sm:$0xff] %v2169_v38  ;;  %v102_v41 = vmul.f32 %v2167_v37, %v2102_v16  ;;  %v103_v42 = vmul.f32 %v2167_v37, %v2110_v17  ;;  %v104_v43 = vmul.f32 %v2167_v37, %v2115_v18 }
  0x43   :  { %v105_v44 = vmul.f32 %v2167_v37, %v2120_v19  ;;  %v107_v45 = vmul.f32 %v2169_v38, %v2102_v16  ;;  %v108_v46 = vmul.f32 %v2169_v38, %v2110_v17  ;;  %v109_v47 = vmul.f32 %v2169_v38, %v2115_v18 }
  0x44   :  { %v110_v48 = vmul.f32 %v2169_v38, %v2120_v19  ;;  %v115_v49 = vmul.f32 %v111_v20, %v97_v33  ;;  %v116_v50 = vmul.f32 %v112_v21, %v98_v34  ;;  %v117_v51 = vmul.f32 %v113_v22, %v99_v35 }
  0x45   :  { %v118_v52 = vmul.f32 %v114_v25, %v100_v36  ;;  %v127_v53 = vmul.f32 %v123_v26, %v102_v41  ;;  %v128_v54 = vmul.f32 %v124_v27, %v103_v42  ;;  %v129_v55 = vmul.f32 %v125_v28, %v104_v43 }
  0x46   :  { %v130_v56 = vmul.f32 %v126_v30, %v105_v44  ;;  %v119_v57 = vsub.f32 %v107_v45, %v115_v49  ;;  %v120_v58 = vsub.f32 %v108_v46, %v116_v50  ;;  %v121_v59 = vsub.f32 %v109_v47, %v117_v51 }
  0x47   :  { %v122_v60 = vsub.f32 %v110_v48, %v118_v52  ;;  %v139_v61 = vmul.f32 %v135_v31, %v102_v41  ;;  %v140_v62 = vmul.f32 %v136_v32, %v103_v42  ;;  %v141_v63 = vmul.f32 %v137_v39, %v104_v43 }
  0x48   :  { %v142_v0 = vmul.f32 %v138_v40, %v105_v44  ;;  %v2191_v2 = vsub.f32 %v119_v57, %v127_v53  ;;  %v2193_v10 = vsub.f32 %v120_v58, %v128_v54  ;;  %v2195_v20 = vsub.f32 %v121_v59, %v129_v55 }
  0x49   :  { %v2197_v21 = vsub.f32 %v122_v60, %v130_v56  ;;  %v2199_v22 = vsub.f32 %v119_v57, %v139_v61  ;;  %v2201_v25 = vsub.f32 %v120_v58, %v140_v62  ;;  %v2203_v26 = vsub.f32 %v121_v59, %v141_v63 }
  0x4a   :  { %3295 = vst [vmem:[#allocation21_spill] sm:$0xff] %v2191_v2  ;;  %v2205_v27 = vsub.f32 %v122_v60, %v142_v0  ;;  %v147_v28 = vmul.f32 %v97_v33, %v2039_v3  ;;  %v148_v30 = vmul.f32 %v98_v34, %v2044_v4  ;;  %v149_v31 = vmul.f32 %v99_v35, %v2052_v6 }
  0x4b   :  { %v150_v32 = vmul.f32 %v100_v36, %v2057_v7  ;;  %v155_v39 = vmul.f32 %v102_v41, %v2062_v8  ;;  %v156_v40 = vmul.f32 %v103_v42, %v2075_v11  ;;  %v157_v45 = vmul.f32 %v104_v43, %v2080_v12 }
  0x4c   :  { %v158_v46 = vmul.f32 %v105_v44, %v2085_v13  ;;  %v2215_v47 = vmul.f32 2.0, %v147_v28  ;;  %v2217_v48 = vmul.f32 2.0, %v148_v30  ;;  %v2219_v49 = vmul.f32 2.0, %v149_v31 }
  0x4d   :  { %v2221_v3 = vmul.f32 2.0, %v150_v32  ;;  %v2223_v4 = vmul.f32 2.0, %v155_v39  ;;  %v2225_v6 = vmul.f32 2.0, %v156_v40  ;;  %v2227_v7 = vmul.f32 2.0, %v157_v45 }
  0x4e   :  { %v2229_v8 = vmul.f32 2.0, %v158_v46  ;;  %v163_v11 = vmul.f32 %v102_v41, %v2092_v14  ;;  %v164_v12 = vmul.f32 %v103_v42, %v2097_v15  ;;  %v165_v13 = vmul.f32 %v104_v43, %v2134_v23 }
  0x4f   :  { %3296 = vst [vmem:[#allocation22_spill] sm:$0xff] %v2221_v3  ;;  %3297 = vst [vmem:[#allocation23_spill] sm:$0xff] %v2223_v4  ;;  %v166_v33 = vmul.f32 %v105_v44, %v2139_v24  ;;  %v2243_v51 = vmov 0  }
  0x50   :  { %3298 = vst [vmem:[#allocation24_spill] sm:$0xff] %v2225_v6  ;;  %v2235_v34 = vmul.f32 2.0, %v163_v11  ;;  %v2237_v35 = vmul.f32 2.0, %v164_v12  ;;  %v2239_v36 = vmul.f32 2.0, %v165_v13 }
  0x51   :  { %v2241_v50 = vmul.f32 2.0, %v166_v33 }
  0x52 LB: > { %v3300_v5 = vld [vmem:[#allocation16_spill] sm:$0xff]  ;;  %v3303_v2 = vld [vmem:[#allocation21_spill] sm:$0xff]  ;;  %3304 = vst [vmem:[#allocation25_spill] sm:$0xff] %v1971_v51  ;;  %s185_s14 = sld [smem:[#allocation5 + %s1975_s10]]  ;;  %s2255_s25 = sshll.u32 %s1975_s10, 7  ;;  %v3305_v29 = vld [vmem:[#allocation18_spill] sm:$0xff]  ;;  %v1971_v51 = vphi %v2243_v51, %v3337_v51   ;;  %s1975_s10 = sphi %s2245_s10, %s183_s10  }
  0x53   : > { %s195_s26 = sld [smem:[#allocation7 + %s2255_s25]]  ;;  %v3306_v37 = vld [vmem:[#allocation19_spill] sm:$0xff]  ;;  %v3307_v38 = vld [vmem:[#allocation20_spill] sm:$0xff]  ;;  %vm246_vm0 = vcmask 244736   ;;  %vm256_vm1 = vcmask 242688   ;;  %s297_s9 = sadd.s32 1, %s2255_s25 }
  0x54   : > { %s196_s1 = sld [smem:[#allocation8 + %s2255_s25]]  ;;  %s371_s20 = sadd.s32 2, %s2255_s25  ;;  %vm261_vm2 = vcmask 1045504  }
  0x55   : > { %s298_s2 = sld [smem:[#allocation7 + %s297_s9]] }
  0x56   : > { %v3301_v3 = vld [vmem:[#allocation22_spill] sm:$0xff]  ;;  %v3302_v4 = vld [vmem:[#allocation23_spill] sm:$0xff]  ;;  %s299_s11 = sld [smem:[#allocation8 + %s297_s9]] }
  0x57   : > { %v3299_v6 = vld [vmem:[#allocation24_spill] sm:$0xff]  ;;  %s372_s3 = sld [smem:[#allocation7 + %s371_s20]] }
  0x58   : > { %s2262_s28 = scalar_lea.vmem %s3264_s4, %s185_s14  ;;  %s2309_s21 = sld [smem:[#allocation8 + %s371_s20]] }
  0x59   : > { %v187_v14 = vld [vmem:[%s2262_s28] sm:$0x1]  ;;  %v197_v23 = vstv %s195_s26  ;;  %s208_s29 = smul.f32 %s195_s26, %s2105_s15 }
  0x5a   : > { %v1859_v15 = vld [vmem:[%s2262_s28 + $0x40] sm:$0x1]  ;;  %v198_v24 = vsub.f32 %v197_v23, %v187_v14  ;;  %v199_v41 = vstv %s196_s1  ;;  %s210_s30 = smul.f32 %s196_s1, %s2129_s13  ;;  %v215_v42 = vmul.f32 %v197_v23, %v2219_v49  ;;  %v213_v43 = vmul.f32 %v197_v23, %v2215_v47 }
  0x5b   : > { %v200_v44 = vsub.f32 %v199_v41, %v1859_v15  ;;  %s209_s6 = smul.f32 %s208_s29, %s195_s26  ;;  %v223_v52 = vmul.f32 %v199_v41, %v2227_v7  ;;  %v221_v53 = vmul.f32 %v199_v41, %v3302_v4  ;;  %v216_v54 = vmul.f32 %v197_v23, %v3301_v3  ;;  %v1860_v45 = vld [vmem:[%s2262_s28 + $0x60] sm:$0x1] }
  0x5c   : > { %v201_v55 = vmul.f32 %v198_v24, %v198_v24  ;;  %s211_s7 = smul.f32 %s210_s30, %s196_s1  ;;  %v219_v56 = vadd.f32 %v215_v42, %v2195_v20  ;;  %v217_v57 = vadd.f32 %v213_v43, %v3303_v2  ;;  %v224_v58 = vmul.f32 %v199_v41, %v2229_v8  ;;  %s458_s1 = sadd.s32 3, %s2255_s25 }
  0x5d   : > { %v204_v59 = vmul.f32 %v200_v44, %v200_v44  ;;  %v220_v60 = vadd.f32 %v216_v54, %v2197_v21  ;;  %v214_v61 = vmul.f32 %v197_v23, %v2217_v48  ;;  %v222_v62 = vmul.f32 %v199_v41, %v3299_v6  ;;  %s300_s16 = smul.f32 %s298_s2, %s2105_s15  ;;  %s459_s0 = sld [smem:[#allocation7 + %s458_s1]] }
  0x5e   : > { %v202_v63 = vmul.f32 %v201_v55, %v3305_v29  ;;  %s212_s8 = sadd.f32 %s211_s7, %s209_s6  ;;  %v227_v28 = vadd.f32 %v223_v52, %v219_v56  ;;  %v225_v39 = vadd.f32 %v221_v53, %v217_v57  ;;  %v240_v14 = vsub.s32 0, %v2032_v1  ;;  %s302_s17 = smul.f32 %s299_s11, %s2129_s13 }
  0x5f   : > { %v205_v0 = vmul.f32 %v204_v59, %v3306_v37  ;;  %v218_v30 = vadd.f32 %v214_v61, %v2193_v10  ;;  %v228_v40 = vadd.f32 %v224_v58, %v220_v60  ;;  %s301_s12 = smul.f32 %s300_s16, %s298_s2  ;;  %v305_v60 = vstv %s298_s2  ;;  %s460_s27 = sld [smem:[#allocation8 + %s458_s1]] }
  0x60   : > { %v203_v31 = vsub.f32 %v3307_v38, %v202_v63  ;;  %v229_v32 = vstv %s212_s8  ;;  %s303_s18 = smul.f32 %s302_s17, %s299_s11  ;;  %v308_v61 = vmul.f32 %v305_v60, %v2219_v49  ;;  %v314_v63 = vstv %s299_s11  ;;  %s532_s8 = sadd.s32 4, %s2255_s25 }
  0x61   : > { %v232_v46 = vmul.f32 %v229_v32, %v2115_v18  ;;  %v230_v11 = vmul.f32 %v229_v32, %v2102_v16  ;;  %v233_v12 = vmul.f32 %v229_v32, %v2120_v19  ;;  %v226_v13 = vadd.f32 %v222_v62, %v218_v30  ;;  %s374_s22 = smul.f32 %s372_s3, %s2105_s15  ;;  %s533_s9 = sld [smem:[#allocation7 + %s532_s8]] }
  0x62   : > { %v206_v33 = vsub.f32 %v203_v31, %v205_v0  ;;  %v231_v15 = vmul.f32 %v229_v32, %v2110_v17  ;;  %v306_v62 = vmul.f32 %v305_v60, %v2215_v47  ;;  %s304_s19 = sadd.f32 %s303_s18, %s301_s12  ;;  %v309_v0 = vmul.f32 %v305_v60, %v3301_v3  ;;  %s376_s23 = smul.f32 %s2309_s21, %s2129_s13 }
  0x63   : > { %v236_v23 = vsub.f32 %v227_v28, %v232_v46  ;;  %v234_v41 = vsub.f32 %v225_v39, %v230_v11  ;;  %v237_v42 = vsub.f32 %v228_v40, %v233_v12  ;;  %v307_v28 = vmul.f32 %v305_v60, %v2217_v48  ;;  %s375_s24 = smul.f32 %s374_s22, %s372_s3  ;;  %s2386_s2 = sld [smem:[#allocation8 + %s532_s8]] }
  0x64   : > { %v207_v24 = vmul.f32 %v1860_v45, %v206_v33  ;;  %v235_v43 = vsub.f32 %v226_v13, %v231_v15  ;;  %v312_v30 = vadd.f32 %v308_v61, %v2203_v26  ;;  %v317_v31 = vmul.f32 %v314_v63, %v2239_v36  ;;  %s377_s14 = smul.f32 %s376_s23, %s2309_s21 }
  0x65   : > { %v310_v32 = vadd.f32 %v306_v62, %v2199_v22  ;;  %v315_v39 = vmul.f32 %v314_v63, %v2235_v34  ;;  %v323_v40 = vstv %s304_s19  ;;  %v313_v45 = vadd.f32 %v309_v0, %v2205_v27  ;;  %s461_s28 = smul.f32 %s459_s0, %s2105_s15  ;;  %s619_s19 = sadd.s32 5, %s2255_s25 }
  0x66   : > { %v241_v44 = vrot.slane %v207_v24, %v240_v14  ;;  %v318_v46 = vmul.f32 %v314_v63, %v2241_v50  ;;  %v311_v11 = vadd.f32 %v307_v28, %v2201_v25  ;;  %v316_v12 = vmul.f32 %v314_v63, %v2237_v35  ;;  %s378_s26 = sadd.f32 %s377_s14, %s375_s24  ;;  %s463_s29 = smul.f32 %s460_s27, %s2129_s13 }
  0x67   : > { %v321_v13 = vadd.f32 %v317_v31, %v312_v30  ;;  %v326_v33 = vmul.f32 %v323_v40, %v2115_v18  ;;  %v319_v14 = vadd.f32 %v315_v39, %v310_v32  ;;  %v324_v15 = vmul.f32 %v323_v40, %v2102_v16  ;;  %s462_s30 = smul.f32 %s461_s28, %s459_s0  ;;  %s620_s20 = sld [smem:[#allocation7 + %s619_s19]] }
  0x68   : > { %v244_v52 = vadd.f32 %v241_v44, %v236_v23  ;;  %v242_v53 = vadd.f32 %v241_v44, %v234_v41  ;;  %v245_v54 = vadd.f32 %v241_v44, %v237_v42  ;;  %v243_v55 = vadd.f32 %v241_v44, %v235_v43  ;;  %s464_s6 = smul.f32 %s463_s29, %s460_s27 }
  0x69   : > { %v322_v23 = vadd.f32 %v318_v46, %v313_v45  ;;  %v327_v24 = vmul.f32 %v323_v40, %v2120_v19  ;;  %v320_v41 = vadd.f32 %v316_v12, %v311_v11  ;;  %v325_v42 = vmul.f32 %v323_v40, %v2110_v17  ;;  %s535_s11 = smul.f32 %s533_s9, %s2105_s15 }
  0x6a   : > { %v253_v56 = vsel %vm246_vm0, %v244_v52, -inf  ;;  %v247_v57 = vsel %vm246_vm0, %v242_v53, -inf  ;;  %v257_v58 = vsel %vm256_vm1, %v245_v54, -inf  ;;  %v250_v59 = vsel %vm246_vm0, %v243_v55, -inf  ;;  %s465_s7 = sadd.f32 %s464_s6, %s462_s30  ;;  %s537_s16 = smul.f32 %s2386_s2, %s2129_s13 }
  0x6b   : > { %254 = vmax.xlane.f32.xlu1 %v253_v56  ;;  %248 = vmax.xlane.f32.xlu0 %v247_v57  ;;  %v330_v43 = vsub.f32 %v321_v13, %v326_v33  ;;  %v328_v44 = vsub.f32 %v319_v14, %v324_v15  ;;  %v331_v54 = vsub.f32 %v322_v23, %v327_v24  ;;  %v388_v13 = vstv %s2309_s21  ;;  %s536_s17 = smul.f32 %s535_s11, %s533_s9 }
  0x6c   : > { %v329_v55 = vsub.f32 %v320_v41, %v325_v42  ;;  %v390_v24 = vmul.f32 %v388_v13, %v3299_v6  ;;  %s538_s12 = smul.f32 %s537_s16, %s2386_s2 }
  0x6d   : > { %s622_s21 = smul.f32 %s620_s20, %s2105_s15 }
  0x6e   : > { %s539_s18 = sadd.f32 %s538_s12, %s536_s17 }
  0x6f   : > { %258 = vmax.xlane.f32.xlu1 %v257_v58  ;;  %251 = vmax.xlane.f32.xlu0 %v250_v59  ;;  %v379_v58 = vstv %s372_s3  ;;  %s621_s3 = sld [smem:[#allocation8 + %s619_s19]]  ;;  %s623_s23 = smul.f32 %s622_s21, %s620_s20 }
  0x70   : > { %v381_v30 = vmul.f32 %v379_v58, %v2217_v48  ;;  %v380_v31 = vmul.f32 %v379_v58, %v2215_v47  ;;  %v383_v33 = vmul.f32 %v379_v58, %v3301_v3  ;;  %v382_v41 = vmul.f32 %v379_v58, %v2219_v49 }
  0x72   : > { %v385_v23 = vadd.f32 %v381_v30, %v2193_v10 }
  0x74   : > { %v394_v58 = vadd.f32 %v390_v24, %v385_v23 }
  0x75   : > { %s624_s22 = smul.f32 %s621_s3, %s2129_s13 }
  0x77   : > { %s625_s24 = smul.f32 %s624_s22, %s621_s3 }
  0x79   : > { %s626_s14 = sadd.f32 %s625_s24, %s623_s23 }
  0xf8   : > { %v2315_v52 = vpop.xlane.xlu1 %254  ;;  %v2317_v53 = vpop.xlane.xlu0 %248 }
  0xf9   : > { %v334_v56 = vadd.f32 %v330_v43, %v2315_v52  ;;  %v332_v57 = vadd.f32 %v328_v44, %v2317_v53  ;;  %v384_v44 = vadd.f32 %v380_v31, %v3303_v2 }
  0xfb   : > { %v338_v32 = vsel %vm246_vm0, %v334_v56, -inf  ;;  %v336_v39 = vsel %vm246_vm0, %v332_v57, -inf  ;;  %v392_v56 = vmul.f32 %v388_v13, %v2229_v8 }
  0xfc   : > { %v259_v59 = vpop.xlane.xlu1 %258  ;;  %v252_v60 = vpop.xlane.xlu0 %251 }
  0xfd   : > { %v262_v61 = vsel %vm261_vm2, %v259_v59, -inf  ;;  %v335_v62 = vadd.f32 %v331_v54, %v259_v59  ;;  %v263_v63 = vmax.f32 %v2317_v53, %v252_v60  ;;  %v333_v0 = vadd.f32 %v329_v55, %v252_v60 }
  0xfe   : > { %v264_v28 = vmax.f32 %v2315_v52, %v262_v61  ;;  %v389_v54 = vmul.f32 %v388_v13, %v3302_v4  ;;  %v387_v55 = vadd.f32 %v383_v33, %v2197_v21 }
  0xff   : > { %v339_v40 = vsel %vm256_vm1, %v335_v62, -inf  ;;  %v337_v45 = vsel %vm246_vm0, %v333_v0, -inf  ;;  %v397_v62 = vstv %s378_s26  ;;  %v391_v0 = vmul.f32 %v388_v13, %v2227_v7  ;;  %s693_s26 = sadd.s32 6, %s2255_s25 }
 0x100   : > { %v341_v46 = vmax.f32 %v338_v32, %v339_v40  ;;  %v265_v11 = vmax.f32 %v263_v63, %v264_v28  ;;  %v340_v12 = vmax.f32 %v336_v39, %v337_v45  ;;  %v386_v63 = vadd.f32 %v382_v41, %v2195_v20  ;;  %s694_s1 = sld [smem:[#allocation7 + %s693_s26]] }
 0x101   : > { %v393_v32 = vadd.f32 %v389_v54, %v384_v44  ;;  %v399_v39 = vmul.f32 %v397_v62, %v2110_v17  ;;  %v398_v31 = vmul.f32 %v397_v62, %v2102_v16  ;;  %v396_v40 = vadd.f32 %v392_v56, %v387_v55  ;;  %v3308_v44 = vld [vmem:[#allocation17_spill] sm:$0xff] }
 0x102   : > { %v266_v14 = vrot.slane %v265_v11, 4  ;;  %v342_v15 = vmax.f32 %v340_v12, %v341_v46  ;;  %v401_v45 = vmul.f32 %v397_v62, %v2120_v19 }
 0x103   : > { %v403_v41 = vsub.f32 %v394_v58, %v399_v39  ;;  %v402_v13 = vsub.f32 %v393_v32, %v398_v31  ;;  %v466_v32 = vstv %s459_s0  ;;  %v475_v31 = vstv %s460_s27  ;;  %s2461_s0 = sld [smem:[#allocation8 + %s693_s26]] }
 0x104   : > { %v267_v42 = vmax.f32 %v265_v11, %v266_v14  ;;  %v343_v43 = vrot.slane %v342_v15, 4  ;;  %v395_v14 = vadd.f32 %v391_v0, %v386_v63  ;;  %v468_v39 = vmul.f32 %v466_v32, %v2217_v48 }
 0x106   : > { %v268_v57 = vrot.slane %v267_v42, 2  ;;  %v344_v61 = vmax.f32 %v342_v15, %v343_v43  ;;  %v400_v15 = vmul.f32 %v397_v62, %v2115_v18  ;;  %s696_s27 = smul.f32 %s694_s1, %s2105_s15 }
 0x108   : > { %v269_v28 = vmax.f32 %v267_v42, %v268_v57  ;;  %v345_v30 = vrot.slane %v344_v61, 2  ;;  %v405_v42 = vsub.f32 %v396_v40, %v401_v45  ;;  %v404_v57 = vsub.f32 %v395_v14, %v400_v15  ;;  %s697_s29 = smul.f32 %s696_s27, %s694_s1 }
 0x109   : > { %v467_v40 = vmul.f32 %v466_v32, %v2215_v47  ;;  %v472_v45 = vadd.f32 %v468_v39, %v2201_v25  ;;  %v476_v14 = vmul.f32 %v475_v31, %v2235_v34  ;;  %v469_v15 = vmul.f32 %v466_v32, %v2219_v49  ;;  %s698_s28 = smul.f32 %s2461_s0, %s2129_s13 }
 0x10a   : > { %v270_v46 = vrot.slane %v269_v28, 1  ;;  %v346_v11 = vmax.f32 %v344_v61, %v345_v30 }
 0x10b   : > { %s699_s30 = smul.f32 %s698_s28, %s2461_s0 }
 0x10c   : > { %v271_v12 = vmax.f32 %v269_v28, %v270_v46  ;;  %v347_v33 = vrot.slane %v346_v11, 1  ;;  %v477_v46 = vmul.f32 %v475_v31, %v2237_v35 }
 0x10d   : > { %s700_s6 = sadd.f32 %s699_s30, %s697_s29 }
 0x10e   : > { %vm272_vm3 = vcmp.ge.f32.partialorder %v2317_v53, %v271_v12  ;;  %vm273_vm4 = vcmp.ge.f32.partialorder %v252_v60, %v271_v12  ;;  %vm274_vm5 = vcmp.ge.f32.partialorder %v2315_v52, %v271_v12  ;;  %vm275_vm6 = vcmp.ge.f32.partialorder %v259_v59, %v271_v12 }
 0x10f   : > { %v276_v23 = vsel %vm272_vm3, %v2032_v1, 30  ;;  %v277_v24 = vsel %vm273_vm4, %v3300_v5, 30  ;;  %v278_v43 = vsel %vm274_vm5, %v2065_v9, 30  ;;  %v279_v54 = vsel %vm275_vm6, %v3308_v44, 30 }
 0x110   : > { %v280_v55 = vsel %vm261_vm2, %v279_v54, 2147483647  ;;  %vm281_vm7 = vcmp.lt.s32.totalorder %v276_v23, %v277_v24  ;;  %v2356_v56 = vmax.f32 %v346_v11, %v347_v33  ;;  %v470_v11 = vmul.f32 %v466_v32, %v3301_v3 }
 0x111   : > { %v282_v61 = vsel %vm281_vm7, %v276_v23, %v277_v24  ;;  %vm283_vm8 = vcmp.lt.s32.totalorder %v278_v43, %v280_v55  ;;  %v484_v12 = vstv %s465_s7  ;;  %v471_v33 = vadd.f32 %v467_v40, %v2199_v22  ;;  %s780_s7 = sadd.s32 7, %s2255_s25 }
 0x112   : > { %v284_v53 = vsel %vm283_vm8, %v278_v43, %v280_v55  ;;  %v407_v52 = vadd.f32 %v403_v41, %v2356_v56  ;;  %v406_v59 = vadd.f32 %v402_v13, %v2356_v56  ;;  %v409_v60 = vadd.f32 %v405_v42, %v2356_v56  ;;  %s781_s8 = sld [smem:[#allocation7 + %s780_s7]] }
 0x113   : > { %vm285_vm9 = vcmp.lt.s32.totalorder %v282_v61, %v284_v53  ;;  %v408_v28 = vadd.f32 %v404_v57, %v2356_v56  ;;  %v481_v41 = vadd.f32 %v477_v46, %v472_v45  ;;  %v486_v13 = vmul.f32 %v484_v12, %v2110_v17 }
 0x114   : > { %v2361_v62 = vsel %vm285_vm9, %v282_v61, %v284_v53  ;;  %v413_v63 = vsel %vm246_vm0, %v407_v52, -inf  ;;  %v410_v0 = vsel %vm246_vm0, %v406_v59, -inf  ;;  %v419_v30 = vsel %vm256_vm1, %v409_v60, -inf }
 0x115   : > { %3309 = vst [vmem:[#allocation26_spill] sm:$0xff] %v2361_v62  ;;  %414 = vmax.xlane.f32.xlu1 %v413_v63  ;;  %411 = vmax.xlane.f32.xlu0 %v410_v0  ;;  %v416_v58 = vsel %vm246_vm0, %v408_v28, -inf  ;;  %v474_v42 = vadd.f32 %v470_v11, %v2205_v27  ;;  %v479_v23 = vmul.f32 %v475_v31, %v2241_v50  ;;  %v540_v46 = vstv %s533_s9  ;;  %s782_s9 = sld [smem:[#allocation8 + %s780_s7]] }
 0x116   : > { %v480_v24 = vadd.f32 %v476_v14, %v471_v33  ;;  %v485_v43 = vmul.f32 %v484_v12, %v2102_v16  ;;  %v473_v54 = vadd.f32 %v469_v15, %v2203_v26  ;;  %v478_v55 = vmul.f32 %v475_v31, %v2239_v36 }
 0x117   : > { %v483_v57 = vadd.f32 %v479_v23, %v474_v42  ;;  %v488_v61 = vmul.f32 %v484_v12, %v2120_v19  ;;  %v490_v53 = vsub.f32 %v481_v41, %v486_v13  ;;  %v487_v60 = vmul.f32 %v484_v12, %v2115_v18 }
 0x118   : > { %v489_v52 = vsub.f32 %v480_v24, %v485_v43  ;;  %v482_v59 = vadd.f32 %v478_v55, %v473_v54  ;;  %v542_v42 = vmul.f32 %v540_v46, %v2217_v48  ;;  %v541_v23 = vmul.f32 %v540_v46, %v2215_v47 }
 0x119   : > { %420 = vmax.xlane.f32.xlu1 %v419_v30  ;;  %417 = vmax.xlane.f32.xlu0 %v416_v58  ;;  %v492_v28 = vsub.f32 %v483_v57, %v488_v61  ;;  %v549_v55 = vstv %s2386_s2  ;;  %v544_v57 = vmul.f32 %v540_v46, %v3301_v3  ;;  %s783_s2 = smul.f32 %s781_s8, %s2105_s15 }
 0x11a   : > { %v491_v39 = vsub.f32 %v482_v59, %v487_v60  ;;  %v551_v59 = vmul.f32 %v549_v55, %v3299_v6  ;;  %v543_v60 = vmul.f32 %v540_v46, %v2219_v49 }
 0x11b   : > { %s785_s11 = smul.f32 %s782_s9, %s2129_s13 }
 0x11c   : > { %s784_s16 = smul.f32 %s783_s2, %s781_s8 }
 0x11d   : > { %s786_s17 = smul.f32 %s785_s11, %s782_s9 }
 0x11f   : > { %s787_s12 = sadd.f32 %s786_s17, %s784_s16 }
 0x1a2   : > { %v2390_v63 = vpop.xlane.xlu1 %414  ;;  %v2392_v0 = vpop.xlane.xlu0 %411 }
 0x1a3   : > { %v494_v30 = vadd.f32 %v490_v53, %v2390_v63  ;;  %v424_v58 = vmax.f32 %v2392_v0, %v2390_v63  ;;  %v493_v32 = vadd.f32 %v489_v52, %v2392_v0  ;;  %v546_v52 = vadd.f32 %v542_v42, %v2193_v10 }
 0x1a5   : > { %v498_v31 = vsel %vm246_vm0, %v494_v30, -inf  ;;  %v497_v11 = vsel %vm246_vm0, %v493_v32, -inf  ;;  %v545_v32 = vadd.f32 %v541_v23, %v3303_v2  ;;  %v555_v46 = vadd.f32 %v551_v59, %v546_v52 }
 0x1a6   : > { %v421_v40 = vpop.xlane.xlu1 %420  ;;  %v418_v45 = vpop.xlane.xlu0 %417  ;;  %v501_v24 = vmax.f32 %v497_v11, %v498_v31  ;;  %v553_v31 = vmul.f32 %v549_v55, %v2229_v8 }
 0x1a7   : > { %v423_v12 = vsel %vm261_vm2, %v421_v40, -inf  ;;  %v496_v33 = vadd.f32 %v492_v28, %v421_v40  ;;  %v495_v14 = vadd.f32 %v491_v39, %v418_v45  ;;  %v550_v39 = vmul.f32 %v549_v55, %v3302_v4 }
 0x1a8   : > { %v425_v15 = vmax.f32 %v418_v45, %v423_v12 }
 0x1a9   : > { %v500_v41 = vsel %vm256_vm1, %v496_v33, -inf  ;;  %v499_v13 = vsel %vm246_vm0, %v495_v14, -inf  ;;  %v558_v33 = vstv %s539_s18  ;;  %v547_v14 = vadd.f32 %v543_v60, %v2195_v20  ;;  %s854_s18 = sadd.s32 8, %s2255_s25 }
 0x1aa   : > { %v426_v43 = vmax.f32 %v424_v58, %v425_v15  ;;  %v502_v54 = vmax.f32 %v499_v13, %v500_v41  ;;  %v548_v58 = vadd.f32 %v544_v57, %v2197_v21  ;;  %v552_v15 = vmul.f32 %v549_v55, %v2227_v7  ;;  %s855_s19 = sld [smem:[#allocation7 + %s854_s18]] }
 0x1ab   : > { %v554_v42 = vadd.f32 %v550_v39, %v545_v32  ;;  %v559_v23 = vmul.f32 %v558_v33, %v2102_v16  ;;  %v561_v60 = vmul.f32 %v558_v33, %v2115_v18 }
 0x1ac   : > { %v427_v61 = vrot.slane %v426_v43, 4  ;;  %v503_v53 = vmax.f32 %v501_v24, %v502_v54  ;;  %v560_v24 = vmul.f32 %v558_v33, %v2110_v17  ;;  %v562_v54 = vmul.f32 %v558_v33, %v2120_v19 }
 0x1ad   : > { %v563_v55 = vsub.f32 %v554_v42, %v559_v23  ;;  %v636_v42 = vstv %s621_s3 }
 0x1ae   : > { %v428_v28 = vmax.f32 %v426_v43, %v427_v61  ;;  %v504_v30 = vrot.slane %v503_v53, 4  ;;  %v557_v43 = vadd.f32 %v553_v31, %v548_v58  ;;  %v564_v37 = vsub.f32 %v555_v46, %v560_v24 }
 0x1b0   : > { %v429_v11 = vrot.slane %v428_v28, 2  ;;  %v505_v12 = vmax.f32 %v503_v53, %v504_v30  ;;  %v556_v30 = vadd.f32 %v552_v15, %v547_v14  ;;  %s857_s3 = smul.f32 %s855_s19, %s2105_s15 }
 0x1b2   : > { %v430_v41 = vmax.f32 %v428_v28, %v429_v11  ;;  %v506_v13 = vrot.slane %v505_v12, 2  ;;  %v566_v28 = vsub.f32 %v557_v43, %v562_v54  ;;  %v565_v11 = vsub.f32 %v556_v30, %v561_v60  ;;  %s858_s22 = smul.f32 %s857_s3, %s855_s19 }
 0x1b3   : > { %v638_v43 = vmul.f32 %v636_v42, %v2237_v35 }
 0x1b4   : > { %v431_v57 = vrot.slane %v430_v41, 1  ;;  %v507_v61 = vmax.f32 %v505_v12, %v506_v13  ;;  %v627_v13 = vstv %s620_s20  ;;  %s2536_s20 = sld [smem:[#allocation8 + %s854_s18]] }
 0x1b5   : > { %v629_v46 = vmul.f32 %v627_v13, %v2217_v48  ;;  %v628_v24 = vmul.f32 %v627_v13, %v2215_v47  ;;  %v631_v54 = vmul.f32 %v627_v13, %v3301_v3  ;;  %v630_v30 = vmul.f32 %v627_v13, %v2219_v49 }
 0x1b6   : > { %v432_v29 = vmax.f32 %v430_v41, %v431_v57  ;;  %v508_v53 = vrot.slane %v507_v61, 1  ;;  %v645_v57 = vstv %s626_s14  ;;  %s941_s14 = sadd.s32 9, %s2255_s25 }
 0x1b7   : > { %v633_v23 = vadd.f32 %v629_v46, %v2201_v25  ;;  %s942_s26 = sld [smem:[#allocation7 + %s941_s14]] }
 0x1b8   : > { %vm433_vm10 = vcmp.ge.f32.partialorder %v2392_v0, %v432_v29  ;;  %vm434_vm11 = vcmp.ge.f32.partialorder %v2390_v63, %v432_v29  ;;  %vm435_vm12 = vcmp.ge.f32.partialorder %v418_v45, %v432_v29  ;;  %vm436_vm13 = vcmp.ge.f32.partialorder %v421_v40, %v432_v29 }
 0x1b9   : > { %v437_v52 = vsel %vm433_vm10, %v2032_v1, 30  ;;  %v438_v59 = vsel %vm434_vm11, %v3300_v5, 30  ;;  %v439_v32 = vsel %vm435_vm12, %v2065_v9, 30  ;;  %v440_v39 = vsel %vm436_vm13, %v3308_v44, 30 }
 0x1ba   : > { %v441_v58 = vsel %vm261_vm2, %v440_v39, 2147483647  ;;  %vm442_vm14 = vcmp.lt.s32.totalorder %v437_v52, %v438_v59  ;;  %v2431_v31 = vmax.f32 %v507_v61, %v508_v53  ;;  %v632_v61 = vadd.f32 %v628_v24, %v2199_v22  ;;  %s859_s21 = smul.f32 %s2536_s20, %s2129_s13 }
 0x1bb   : > { %v443_v12 = vsel %vm442_vm14, %v437_v52, %v438_v59  ;;  %vm444_vm15 = vcmp.lt.s32.totalorder %v439_v32, %v441_v58  ;;  %v637_v53 = vmul.f32 %v636_v42, %v2235_v34  ;;  %v642_v60 = vadd.f32 %v638_v43, %v633_v23 }
 0x1bc   : > { %v445_v63 = vsel %vm444_vm15, %v439_v32, %v441_v58  ;;  %v568_v29 = vadd.f32 %v564_v37, %v2431_v31  ;;  %v567_v0 = vadd.f32 %v563_v55, %v2431_v31  ;;  %v570_v40 = vadd.f32 %v566_v28, %v2431_v31  ;;  %s860_s23 = smul.f32 %s859_s21, %s2536_s20 }
 0x1bd   : > { %vm446_vm3 = vcmp.lt.s32.totalorder %v443_v12, %v445_v63  ;;  %v569_v15 = vadd.f32 %v565_v11, %v2431_v31  ;;  %v647_v55 = vmul.f32 %v645_v57, %v2110_v17  ;;  %v635_v28 = vadd.f32 %v631_v54, %v2205_v27 }
 0x1be   : > { %v2436_v45 = vsel %vm446_vm3, %v443_v12, %v445_v63  ;;  %v574_v33 = vsel %vm246_vm0, %v568_v29, -inf  ;;  %v571_v14 = vsel %vm246_vm0, %v567_v0, -inf  ;;  %v580_v41 = vsel %vm256_vm1, %v570_v40, -inf  ;;  %s861_s24 = sadd.f32 %s860_s23, %s858_s22 }
 0x1bf   : > { %3310 = vst [vmem:[#allocation27_spill] sm:$0xff] %v2436_v45  ;;  %575 = vmax.xlane.f32.xlu1 %v574_v33  ;;  %572 = vmax.xlane.f32.xlu0 %v571_v14  ;;  %v577_v37 = vsel %vm246_vm0, %v569_v15, -inf  ;;  %v640_v52 = vmul.f32 %v636_v42, %v2241_v50  ;;  %v641_v59 = vadd.f32 %v637_v53, %v632_v61  ;;  %v701_v43 = vstv %s694_s1  ;;  %s943_s1 = sld [smem:[#allocation8 + %s941_s14]] }
 0x1c0   : > { %v646_v32 = vmul.f32 %v645_v57, %v2102_v16  ;;  %v634_v39 = vadd.f32 %v630_v30, %v2203_v26  ;;  %v639_v58 = vmul.f32 %v636_v42, %v2239_v36  ;;  %v649_v12 = vmul.f32 %v645_v57, %v2120_v19 }
 0x1c1   : > { %v644_v11 = vadd.f32 %v640_v52, %v635_v28  ;;  %v651_v63 = vsub.f32 %v642_v60, %v647_v55  ;;  %v648_v40 = vmul.f32 %v645_v57, %v2115_v18  ;;  %v703_v28 = vmul.f32 %v701_v43, %v2217_v48 }
 0x1c2   : > { %v650_v29 = vsub.f32 %v641_v59, %v646_v32  ;;  %v643_v0 = vadd.f32 %v639_v58, %v634_v39  ;;  %v702_v52 = vmul.f32 %v701_v43, %v2215_v47  ;;  %v710_v58 = vstv %s2461_s0  ;;  %s944_s0 = smul.f32 %s942_s26, %s2105_s15 }
 0x1c3   : > { %581 = vmax.xlane.f32.xlu1 %v580_v41  ;;  %578 = vmax.xlane.f32.xlu0 %v577_v37  ;;  %v653_v15 = vsub.f32 %v644_v11, %v649_v12  ;;  %v705_v11 = vmul.f32 %v701_v43, %v3301_v3 }
 0x1c4   : > { %v652_v46 = vsub.f32 %v643_v0, %v648_v40  ;;  %v712_v0 = vmul.f32 %v710_v58, %v3299_v6  ;;  %v704_v40 = vmul.f32 %v701_v43, %v2219_v49  ;;  %s945_s28 = smul.f32 %s944_s0, %s942_s26 }
 0x1c5   : > { %s946_s27 = smul.f32 %s943_s1, %s2129_s13 }
 0x1c7   : > { %s947_s29 = smul.f32 %s946_s27, %s943_s1 }
 0x1c9   : > { %s948_s30 = sadd.f32 %s947_s29, %s945_s28 }
 0x24c   : > { %v2465_v33 = vpop.xlane.xlu1 %575  ;;  %v2467_v14 = vpop.xlane.xlu0 %572 }
 0x24d   : > { %v655_v41 = vadd.f32 %v651_v63, %v2465_v33  ;;  %v585_v37 = vmax.f32 %v2467_v14, %v2465_v33  ;;  %v654_v13 = vadd.f32 %v650_v29, %v2467_v14  ;;  %v707_v29 = vadd.f32 %v703_v28, %v2193_v10 }
 0x24f   : > { %v659_v42 = vsel %vm246_vm0, %v655_v41, -inf  ;;  %v658_v54 = vsel %vm246_vm0, %v654_v13, -inf  ;;  %v706_v13 = vadd.f32 %v702_v52, %v3303_v2  ;;  %v716_v43 = vadd.f32 %v712_v0, %v707_v29 }
 0x250   : > { %v582_v24 = vpop.xlane.xlu1 %581  ;;  %v579_v23 = vpop.xlane.xlu0 %578  ;;  %v662_v59 = vmax.f32 %v658_v54, %v659_v42  ;;  %v714_v42 = vmul.f32 %v710_v58, %v2229_v8 }
 0x251   : > { %v584_v57 = vsel %vm261_vm2, %v582_v24, -inf  ;;  %v657_v61 = vadd.f32 %v653_v15, %v582_v24  ;;  %v656_v53 = vadd.f32 %v652_v46, %v579_v23  ;;  %v711_v46 = vmul.f32 %v710_v58, %v3302_v4 }
 0x252   : > { %v586_v30 = vmax.f32 %v579_v23, %v584_v57 }
 0x253   : > { %v661_v60 = vsel %vm256_vm1, %v657_v61, -inf  ;;  %v660_v55 = vsel %vm246_vm0, %v656_v53, -inf  ;;  %v719_v61 = vstv %s700_s6  ;;  %v708_v53 = vadd.f32 %v704_v40, %v2195_v20  ;;  %s1015_s6 = sadd.s32 10, %s2255_s25 }
 0x254   : > { %v587_v32 = vmax.f32 %v585_v37, %v586_v30  ;;  %v663_v39 = vmax.f32 %v660_v55, %v661_v60  ;;  %v709_v37 = vadd.f32 %v705_v11, %v2197_v21  ;;  %v713_v30 = vmul.f32 %v710_v58, %v2227_v7  ;;  %s1016_s7 = sld [smem:[#allocation7 + %s1015_s6]] }
 0x255   : > { %v715_v28 = vadd.f32 %v711_v46, %v706_v13  ;;  %v720_v52 = vmul.f32 %v719_v61, %v2102_v16  ;;  %v722_v40 = vmul.f32 %v719_v61, %v2115_v18 }
 0x256   : > { %v588_v12 = vrot.slane %v587_v32, 4  ;;  %v664_v63 = vmax.f32 %v662_v59, %v663_v39  ;;  %v721_v59 = vmul.f32 %v719_v61, %v2110_v17  ;;  %v723_v39 = vmul.f32 %v719_v61, %v2120_v19 }
 0x257   : > { %v724_v58 = vsub.f32 %v715_v28, %v720_v52  ;;  %v797_v28 = vstv %s782_s9 }
 0x258   : > { %v589_v15 = vmax.f32 %v587_v32, %v588_v12  ;;  %v665_v41 = vrot.slane %v664_v63, 4  ;;  %v718_v32 = vadd.f32 %v714_v42, %v709_v37  ;;  %v725_v51 = vsub.f32 %v716_v43, %v721_v59 }
 0x25a   : > { %v590_v54 = vrot.slane %v589_v15, 2  ;;  %v666_v57 = vmax.f32 %v664_v63, %v665_v41  ;;  %v717_v41 = vadd.f32 %v713_v30, %v708_v53  ;;  %s1018_s9 = smul.f32 %s1016_s7, %s2105_s15 }
 0x25c   : > { %v591_v60 = vmax.f32 %v589_v15, %v590_v54  ;;  %v667_v55 = vrot.slane %v666_v57, 2  ;;  %v727_v15 = vsub.f32 %v718_v32, %v723_v39  ;;  %v726_v54 = vsub.f32 %v717_v41, %v722_v40  ;;  %s1019_s11 = smul.f32 %s1018_s9, %s1016_s7 }
 0x25d   : > { %v799_v32 = vmul.f32 %v797_v28, %v2237_v35 }
 0x25e   : > { %v592_v11 = vrot.slane %v591_v60, 1  ;;  %v668_v12 = vmax.f32 %v666_v57, %v667_v55  ;;  %v788_v55 = vstv %s781_s8  ;;  %s2611_s8 = sld [smem:[#allocation8 + %s1015_s6]] }
 0x25f   : > { %v790_v43 = vmul.f32 %v788_v55, %v2217_v48  ;;  %v789_v59 = vmul.f32 %v788_v55, %v2215_v47  ;;  %v792_v39 = vmul.f32 %v788_v55, %v3301_v3  ;;  %v791_v41 = vmul.f32 %v788_v55, %v2219_v49 }
 0x260   : > { %v593_v38 = vmax.f32 %v591_v60, %v592_v11  ;;  %v669_v63 = vrot.slane %v668_v12, 1  ;;  %v806_v11 = vstv %s787_s12  ;;  %s1102_s12 = sadd.s32 11, %s2255_s25 }
 0x261   : > { %v794_v52 = vadd.f32 %v790_v43, %v2201_v25  ;;  %s1103_s18 = sld [smem:[#allocation7 + %s1102_s12]] }
 0x262   : > { %vm594_vm4 = vcmp.ge.f32.partialorder %v2467_v14, %v593_v38  ;;  %vm595_vm5 = vcmp.ge.f32.partialorder %v2465_v33, %v593_v38  ;;  %vm596_vm6 = vcmp.ge.f32.partialorder %v579_v23, %v593_v38  ;;  %vm597_vm7 = vcmp.ge.f32.partialorder %v582_v24, %v593_v38 }
 0x263   : > { %v598_v29 = vsel %vm594_vm4, %v2032_v1, 30  ;;  %v599_v0 = vsel %vm595_vm5, %v3300_v5, 30  ;;  %v600_v13 = vsel %vm596_vm6, %v2065_v9, 30  ;;  %v601_v46 = vsel %vm597_vm7, %v3308_v44, 30 }
 0x264   : > { %v602_v37 = vsel %vm261_vm2, %v601_v46, 2147483647  ;;  %vm603_vm8 = vcmp.lt.s32.totalorder %v598_v29, %v599_v0  ;;  %v2506_v42 = vmax.f32 %v668_v12, %v669_v63  ;;  %v793_v12 = vadd.f32 %v789_v59, %v2199_v22  ;;  %s1020_s2 = smul.f32 %s2611_s8, %s2129_s13 }
 0x265   : > { %v604_v57 = vsel %vm603_vm8, %v598_v29, %v599_v0  ;;  %vm605_vm9 = vcmp.lt.s32.totalorder %v600_v13, %v602_v37  ;;  %v798_v63 = vmul.f32 %v797_v28, %v2235_v34  ;;  %v803_v40 = vadd.f32 %v799_v32, %v794_v52 }
 0x266   : > { %v606_v33 = vsel %vm605_vm9, %v600_v13, %v602_v37  ;;  %v729_v38 = vadd.f32 %v725_v51, %v2506_v42  ;;  %v728_v14 = vadd.f32 %v724_v58, %v2506_v42  ;;  %v731_v24 = vadd.f32 %v727_v15, %v2506_v42  ;;  %s1021_s16 = smul.f32 %s1020_s2, %s2611_s8 }
 0x267   : > { %vm607_vm10 = vcmp.lt.s32.totalorder %v604_v57, %v606_v33  ;;  %v730_v30 = vadd.f32 %v726_v54, %v2506_v42  ;;  %v808_v58 = vmul.f32 %v806_v11, %v2110_v17  ;;  %v796_v15 = vadd.f32 %v792_v39, %v2205_v27 }
 0x268   : > { %v2511_v23 = vsel %vm607_vm10, %v604_v57, %v606_v33  ;;  %v735_v61 = vsel %vm246_vm0, %v729_v38, -inf  ;;  %v732_v53 = vsel %vm246_vm0, %v728_v14, -inf  ;;  %v741_v60 = vsel %vm256_vm1, %v731_v24, -inf  ;;  %s1022_s17 = sadd.f32 %s1021_s16, %s1019_s11 }
 0x269   : > { %3311 = vst [vmem:[#allocation28_spill] sm:$0xff] %v2511_v23  ;;  %736 = vmax.xlane.f32.xlu1 %v735_v61  ;;  %733 = vmax.xlane.f32.xlu0 %v732_v53  ;;  %v738_v51 = vsel %vm246_vm0, %v730_v30, -inf  ;;  %v801_v29 = vmul.f32 %v797_v28, %v2241_v50  ;;  %v802_v0 = vadd.f32 %v798_v63, %v793_v12  ;;  %v862_v32 = vstv %s855_s19  ;;  %s1104_s19 = sld [smem:[#allocation8 + %s1102_s12]] }
 0x26a   : > { %v807_v13 = vmul.f32 %v806_v11, %v2102_v16  ;;  %v795_v46 = vadd.f32 %v791_v41, %v2203_v26  ;;  %v800_v37 = vmul.f32 %v797_v28, %v2239_v36  ;;  %v810_v57 = vmul.f32 %v806_v11, %v2120_v19 }
 0x26b   : > { %v805_v54 = vadd.f32 %v801_v29, %v796_v15  ;;  %v812_v33 = vsub.f32 %v803_v40, %v808_v58  ;;  %v809_v24 = vmul.f32 %v806_v11, %v2115_v18  ;;  %v864_v15 = vmul.f32 %v862_v32, %v2217_v48 }
 0x26c   : > { %v811_v38 = vsub.f32 %v802_v0, %v807_v13  ;;  %v804_v14 = vadd.f32 %v800_v37, %v795_v46  ;;  %v863_v29 = vmul.f32 %v862_v32, %v2215_v47  ;;  %v871_v37 = vstv %s2536_s20  ;;  %s1105_s20 = smul.f32 %s1103_s18, %s2105_s15 }
 0x26d   : > { %742 = vmax.xlane.f32.xlu1 %v741_v60  ;;  %739 = vmax.xlane.f32.xlu0 %v738_v51  ;;  %v814_v30 = vsub.f32 %v805_v54, %v810_v57  ;;  %v866_v54 = vmul.f32 %v862_v32, %v3301_v3 }
 0x26e   : > { %v813_v43 = vsub.f32 %v804_v14, %v809_v24  ;;  %v873_v14 = vmul.f32 %v871_v37, %v3299_v6  ;;  %v865_v24 = vmul.f32 %v862_v32, %v2219_v49  ;;  %s1106_s21 = smul.f32 %s1105_s20, %s1103_s18 }
 0x26f   : > { %s1107_s3 = smul.f32 %s1104_s19, %s2129_s13 }
 0x271   : > { %s1108_s22 = smul.f32 %s1107_s3, %s1104_s19 }
 0x273   : > { %s1109_s23 = sadd.f32 %s1108_s22, %s1106_s21 }
 0x2f6   : > { %v2540_v61 = vpop.xlane.xlu1 %736  ;;  %v2542_v53 = vpop.xlane.xlu0 %733 }
 0x2f7   : > { %v816_v60 = vadd.f32 %v812_v33, %v2540_v61  ;;  %v746_v51 = vmax.f32 %v2542_v53, %v2540_v61  ;;  %v815_v55 = vadd.f32 %v811_v38, %v2542_v53  ;;  %v868_v38 = vadd.f32 %v864_v15, %v2193_v10 }
 0x2f9   : > { %v820_v28 = vsel %vm246_vm0, %v816_v60, -inf  ;;  %v819_v39 = vsel %vm246_vm0, %v815_v55, -inf  ;;  %v867_v55 = vadd.f32 %v863_v29, %v3303_v2  ;;  %v877_v32 = vadd.f32 %v873_v14, %v868_v38 }
 0x2fa   : > { %v743_v59 = vpop.xlane.xlu1 %742  ;;  %v740_v52 = vpop.xlane.xlu0 %739  ;;  %v823_v0 = vmax.f32 %v819_v39, %v820_v28  ;;  %v875_v28 = vmul.f32 %v871_v37, %v2229_v8 }
 0x2fb   : > { %v745_v11 = vsel %vm261_vm2, %v743_v59, -inf  ;;  %v818_v12 = vadd.f32 %v814_v30, %v743_v59  ;;  %v817_v63 = vadd.f32 %v813_v43, %v740_v52  ;;  %v872_v43 = vmul.f32 %v871_v37, %v3302_v4 }
 0x2fc   : > { %v747_v41 = vmax.f32 %v740_v52, %v745_v11 }
 0x2fd   : > { %v822_v40 = vsel %vm256_vm1, %v818_v12, -inf  ;;  %v821_v58 = vsel %vm246_vm0, %v817_v63, -inf  ;;  %v880_v12 = vstv %s861_s24  ;;  %v869_v63 = vadd.f32 %v865_v24, %v2195_v20  ;;  %s1176_s24 = sadd.s32 12, %s2255_s25 }
 0x2fe   : > { %v748_v13 = vmax.f32 %v746_v51, %v747_v41  ;;  %v824_v46 = vmax.f32 %v821_v58, %v822_v40  ;;  %v870_v51 = vadd.f32 %v866_v54, %v2197_v21  ;;  %v874_v41 = vmul.f32 %v871_v37, %v2227_v7  ;;  %s1177_s14 = sld [smem:[#allocation7 + %s1176_s24]] }
 0x2ff   : > { %v876_v15 = vadd.f32 %v872_v43, %v867_v55  ;;  %v881_v29 = vmul.f32 %v880_v12, %v2102_v16  ;;  %v883_v24 = vmul.f32 %v880_v12, %v2115_v18 }
 0x300   : > { %v749_v57 = vrot.slane %v748_v13, 4  ;;  %v825_v33 = vmax.f32 %v823_v0, %v824_v46  ;;  %v882_v0 = vmul.f32 %v880_v12, %v2110_v17  ;;  %v884_v46 = vmul.f32 %v880_v12, %v2120_v19 }
 0x301   : > { %v885_v37 = vsub.f32 %v876_v15, %v881_v29  ;;  %v958_v15 = vstv %s943_s1 }
 0x302   : > { %v750_v30 = vmax.f32 %v748_v13, %v749_v57  ;;  %v826_v60 = vrot.slane %v825_v33, 4  ;;  %v879_v13 = vadd.f32 %v875_v28, %v870_v51  ;;  %v886_v45 = vsub.f32 %v877_v32, %v882_v0 }
 0x304   : > { %v751_v39 = vrot.slane %v750_v30, 2  ;;  %v827_v11 = vmax.f32 %v825_v33, %v826_v60  ;;  %v878_v60 = vadd.f32 %v874_v41, %v869_v63  ;;  %s1179_s1 = smul.f32 %s1177_s14, %s2105_s15 }
 0x306   : > { %v752_v40 = vmax.f32 %v750_v30, %v751_v39  ;;  %v828_v58 = vrot.slane %v827_v11, 2  ;;  %v888_v30 = vsub.f32 %v879_v13, %v884_v46  ;;  %v887_v39 = vsub.f32 %v878_v60, %v883_v24  ;;  %s1180_s27 = smul.f32 %s1179_s1, %s1177_s14 }
 0x307   : > { %v960_v13 = vmul.f32 %v958_v15, %v2237_v35 }
 0x308   : > { %v753_v54 = vrot.slane %v752_v40, 1  ;;  %v829_v57 = vmax.f32 %v827_v11, %v828_v58  ;;  %v949_v58 = vstv %s942_s26  ;;  %s2686_s26 = sld [smem:[#allocation8 + %s1176_s24]] }
 0x309   : > { %v951_v32 = vmul.f32 %v949_v58, %v2217_v48  ;;  %v950_v0 = vmul.f32 %v949_v58, %v2215_v47  ;;  %v953_v46 = vmul.f32 %v949_v58, %v3301_v3  ;;  %v952_v60 = vmul.f32 %v949_v58, %v2219_v49 }
 0x30a   : > { %v754_v23 = vmax.f32 %v752_v40, %v753_v54  ;;  %v830_v33 = vrot.slane %v829_v57, 1  ;;  %v967_v54 = vstv %s948_s30  ;;  %s1263_s30 = sadd.s32 13, %s2255_s25 }
 0x30b   : > { %v955_v29 = vadd.f32 %v951_v32, %v2201_v25  ;;  %s1264_s6 = sld [smem:[#allocation7 + %s1263_s30]] }
 0x30c   : > { %vm755_vm11 = vcmp.ge.f32.partialorder %v2542_v53, %v754_v23  ;;  %vm756_vm12 = vcmp.ge.f32.partialorder %v2540_v61, %v754_v23  ;;  %vm757_vm13 = vcmp.ge.f32.partialorder %v740_v52, %v754_v23  ;;  %vm758_vm14 = vcmp.ge.f32.partialorder %v743_v59, %v754_v23 }
 0x30d   : > { %v759_v38 = vsel %vm755_vm11, %v2032_v1, 30  ;;  %v760_v14 = vsel %vm756_vm12, %v3300_v5, 30  ;;  %v761_v55 = vsel %vm757_vm13, %v2065_v9, 30  ;;  %v762_v43 = vsel %vm758_vm14, %v3308_v44, 30 }
 0x30e   : > { %v763_v51 = vsel %vm261_vm2, %v762_v43, 2147483647  ;;  %vm764_vm15 = vcmp.lt.s32.totalorder %v759_v38, %v760_v14  ;;  %v2581_v28 = vmax.f32 %v829_v57, %v830_v33  ;;  %v954_v57 = vadd.f32 %v950_v0, %v2199_v22  ;;  %s1181_s0 = smul.f32 %s2686_s26, %s2129_s13 }
 0x30f   : > { %v765_v11 = vsel %vm764_vm15, %v759_v38, %v760_v14  ;;  %vm766_vm3 = vcmp.lt.s32.totalorder %v761_v55, %v763_v51  ;;  %v959_v33 = vmul.f32 %v958_v15, %v2235_v34  ;;  %v964_v24 = vadd.f32 %v960_v13, %v955_v29 }
 0x310   : > { %v767_v61 = vsel %vm766_vm3, %v761_v55, %v763_v51  ;;  %v890_v23 = vadd.f32 %v886_v45, %v2581_v28  ;;  %v889_v53 = vadd.f32 %v885_v37, %v2581_v28  ;;  %v892_v59 = vadd.f32 %v888_v30, %v2581_v28  ;;  %s1182_s28 = smul.f32 %s1181_s0, %s2686_s26 }
 0x311   : > { %vm768_vm4 = vcmp.lt.s32.totalorder %v765_v11, %v767_v61  ;;  %v891_v41 = vadd.f32 %v887_v39, %v2581_v28  ;;  %v969_v37 = vmul.f32 %v967_v54, %v2110_v17  ;;  %v957_v30 = vadd.f32 %v953_v46, %v2205_v27 }
 0x312   : > { %v2586_v52 = vsel %vm768_vm4, %v765_v11, %v767_v61  ;;  %v896_v12 = vsel %vm246_vm0, %v890_v23, -inf  ;;  %v893_v63 = vsel %vm246_vm0, %v889_v53, -inf  ;;  %v902_v40 = vsel %vm256_vm1, %v892_v59, -inf  ;;  %s1183_s29 = sadd.f32 %s1182_s28, %s1180_s27 }
 0x313   : > { %3312 = vst [vmem:[#allocation29_spill] sm:$0xff] %v2586_v52  ;;  %897 = vmax.xlane.f32.xlu1 %v896_v12  ;;  %894 = vmax.xlane.f32.xlu0 %v893_v63  ;;  %v899_v45 = vsel %vm246_vm0, %v891_v41, -inf  ;;  %v962_v38 = vmul.f32 %v958_v15, %v2241_v50  ;;  %v963_v14 = vadd.f32 %v959_v33, %v954_v57  ;;  %v1023_v13 = vstv %s1016_s7  ;;  %s1265_s7 = sld [smem:[#allocation8 + %s1263_s30]] }
 0x314   : > { %v968_v55 = vmul.f32 %v967_v54, %v2102_v16  ;;  %v956_v43 = vadd.f32 %v952_v60, %v2203_v26  ;;  %v961_v51 = vmul.f32 %v958_v15, %v2239_v36  ;;  %v971_v11 = vmul.f32 %v967_v54, %v2120_v19 }
 0x315   : > { %v966_v39 = vadd.f32 %v962_v38, %v957_v30  ;;  %v973_v61 = vsub.f32 %v964_v24, %v969_v37  ;;  %v970_v59 = vmul.f32 %v967_v54, %v2115_v18  ;;  %v1025_v30 = vmul.f32 %v1023_v13, %v2217_v48 }
 0x316   : > { %v972_v23 = vsub.f32 %v963_v14, %v968_v55  ;;  %v965_v53 = vadd.f32 %v961_v51, %v956_v43  ;;  %v1024_v38 = vmul.f32 %v1023_v13, %v2215_v47  ;;  %v1032_v51 = vstv %s2611_s8  ;;  %s1266_s8 = smul.f32 %s1264_s6, %s2105_s15 }
 0x317   : > { %903 = vmax.xlane.f32.xlu1 %v902_v40  ;;  %900 = vmax.xlane.f32.xlu0 %v899_v45  ;;  %v975_v41 = vsub.f32 %v966_v39, %v971_v11  ;;  %v1027_v39 = vmul.f32 %v1023_v13, %v3301_v3 }
 0x318   : > { %v974_v32 = vsub.f32 %v965_v53, %v970_v59  ;;  %v1034_v53 = vmul.f32 %v1032_v51, %v3299_v6  ;;  %v1026_v59 = vmul.f32 %v1023_v13, %v2219_v49  ;;  %s1267_s2 = smul.f32 %s1266_s8, %s1264_s6 }
 0x319   : > { %s1268_s9 = smul.f32 %s1265_s7, %s2129_s13 }
 0x31b   : > { %s1269_s11 = smul.f32 %s1268_s9, %s1265_s7 }
 0x31d   : > { %s1270_s16 = sadd.f32 %s1269_s11, %s1267_s2 }
 0x3a0   : > { %v2615_v12 = vpop.xlane.xlu1 %897  ;;  %v2617_v63 = vpop.xlane.xlu0 %894 }
 0x3a1   : > { %v977_v40 = vadd.f32 %v973_v61, %v2615_v12  ;;  %v907_v45 = vmax.f32 %v2617_v63, %v2615_v12  ;;  %v976_v58 = vadd.f32 %v972_v23, %v2617_v63  ;;  %v1029_v23 = vadd.f32 %v1025_v30, %v2193_v10 }
 0x3a3   : > { %v981_v15 = vsel %vm246_vm0, %v977_v40, -inf  ;;  %v980_v46 = vsel %vm246_vm0, %v976_v58, -inf  ;;  %v1028_v58 = vadd.f32 %v1024_v38, %v3303_v2  ;;  %v1038_v13 = vadd.f32 %v1034_v53, %v1029_v23 }
 0x3a4   : > { %v904_v0 = vpop.xlane.xlu1 %903  ;;  %v901_v29 = vpop.xlane.xlu0 %900  ;;  %v984_v14 = vmax.f32 %v980_v46, %v981_v15  ;;  %v1036_v15 = vmul.f32 %v1032_v51, %v2229_v8 }
 0x3a5   : > { %v906_v54 = vsel %vm261_vm2, %v904_v0, -inf  ;;  %v979_v57 = vadd.f32 %v975_v41, %v904_v0  ;;  %v978_v33 = vadd.f32 %v974_v32, %v901_v29  ;;  %v1033_v32 = vmul.f32 %v1032_v51, %v3302_v4 }
 0x3a6   : > { %v908_v60 = vmax.f32 %v901_v29, %v906_v54 }
 0x3a7   : > { %v983_v24 = vsel %vm256_vm1, %v979_v57, -inf  ;;  %v982_v37 = vsel %vm246_vm0, %v978_v33, -inf  ;;  %v1041_v57 = vstv %s1022_s17  ;;  %v1030_v33 = vadd.f32 %v1026_v59, %v2195_v20  ;;  %s1337_s17 = sadd.s32 14, %s2255_s25 }
 0x3a8   : > { %v909_v55 = vmax.f32 %v907_v45, %v908_v60  ;;  %v985_v43 = vmax.f32 %v982_v37, %v983_v24  ;;  %v1031_v45 = vadd.f32 %v1027_v39, %v2197_v21  ;;  %v1035_v60 = vmul.f32 %v1032_v51, %v2227_v7  ;;  %s1338_s12 = sld [smem:[#allocation7 + %s1337_s17]] }
 0x3a9   : > { %v1037_v30 = vadd.f32 %v1033_v32, %v1028_v58  ;;  %v1042_v38 = vmul.f32 %v1041_v57, %v2102_v16  ;;  %v1044_v59 = vmul.f32 %v1041_v57, %v2115_v18 }
 0x3aa   : > { %v910_v11 = vrot.slane %v909_v55, 4  ;;  %v986_v61 = vmax.f32 %v984_v14, %v985_v43  ;;  %v1043_v14 = vmul.f32 %v1041_v57, %v2110_v17  ;;  %v1045_v43 = vmul.f32 %v1041_v57, %v2120_v19 }
 0x3ab   : > { %v1046_v51 = vsub.f32 %v1037_v30, %v1042_v38  ;;  %v1119_v30 = vstv %s1104_s19 }
 0x3ac   : > { %v911_v41 = vmax.f32 %v909_v55, %v910_v11  ;;  %v987_v40 = vrot.slane %v986_v61, 4  ;;  %v1040_v55 = vadd.f32 %v1036_v15, %v1031_v45  ;;  %v1047_v62 = vsub.f32 %v1038_v13, %v1043_v14 }
 0x3ae   : > { %v912_v46 = vrot.slane %v911_v41, 2  ;;  %v988_v54 = vmax.f32 %v986_v61, %v987_v40  ;;  %v1039_v40 = vadd.f32 %v1035_v60, %v1030_v33  ;;  %s1340_s19 = smul.f32 %s1338_s12, %s2105_s15 }
 0x3b0   : > { %v913_v24 = vmax.f32 %v911_v41, %v912_v46  ;;  %v989_v37 = vrot.slane %v988_v54, 2  ;;  %v1049_v41 = vsub.f32 %v1040_v55, %v1045_v43  ;;  %v1048_v46 = vsub.f32 %v1039_v40, %v1044_v59  ;;  %s1341_s3 = smul.f32 %s1340_s19, %s1338_s12 }
 0x3b1   : > { %v1121_v55 = vmul.f32 %v1119_v30, %v2237_v35 }
 0x3b2   : > { %v914_v39 = vrot.slane %v913_v24, 1  ;;  %v990_v11 = vmax.f32 %v988_v54, %v989_v37  ;;  %v1110_v37 = vstv %s1103_s18  ;;  %s2761_s18 = sld [smem:[#allocation8 + %s1337_s17]] }
 0x3b3   : > { %v1112_v13 = vmul.f32 %v1110_v37, %v2217_v48  ;;  %v1111_v14 = vmul.f32 %v1110_v37, %v2215_v47  ;;  %v1114_v43 = vmul.f32 %v1110_v37, %v3301_v3  ;;  %v1113_v40 = vmul.f32 %v1110_v37, %v2219_v49 }
 0x3b4   : > { %v915_v52 = vmax.f32 %v913_v24, %v914_v39  ;;  %v991_v61 = vrot.slane %v990_v11, 1  ;;  %v1128_v39 = vstv %s1109_s23  ;;  %s1424_s23 = sadd.s32 15, %s2255_s25 }
 0x3b5   : > { %v1116_v38 = vadd.f32 %v1112_v13, %v2201_v25  ;;  %s1425_s24 = sld [smem:[#allocation7 + %s1424_s23]] }
 0x3b6   : > { %vm916_vm5 = vcmp.ge.f32.partialorder %v2617_v63, %v915_v52  ;;  %vm917_vm6 = vcmp.ge.f32.partialorder %v2615_v12, %v915_v52  ;;  %vm918_vm7 = vcmp.ge.f32.partialorder %v901_v29, %v915_v52  ;;  %vm919_vm8 = vcmp.ge.f32.partialorder %v904_v0, %v915_v52 }
 0x3b7   : > { %v920_v23 = vsel %vm916_vm5, %v2032_v1, 30  ;;  %v921_v53 = vsel %vm917_vm6, %v3300_v5, 30  ;;  %v922_v58 = vsel %vm918_vm7, %v2065_v9, 30  ;;  %v923_v32 = vsel %vm919_vm8, %v3308_v44, 30 }
 0x3b8   : > { %v924_v45 = vsel %vm261_vm2, %v923_v32, 2147483647  ;;  %vm925_vm9 = vcmp.lt.s32.totalorder %v920_v23, %v921_v53  ;;  %v2656_v15 = vmax.f32 %v990_v11, %v991_v61  ;;  %v1115_v11 = vadd.f32 %v1111_v14, %v2199_v22  ;;  %s1342_s20 = smul.f32 %s2761_s18, %s2129_s13 }
 0x3b9   : > { %v926_v54 = vsel %vm925_vm9, %v920_v23, %v921_v53  ;;  %vm927_vm10 = vcmp.lt.s32.totalorder %v922_v58, %v924_v45  ;;  %v1120_v61 = vmul.f32 %v1119_v30, %v2235_v34  ;;  %v1125_v59 = vadd.f32 %v1121_v55, %v1116_v38 }
 0x3ba   : > { %3313 = vst [vmem:[#allocation30_spill] sm:$0xff] %v2656_v15  ;;  %v928_v12 = vsel %vm927_vm10, %v922_v58, %v924_v45  ;;  %v1051_v52 = vadd.f32 %v1047_v62, %v2656_v15  ;;  %v1050_v63 = vadd.f32 %v1046_v51, %v2656_v15  ;;  %v1053_v0 = vadd.f32 %v1049_v41, %v2656_v15  ;;  %s1343_s21 = smul.f32 %s1342_s20, %s2761_s18 }
 0x3bb   : > { %vm929_vm11 = vcmp.lt.s32.totalorder %v926_v54, %v928_v12  ;;  %v1052_v60 = vadd.f32 %v1048_v46, %v2656_v15  ;;  %v1130_v51 = vmul.f32 %v1128_v39, %v2110_v17  ;;  %v1118_v41 = vadd.f32 %v1114_v43, %v2205_v27 }
 0x3bc   : > { %v2661_v29 = vsel %vm929_vm11, %v926_v54, %v928_v12  ;;  %v1057_v57 = vsel %vm246_vm0, %v1051_v52, -inf  ;;  %v1054_v33 = vsel %vm246_vm0, %v1050_v63, -inf  ;;  %v1063_v24 = vsel %vm256_vm1, %v1053_v0, -inf  ;;  %s1344_s22 = sadd.f32 %s1343_s21, %s1341_s3 }
 0x3bd   : > { %3314 = vst [vmem:[#allocation31_spill] sm:$0xff] %v2661_v29  ;;  %1058 = vmax.xlane.f32.xlu1 %v1057_v57  ;;  %1055 = vmax.xlane.f32.xlu0 %v1054_v33  ;;  %v1060_v62 = vsel %vm246_vm0, %v1052_v60, -inf  ;;  %v1123_v23 = vmul.f32 %v1119_v30, %v2241_v50  ;;  %v1124_v53 = vadd.f32 %v1120_v61, %v1115_v11  ;;  %v1184_v55 = vstv %s1177_s14  ;;  %s1426_s14 = sld [smem:[#allocation8 + %s1424_s23]] }
 0x3be   : > { %v1129_v58 = vmul.f32 %v1128_v39, %v2102_v16  ;;  %v1117_v32 = vadd.f32 %v1113_v40, %v2203_v26  ;;  %v1122_v45 = vmul.f32 %v1119_v30, %v2239_v36  ;;  %v1132_v54 = vmul.f32 %v1128_v39, %v2120_v19 }
 0x3bf   : > { %v1127_v46 = vadd.f32 %v1123_v23, %v1118_v41  ;;  %v1134_v12 = vsub.f32 %v1125_v59, %v1130_v51  ;;  %v1131_v0 = vmul.f32 %v1128_v39, %v2115_v18  ;;  %v1186_v41 = vmul.f32 %v1184_v55, %v2217_v48 }
 0x3c0   : > { %v1133_v52 = vsub.f32 %v1124_v53, %v1129_v58  ;;  %v1126_v63 = vadd.f32 %v1122_v45, %v1117_v32  ;;  %v1185_v23 = vmul.f32 %v1184_v55, %v2215_v47  ;;  %v1193_v45 = vstv %s2686_s26  ;;  %s1427_s26 = smul.f32 %s1425_s24, %s2105_s15 }
 0x3c1   : > { %1064 = vmax.xlane.f32.xlu1 %v1063_v24  ;;  %1061 = vmax.xlane.f32.xlu0 %v1060_v62  ;;  %v1136_v60 = vsub.f32 %v1127_v46, %v1132_v54  ;;  %v1188_v46 = vmul.f32 %v1184_v55, %v3301_v3 }
 0x3c2   : > { %v1135_v13 = vsub.f32 %v1126_v63, %v1131_v0  ;;  %v1195_v63 = vmul.f32 %v1193_v45, %v3299_v6  ;;  %v1187_v0 = vmul.f32 %v1184_v55, %v2219_v49  ;;  %s1428_s0 = smul.f32 %s1427_s26, %s1425_s24 }
 0x3c3   : > { %s1429_s1 = smul.f32 %s1426_s14, %s2129_s13 }
 0x3c5   : > { %s1430_s27 = smul.f32 %s1429_s1, %s1426_s14 }
 0x3c7   : > { %s1431_s28 = sadd.f32 %s1430_s27, %s1428_s0 }
 0x44a   : > { %v2690_v57 = vpop.xlane.xlu1 %1058  ;;  %v2692_v33 = vpop.xlane.xlu0 %1055 }
 0x44b   : > { %v1138_v24 = vadd.f32 %v1134_v12, %v2690_v57  ;;  %v1068_v62 = vmax.f32 %v2692_v33, %v2690_v57  ;;  %v1137_v37 = vadd.f32 %v1133_v52, %v2692_v33  ;;  %v1190_v52 = vadd.f32 %v1186_v41, %v2193_v10 }
 0x44d   : > { %v1142_v30 = vsel %vm246_vm0, %v1138_v24, -inf  ;;  %v1141_v43 = vsel %vm246_vm0, %v1137_v37, -inf  ;;  %v1189_v37 = vadd.f32 %v1185_v23, %v3303_v2  ;;  %v1199_v55 = vadd.f32 %v1195_v63, %v1190_v52 }
 0x44e   : > { %v1065_v14 = vpop.xlane.xlu1 %1064  ;;  %v1062_v38 = vpop.xlane.xlu0 %1061  ;;  %v1145_v53 = vmax.f32 %v1141_v43, %v1142_v30  ;;  %v1197_v30 = vmul.f32 %v1193_v45, %v2229_v8 }
 0x44f   : > { %v1067_v39 = vsel %vm261_vm2, %v1065_v14, -inf  ;;  %v1140_v11 = vadd.f32 %v1136_v60, %v1065_v14  ;;  %v1139_v61 = vadd.f32 %v1135_v13, %v1062_v38  ;;  %v1194_v13 = vmul.f32 %v1193_v45, %v3302_v4 }
 0x450   : > { %v1069_v40 = vmax.f32 %v1062_v38, %v1067_v39 }
 0x451   : > { %v1144_v59 = vsel %vm256_vm1, %v1140_v11, -inf  ;;  %v1143_v51 = vsel %vm246_vm0, %v1139_v61, -inf  ;;  %v1202_v11 = vstv %s1183_s29  ;;  %v1191_v61 = vadd.f32 %v1187_v0, %v2195_v20  ;;  %s1498_s29 = sadd.s32 16, %s2255_s25 }
 0x452   : > { %v1070_v58 = vmax.f32 %v1068_v62, %v1069_v40  ;;  %v1146_v32 = vmax.f32 %v1143_v51, %v1144_v59  ;;  %v1192_v62 = vadd.f32 %v1188_v46, %v2197_v21  ;;  %v1196_v40 = vmul.f32 %v1193_v45, %v2227_v7  ;;  %s1499_s30 = sld [smem:[#allocation7 + %s1498_s29]] }
 0x453   : > { %v1198_v41 = vadd.f32 %v1194_v13, %v1189_v37  ;;  %v1203_v23 = vmul.f32 %v1202_v11, %v2102_v16  ;;  %v1205_v0 = vmul.f32 %v1202_v11, %v2115_v18 }
 0x454   : > { %v1071_v54 = vrot.slane %v1070_v58, 4  ;;  %v1147_v12 = vmax.f32 %v1145_v53, %v1146_v32  ;;  %v1204_v53 = vmul.f32 %v1202_v11, %v2110_v17  ;;  %v1206_v32 = vmul.f32 %v1202_v11, %v2120_v19 }
 0x455   : > { %v1207_v45 = vsub.f32 %v1198_v41, %v1203_v23  ;;  %v1280_v41 = vstv %s1265_s7 }
 0x456   : > { %v1072_v60 = vmax.f32 %v1070_v58, %v1071_v54  ;;  %v1148_v24 = vrot.slane %v1147_v12, 4  ;;  %v1201_v58 = vadd.f32 %v1197_v30, %v1192_v62  ;;  %v1208_v15 = vsub.f32 %v1199_v55, %v1204_v53 }
 0x458   : > { %v1073_v43 = vrot.slane %v1072_v60, 2  ;;  %v1149_v39 = vmax.f32 %v1147_v12, %v1148_v24  ;;  %v1200_v24 = vadd.f32 %v1196_v40, %v1191_v61  ;;  %s1501_s7 = smul.f32 %s1499_s30, %s2105_s15 }
 0x45a   : > { %v1074_v59 = vmax.f32 %v1072_v60, %v1073_v43  ;;  %v1150_v51 = vrot.slane %v1149_v39, 2  ;;  %v1210_v60 = vsub.f32 %v1201_v58, %v1206_v32  ;;  %v1209_v43 = vsub.f32 %v1200_v24, %v1205_v0  ;;  %s1502_s9 = smul.f32 %s1501_s7, %s1499_s30 }
 0x45b   : > { %v1282_v58 = vmul.f32 %v1280_v41, %v2237_v35 }
 0x45c   : > { %v1075_v46 = vrot.slane %v1074_v59, 1  ;;  %v1151_v54 = vmax.f32 %v1149_v39, %v1150_v51  ;;  %v1271_v51 = vstv %s1264_s6  ;;  %s2836_s6 = sld [smem:[#allocation8 + %s1498_s29]] }
 0x45d   : > { %v1273_v55 = vmul.f32 %v1271_v51, %v2217_v48  ;;  %v1272_v53 = vmul.f32 %v1271_v51, %v2215_v47  ;;  %v1275_v32 = vmul.f32 %v1271_v51, %v3301_v3  ;;  %v1274_v24 = vmul.f32 %v1271_v51, %v2219_v49 }
 0x45e   : > { %v1076_v29 = vmax.f32 %v1074_v59, %v1075_v46  ;;  %v1152_v12 = vrot.slane %v1151_v54, 1  ;;  %v1289_v46 = vstv %s1270_s16  ;;  %s1585_s16 = sadd.s32 17, %s2255_s25 }
 0x45f   : > { %v1277_v23 = vadd.f32 %v1273_v55, %v2201_v25  ;;  %s1586_s17 = sld [smem:[#allocation7 + %s1585_s16]] }
 0x460   : > { %vm1077_vm12 = vcmp.ge.f32.partialorder %v2692_v33, %v1076_v29  ;;  %vm1078_vm13 = vcmp.ge.f32.partialorder %v2690_v57, %v1076_v29  ;;  %vm1079_vm14 = vcmp.ge.f32.partialorder %v1062_v38, %v1076_v29  ;;  %vm1080_vm15 = vcmp.ge.f32.partialorder %v1065_v14, %v1076_v29 }
 0x461   : > { %v1081_v52 = vsel %vm1077_vm12, %v2032_v1, 30  ;;  %v1082_v63 = vsel %vm1078_vm13, %v3300_v5, 30  ;;  %v1083_v37 = vsel %vm1079_vm14, %v2065_v9, 30  ;;  %v1084_v13 = vsel %vm1080_vm15, %v3308_v44, 30 }
 0x462   : > { %v1085_v62 = vsel %vm261_vm2, %v1084_v13, 2147483647  ;;  %vm1086_vm3 = vcmp.lt.s32.totalorder %v1081_v52, %v1082_v63  ;;  %v2731_v30 = vmax.f32 %v1151_v54, %v1152_v12  ;;  %v1276_v54 = vadd.f32 %v1272_v53, %v2199_v22  ;;  %s1503_s8 = smul.f32 %s2836_s6, %s2129_s13 }
 0x463   : > { %v1087_v39 = vsel %vm1086_vm3, %v1081_v52, %v1082_v63  ;;  %vm1088_vm4 = vcmp.lt.s32.totalorder %v1083_v37, %v1085_v62  ;;  %v1281_v12 = vmul.f32 %v1280_v41, %v2235_v34  ;;  %v1286_v0 = vadd.f32 %v1282_v58, %v1277_v23 }
 0x464   : > { %3315 = vst [vmem:[#allocation32_spill] sm:$0xff] %v2731_v30  ;;  %v1089_v57 = vsel %vm1088_vm4, %v1083_v37, %v1085_v62  ;;  %v1212_v29 = vadd.f32 %v1208_v15, %v2731_v30  ;;  %v1211_v33 = vadd.f32 %v1207_v45, %v2731_v30  ;;  %v1214_v14 = vadd.f32 %v1210_v60, %v2731_v30  ;;  %s1504_s2 = smul.f32 %s1503_s8, %s2836_s6 }
 0x465   : > { %vm1090_vm5 = vcmp.lt.s32.totalorder %v1087_v39, %v1089_v57  ;;  %v1213_v40 = vadd.f32 %v1209_v43, %v2731_v30  ;;  %v1291_v45 = vmul.f32 %v1289_v46, %v2110_v17  ;;  %v1279_v60 = vadd.f32 %v1275_v32, %v2205_v27 }
 0x466   : > { %v2736_v38 = vsel %vm1090_vm5, %v1087_v39, %v1089_v57  ;;  %v1218_v11 = vsel %vm246_vm0, %v1212_v29, -inf  ;;  %v1215_v61 = vsel %vm246_vm0, %v1211_v33, -inf  ;;  %v1224_v59 = vsel %vm256_vm1, %v1214_v14, -inf  ;;  %s1505_s11 = sadd.f32 %s1504_s2, %s1502_s9 }
 0x467   : > { %3316 = vst [vmem:[#allocation33_spill] sm:$0xff] %v2736_v38  ;;  %1219 = vmax.xlane.f32.xlu1 %v1218_v11  ;;  %1216 = vmax.xlane.f32.xlu0 %v1215_v61  ;;  %v1221_v15 = vsel %vm246_vm0, %v1213_v40, -inf  ;;  %v1284_v52 = vmul.f32 %v1280_v41, %v2241_v50  ;;  %v1285_v63 = vadd.f32 %v1281_v12, %v1276_v54  ;;  %v1345_v58 = vstv %s1338_s12  ;;  %s1587_s12 = sld [smem:[#allocation8 + %s1585_s16]] }
 0x468   : > { %v1290_v37 = vmul.f32 %v1289_v46, %v2102_v16  ;;  %v1278_v13 = vadd.f32 %v1274_v24, %v2203_v26  ;;  %v1283_v62 = vmul.f32 %v1280_v41, %v2239_v36  ;;  %v1293_v39 = vmul.f32 %v1289_v46, %v2120_v19 }
 0x469   : > { %v1288_v43 = vadd.f32 %v1284_v52, %v1279_v60  ;;  %v1295_v57 = vsub.f32 %v1286_v0, %v1291_v45  ;;  %v1292_v14 = vmul.f32 %v1289_v46, %v2115_v18  ;;  %v1347_v60 = vmul.f32 %v1345_v58, %v2217_v48 }
 0x46a   : > { %v1294_v29 = vsub.f32 %v1285_v63, %v1290_v37  ;;  %v1287_v33 = vadd.f32 %v1283_v62, %v1278_v13  ;;  %v1346_v52 = vmul.f32 %v1345_v58, %v2215_v47  ;;  %v1354_v62 = vstv %s2761_s18  ;;  %s1588_s18 = smul.f32 %s1586_s17, %s2105_s15 }
 0x46b   : > { %1225 = vmax.xlane.f32.xlu1 %v1224_v59  ;;  %1222 = vmax.xlane.f32.xlu0 %v1221_v15  ;;  %v1297_v40 = vsub.f32 %v1288_v43, %v1293_v39  ;;  %v1349_v43 = vmul.f32 %v1345_v58, %v3301_v3 }
 0x46c   : > { %v1296_v55 = vsub.f32 %v1287_v33, %v1292_v14  ;;  %v1356_v33 = vmul.f32 %v1354_v62, %v3299_v6  ;;  %v1348_v14 = vmul.f32 %v1345_v58, %v2219_v49  ;;  %s1589_s20 = smul.f32 %s1588_s18, %s1586_s17 }
 0x46d   : > { %s1590_s19 = smul.f32 %s1587_s12, %s2129_s13 }
 0x46f   : > { %s1591_s3 = smul.f32 %s1590_s19, %s1587_s12 }
 0x471   : > { %s1592_s21 = sadd.f32 %s1591_s3, %s1589_s20 }
 0x4f4   : > { %v2765_v11 = vpop.xlane.xlu1 %1219  ;;  %v2767_v61 = vpop.xlane.xlu0 %1216 }
 0x4f5   : > { %v1299_v59 = vadd.f32 %v1295_v57, %v2765_v11  ;;  %v1229_v15 = vmax.f32 %v2767_v61, %v2765_v11  ;;  %v1298_v51 = vadd.f32 %v1294_v29, %v2767_v61  ;;  %v1351_v29 = vadd.f32 %v1347_v60, %v2193_v10 }
 0x4f7   : > { %v1303_v41 = vsel %vm246_vm0, %v1299_v59, -inf  ;;  %v1302_v32 = vsel %vm246_vm0, %v1298_v51, -inf  ;;  %v1350_v51 = vadd.f32 %v1346_v52, %v3303_v2  ;;  %v1360_v58 = vadd.f32 %v1356_v33, %v1351_v29 }
 0x4f8   : > { %v1226_v53 = vpop.xlane.xlu1 %1225  ;;  %v1223_v23 = vpop.xlane.xlu0 %1222  ;;  %v1306_v63 = vmax.f32 %v1302_v32, %v1303_v41  ;;  %v1358_v41 = vmul.f32 %v1354_v62, %v2229_v8 }
 0x4f9   : > { %v1228_v46 = vsel %vm261_vm2, %v1226_v53, -inf  ;;  %v1301_v54 = vadd.f32 %v1297_v40, %v1226_v53  ;;  %v1300_v12 = vadd.f32 %v1296_v55, %v1223_v23  ;;  %v1355_v55 = vmul.f32 %v1354_v62, %v3302_v4 }
 0x4fa   : > { %v1230_v24 = vmax.f32 %v1223_v23, %v1228_v46 }
 0x4fb   : > { %v1305_v0 = vsel %vm256_vm1, %v1301_v54, -inf  ;;  %v1304_v45 = vsel %vm246_vm0, %v1300_v12, -inf  ;;  %v1363_v54 = vstv %s1344_s22  ;;  %v1352_v12 = vadd.f32 %v1348_v14, %v2195_v20  ;;  %s1659_s22 = sadd.s32 18, %s2255_s25 }
 0x4fc   : > { %v1231_v37 = vmax.f32 %v1229_v15, %v1230_v24  ;;  %v1307_v13 = vmax.f32 %v1304_v45, %v1305_v0  ;;  %v1353_v15 = vadd.f32 %v1349_v43, %v2197_v21  ;;  %v1357_v24 = vmul.f32 %v1354_v62, %v2227_v7  ;;  %s1660_s23 = sld [smem:[#allocation7 + %s1659_s22]] }
 0x4fd   : > { %v1359_v60 = vadd.f32 %v1355_v55, %v1350_v51  ;;  %v1364_v52 = vmul.f32 %v1363_v54, %v2102_v16  ;;  %v1366_v14 = vmul.f32 %v1363_v54, %v2115_v18 }
 0x4fe   : > { %v1232_v39 = vrot.slane %v1231_v37, 4  ;;  %v1308_v57 = vmax.f32 %v1306_v63, %v1307_v13  ;;  %v1365_v63 = vmul.f32 %v1363_v54, %v2110_v17  ;;  %v1367_v13 = vmul.f32 %v1363_v54, %v2120_v19 }
 0x4ff   : > { %v1368_v62 = vsub.f32 %v1359_v60, %v1364_v52  ;;  %v1441_v60 = vstv %s1426_s14 }
 0x500   : > { %v1233_v40 = vmax.f32 %v1231_v37, %v1232_v39  ;;  %v1309_v59 = vrot.slane %v1308_v57, 4  ;;  %v1362_v37 = vadd.f32 %v1358_v41, %v1353_v15  ;;  %v1369_v30 = vsub.f32 %v1360_v58, %v1365_v63 }
 0x502   : > { %v1234_v32 = vrot.slane %v1233_v40, 2  ;;  %v1310_v46 = vmax.f32 %v1308_v57, %v1309_v59  ;;  %v1361_v59 = vadd.f32 %v1357_v24, %v1352_v12  ;;  %s1662_s14 = smul.f32 %s1660_s23, %s2105_s15 }
 0x504   : > { %v1235_v0 = vmax.f32 %v1233_v40, %v1234_v32  ;;  %v1311_v45 = vrot.slane %v1310_v46, 2  ;;  %v1371_v40 = vsub.f32 %v1362_v37, %v1367_v13  ;;  %v1370_v32 = vsub.f32 %v1361_v59, %v1366_v14  ;;  %s1663_s1 = smul.f32 %s1662_s14, %s1660_s23 }
 0x505   : > { %v1443_v37 = vmul.f32 %v1441_v60, %v2237_v35 }
 0x506   : > { %v1236_v43 = vrot.slane %v1235_v0, 1  ;;  %v1312_v39 = vmax.f32 %v1310_v46, %v1311_v45  ;;  %v1432_v45 = vstv %s1425_s24  ;;  %s2911_s24 = sld [smem:[#allocation8 + %s1659_s22]] }
 0x507   : > { %v1434_v58 = vmul.f32 %v1432_v45, %v2217_v48  ;;  %v1433_v63 = vmul.f32 %v1432_v45, %v2215_v47  ;;  %v1436_v13 = vmul.f32 %v1432_v45, %v3301_v3  ;;  %v1435_v59 = vmul.f32 %v1432_v45, %v2219_v49 }
 0x508   : > { %v1237_v38 = vmax.f32 %v1235_v0, %v1236_v43  ;;  %v1313_v57 = vrot.slane %v1312_v39, 1  ;;  %v1450_v43 = vstv %s1431_s28  ;;  %s1746_s28 = sadd.s32 19, %s2255_s25 }
 0x509   : > { %v1438_v52 = vadd.f32 %v1434_v58, %v2201_v25  ;;  %s1747_s29 = sld [smem:[#allocation7 + %s1746_s28]] }
 0x50a   : > { %vm1238_vm6 = vcmp.ge.f32.partialorder %v2767_v61, %v1237_v38  ;;  %vm1239_vm7 = vcmp.ge.f32.partialorder %v2765_v11, %v1237_v38  ;;  %vm1240_vm8 = vcmp.ge.f32.partialorder %v1223_v23, %v1237_v38  ;;  %vm1241_vm9 = vcmp.ge.f32.partialorder %v1226_v53, %v1237_v38 }
 0x50b   : > { %v1242_v29 = vsel %vm1238_vm6, %v2032_v1, 30  ;;  %v1243_v33 = vsel %vm1239_vm7, %v3300_v5, 30  ;;  %v1244_v51 = vsel %vm1240_vm8, %v2065_v9, 30  ;;  %v1245_v55 = vsel %vm1241_vm9, %v3308_v44, 30 }
 0x50c   : > { %v1246_v15 = vsel %vm261_vm2, %v1245_v55, 2147483647  ;;  %vm1247_vm10 = vcmp.lt.s32.totalorder %v1242_v29, %v1243_v33  ;;  %v2806_v41 = vmax.f32 %v1312_v39, %v1313_v57  ;;  %v1437_v39 = vadd.f32 %v1433_v63, %v2199_v22  ;;  %s1664_s26 = smul.f32 %s2911_s24, %s2129_s13 }
 0x50d   : > { %v1248_v46 = vsel %vm1247_vm10, %v1242_v29, %v1243_v33  ;;  %vm1249_vm11 = vcmp.lt.s32.totalorder %v1244_v51, %v1246_v15  ;;  %v1442_v57 = vmul.f32 %v1441_v60, %v2235_v34  ;;  %v1447_v14 = vadd.f32 %v1443_v37, %v1438_v52 }
 0x50e   : > { %3317 = vst [vmem:[#allocation34_spill] sm:$0xff] %v2806_v41  ;;  %v1250_v11 = vsel %vm1249_vm11, %v1244_v51, %v1246_v15  ;;  %v1373_v38 = vadd.f32 %v1369_v30, %v2806_v41  ;;  %v1372_v61 = vadd.f32 %v1368_v62, %v2806_v41  ;;  %v1375_v53 = vadd.f32 %v1371_v40, %v2806_v41  ;;  %s1665_s0 = smul.f32 %s1664_s26, %s2911_s24 }
 0x50f   : > { %vm1251_vm12 = vcmp.lt.s32.totalorder %v1248_v46, %v1250_v11  ;;  %v1374_v24 = vadd.f32 %v1370_v32, %v2806_v41  ;;  %v1452_v62 = vmul.f32 %v1450_v43, %v2110_v17  ;;  %v1440_v40 = vadd.f32 %v1436_v13, %v2205_v27 }
 0x510   : > { %v2811_v23 = vsel %vm1251_vm12, %v1248_v46, %v1250_v11  ;;  %v1379_v54 = vsel %vm246_vm0, %v1373_v38, -inf  ;;  %v1376_v12 = vsel %vm246_vm0, %v1372_v61, -inf  ;;  %v1385_v0 = vsel %vm256_vm1, %v1375_v53, -inf  ;;  %s1666_s27 = sadd.f32 %s1665_s0, %s1663_s1 }
 0x511   : > { %3318 = vst [vmem:[#allocation35_spill] sm:$0xff] %v2811_v23  ;;  %1380 = vmax.xlane.f32.xlu1 %v1379_v54  ;;  %1377 = vmax.xlane.f32.xlu0 %v1376_v12  ;;  %v1382_v30 = vsel %vm246_vm0, %v1374_v24, -inf  ;;  %v1445_v29 = vmul.f32 %v1441_v60, %v2241_v50  ;;  %v1446_v33 = vadd.f32 %v1442_v57, %v1437_v39  ;;  %v1506_v37 = vstv %s1499_s30  ;;  %s1748_s30 = sld [smem:[#allocation8 + %s1746_s28]] }
 0x512   : > { %v1451_v51 = vmul.f32 %v1450_v43, %v2102_v16  ;;  %v1439_v55 = vadd.f32 %v1435_v59, %v2203_v26  ;;  %v1444_v15 = vmul.f32 %v1441_v60, %v2239_v36  ;;  %v1454_v46 = vmul.f32 %v1450_v43, %v2120_v19 }
 0x513   : > { %v1449_v32 = vadd.f32 %v1445_v29, %v1440_v40  ;;  %v1456_v11 = vsub.f32 %v1447_v14, %v1452_v62  ;;  %v1453_v53 = vmul.f32 %v1450_v43, %v2115_v18  ;;  %v1508_v40 = vmul.f32 %v1506_v37, %v2217_v48 }
 0x514   : > { %v1455_v38 = vsub.f32 %v1446_v33, %v1451_v51  ;;  %v1448_v61 = vadd.f32 %v1444_v15, %v1439_v55  ;;  %v1507_v29 = vmul.f32 %v1506_v37, %v2215_v47  ;;  %v1515_v15 = vstv %s2836_s6  ;;  %s1749_s6 = smul.f32 %s1747_s29, %s2105_s15 }
 0x515   : > { %1386 = vmax.xlane.f32.xlu1 %v1385_v0  ;;  %1383 = vmax.xlane.f32.xlu0 %v1382_v30  ;;  %v1458_v24 = vsub.f32 %v1449_v32, %v1454_v46  ;;  %v1510_v32 = vmul.f32 %v1506_v37, %v3301_v3 }
 0x516   : > { %v1457_v58 = vsub.f32 %v1448_v61, %v1453_v53  ;;  %v1517_v61 = vmul.f32 %v1515_v15, %v3299_v6  ;;  %v1509_v53 = vmul.f32 %v1506_v37, %v2219_v49  ;;  %s1750_s8 = smul.f32 %s1749_s6, %s1747_s29 }
 0x517   : > { %s1751_s7 = smul.f32 %s1748_s30, %s2129_s13 }
 0x519   : > { %s1752_s9 = smul.f32 %s1751_s7, %s1748_s30 }
 0x51b   : > { %s1753_s2 = sadd.f32 %s1752_s9, %s1750_s8 }
 0x59e   : > { %v2840_v54 = vpop.xlane.xlu1 %1380  ;;  %v2842_v12 = vpop.xlane.xlu0 %1377 }
 0x59f   : > { %v1460_v0 = vadd.f32 %v1456_v11, %v2840_v54  ;;  %v1390_v30 = vmax.f32 %v2842_v12, %v2840_v54  ;;  %v1459_v45 = vadd.f32 %v1455_v38, %v2842_v12  ;;  %v1512_v38 = vadd.f32 %v1508_v40, %v2193_v10 }
 0x5a1   : > { %v1464_v60 = vsel %vm246_vm0, %v1460_v0, -inf  ;;  %v1463_v13 = vsel %vm246_vm0, %v1459_v45, -inf  ;;  %v1511_v45 = vadd.f32 %v1507_v29, %v3303_v2  ;;  %v1521_v37 = vadd.f32 %v1517_v61, %v1512_v38 }
 0x5a2   : > { %v1387_v63 = vpop.xlane.xlu1 %1386  ;;  %v1384_v52 = vpop.xlane.xlu0 %1383  ;;  %v1467_v33 = vmax.f32 %v1463_v13, %v1464_v60  ;;  %v1519_v60 = vmul.f32 %v1515_v15, %v2229_v8 }
 0x5a3   : > { %v1389_v43 = vsel %vm261_vm2, %v1387_v63, -inf  ;;  %v1462_v39 = vadd.f32 %v1458_v24, %v1387_v63  ;;  %v1461_v57 = vadd.f32 %v1457_v58, %v1384_v52  ;;  %v1516_v58 = vmul.f32 %v1515_v15, %v3302_v4 }
 0x5a4   : > { %v1391_v59 = vmax.f32 %v1384_v52, %v1389_v43 }
 0x5a5   : > { %v1466_v14 = vsel %vm256_vm1, %v1462_v39, -inf  ;;  %v1465_v62 = vsel %vm246_vm0, %v1461_v57, -inf  ;;  %v1524_v39 = vstv %s1505_s11  ;;  %v1513_v57 = vadd.f32 %v1509_v53, %v2195_v20 }
 0x5a6   : > { %v1392_v51 = vmax.f32 %v1390_v30, %v1391_v59  ;;  %v1468_v55 = vmax.f32 %v1465_v62, %v1466_v14  ;;  %v1514_v30 = vadd.f32 %v1510_v32, %v2197_v21  ;;  %v1518_v59 = vmul.f32 %v1515_v15, %v2227_v7 }
 0x5a7   : > { %v1520_v40 = vadd.f32 %v1516_v58, %v1511_v45  ;;  %v1525_v29 = vmul.f32 %v1524_v39, %v2102_v16  ;;  %v1527_v53 = vmul.f32 %v1524_v39, %v2115_v18 }
 0x5a8   : > { %v1393_v46 = vrot.slane %v1392_v51, 4  ;;  %v1469_v11 = vmax.f32 %v1467_v33, %v1468_v55  ;;  %v1526_v33 = vmul.f32 %v1524_v39, %v2110_v17  ;;  %v1528_v55 = vmul.f32 %v1524_v39, %v2120_v19 }
 0x5a9   : > { %v1529_v15 = vsub.f32 %v1520_v40, %v1525_v29  ;;  %v1602_v40 = vstv %s1587_s12 }
 0x5aa   : > { %v1394_v24 = vmax.f32 %v1392_v51, %v1393_v46  ;;  %v1470_v0 = vrot.slane %v1469_v11, 4  ;;  %v1523_v51 = vadd.f32 %v1519_v60, %v1514_v30  ;;  %v1530_v41 = vsub.f32 %v1521_v37, %v1526_v33 }
 0x5ac   : > { %v1395_v13 = vrot.slane %v1394_v24, 2  ;;  %v1471_v43 = vmax.f32 %v1469_v11, %v1470_v0  ;;  %v1522_v0 = vadd.f32 %v1518_v59, %v1513_v57 }
 0x5ae   : > { %v1396_v14 = vmax.f32 %v1394_v24, %v1395_v13  ;;  %v1472_v62 = vrot.slane %v1471_v43, 2  ;;  %v1532_v24 = vsub.f32 %v1523_v51, %v1528_v55  ;;  %v1531_v13 = vsub.f32 %v1522_v0, %v1527_v53 }
 0x5af   : > { %v1604_v51 = vmul.f32 %v1602_v40, %v2237_v35 }
 0x5b0   : > { %v1397_v32 = vrot.slane %v1396_v14, 1  ;;  %v1473_v46 = vmax.f32 %v1471_v43, %v1472_v62  ;;  %v1593_v62 = vstv %s1586_s17 }
 0x5b1   : > { %v1595_v37 = vmul.f32 %v1593_v62, %v2217_v48  ;;  %v1594_v33 = vmul.f32 %v1593_v62, %v2215_v47  ;;  %v1597_v55 = vmul.f32 %v1593_v62, %v3301_v3  ;;  %v1596_v0 = vmul.f32 %v1593_v62, %v2219_v49 }
 0x5b2   : > { %v1398_v23 = vmax.f32 %v1396_v14, %v1397_v32  ;;  %v1474_v11 = vrot.slane %v1473_v46, 1  ;;  %v1611_v32 = vstv %s1592_s21 }
 0x5b3   : > { %v1599_v29 = vadd.f32 %v1595_v37, %v2201_v25 }
 0x5b4   : > { %vm1399_vm13 = vcmp.ge.f32.partialorder %v2842_v12, %v1398_v23  ;;  %vm1400_vm14 = vcmp.ge.f32.partialorder %v2840_v54, %v1398_v23  ;;  %vm1401_vm15 = vcmp.ge.f32.partialorder %v1384_v52, %v1398_v23  ;;  %vm1402_vm3 = vcmp.ge.f32.partialorder %v1387_v63, %v1398_v23 }
 0x5b5   : > { %v1403_v38 = vsel %vm1399_vm13, %v2032_v1, 30  ;;  %v1404_v61 = vsel %vm1400_vm14, %v3300_v5, 30  ;;  %v1405_v45 = vsel %vm1401_vm15, %v2065_v9, 30  ;;  %v1406_v58 = vsel %vm1402_vm3, %v3308_v44, 30 }
 0x5b6   : > { %v1407_v30 = vsel %vm261_vm2, %v1406_v58, 2147483647  ;;  %vm1408_vm4 = vcmp.lt.s32.totalorder %v1403_v38, %v1404_v61  ;;  %v2881_v60 = vmax.f32 %v1473_v46, %v1474_v11  ;;  %v1598_v46 = vadd.f32 %v1594_v33, %v2199_v22 }
 0x5b7   : > { %v1409_v43 = vsel %vm1408_vm4, %v1403_v38, %v1404_v61  ;;  %vm1410_vm5 = vcmp.lt.s32.totalorder %v1405_v45, %v1407_v30  ;;  %v1603_v11 = vmul.f32 %v1602_v40, %v2235_v34  ;;  %v1608_v53 = vadd.f32 %v1604_v51, %v1599_v29 }
 0x5b8   : > { %v1411_v54 = vsel %vm1410_vm5, %v1405_v45, %v1407_v30  ;;  %v1534_v23 = vadd.f32 %v1530_v41, %v2881_v60  ;;  %v1533_v12 = vadd.f32 %v1529_v15, %v2881_v60  ;;  %v1536_v63 = vadd.f32 %v1532_v24, %v2881_v60 }
 0x5b9   : > { %vm1412_vm6 = vcmp.lt.s32.totalorder %v1409_v43, %v1411_v54  ;;  %v1535_v59 = vadd.f32 %v1531_v13, %v2881_v60  ;;  %v1613_v15 = vmul.f32 %v1611_v32, %v2110_v17  ;;  %v1601_v24 = vadd.f32 %v1597_v55, %v2205_v27 }
 0x5ba   : > { %v2886_v52 = vsel %vm1412_vm6, %v1409_v43, %v1411_v54  ;;  %v1540_v39 = vsel %vm246_vm0, %v1534_v23, -inf  ;;  %v1537_v57 = vsel %vm246_vm0, %v1533_v12, -inf  ;;  %v1546_v14 = vsel %vm256_vm1, %v1536_v63, -inf }
 0x5bb   : > { %1541 = vmax.xlane.f32.xlu1 %v1540_v39  ;;  %1538 = vmax.xlane.f32.xlu0 %v1537_v57  ;;  %v1543_v41 = vsel %vm246_vm0, %v1535_v59, -inf  ;;  %v1606_v38 = vmul.f32 %v1602_v40, %v2241_v50  ;;  %v1607_v61 = vadd.f32 %v1603_v11, %v1598_v46  ;;  %v1612_v45 = vmul.f32 %v1611_v32, %v2102_v16 }
 0x5bc   : > { %v1600_v58 = vadd.f32 %v1596_v0, %v2203_v26  ;;  %v1605_v30 = vmul.f32 %v1602_v40, %v2239_v36  ;;  %v1615_v43 = vmul.f32 %v1611_v32, %v2120_v19  ;;  %v1617_v54 = vsub.f32 %v1608_v53, %v1613_v15 }
 0x5bd   : > { %v1610_v13 = vadd.f32 %v1606_v38, %v1601_v24  ;;  %v1616_v23 = vsub.f32 %v1607_v61, %v1612_v45  ;;  %v1614_v63 = vmul.f32 %v1611_v32, %v2115_v18  ;;  %v1667_v51 = vstv %s1660_s23 }
 0x5be   : > { %v1609_v12 = vadd.f32 %v1605_v30, %v1600_v58  ;;  %v1669_v24 = vmul.f32 %v1667_v51, %v2217_v48  ;;  %v1668_v38 = vmul.f32 %v1667_v51, %v2215_v47  ;;  %v1676_v30 = vstv %s2911_s24 }
 0x5bf   : > { %1547 = vmax.xlane.f32.xlu1 %v1546_v14  ;;  %1544 = vmax.xlane.f32.xlu0 %v1543_v41  ;;  %v1619_v59 = vsub.f32 %v1610_v13, %v1615_v43  ;;  %v1671_v13 = vmul.f32 %v1667_v51, %v3301_v3 }
 0x5c0   : > { %v1618_v37 = vsub.f32 %v1609_v12, %v1614_v63  ;;  %v1678_v12 = vmul.f32 %v1676_v30, %v3299_v6  ;;  %v1670_v63 = vmul.f32 %v1667_v51, %v2219_v49 }
 0x648   : > { %v2915_v39 = vpop.xlane.xlu1 %1541  ;;  %v2917_v57 = vpop.xlane.xlu0 %1538 }
 0x649   : > { %v1621_v14 = vadd.f32 %v1617_v54, %v2915_v39  ;;  %v1551_v41 = vmax.f32 %v2917_v57, %v2915_v39  ;;  %v1620_v62 = vadd.f32 %v1616_v23, %v2917_v57  ;;  %v1673_v23 = vadd.f32 %v1669_v24, %v2193_v10 }
 0x64b   : > { %v1625_v40 = vsel %vm246_vm0, %v1621_v14, -inf  ;;  %v1624_v55 = vsel %vm246_vm0, %v1620_v62, -inf  ;;  %v1672_v62 = vadd.f32 %v1668_v38, %v3303_v2  ;;  %v1682_v51 = vadd.f32 %v1678_v12, %v1673_v23 }
 0x64c   : > { %v1548_v33 = vpop.xlane.xlu1 %1547  ;;  %v1545_v29 = vpop.xlane.xlu0 %1544  ;;  %v1628_v61 = vmax.f32 %v1624_v55, %v1625_v40  ;;  %v1680_v40 = vmul.f32 %v1676_v30, %v2229_v8 }
 0x64d   : > { %v1550_v32 = vsel %vm261_vm2, %v1548_v33, -inf  ;;  %v1623_v46 = vadd.f32 %v1619_v59, %v1548_v33  ;;  %v1622_v11 = vadd.f32 %v1618_v37, %v1545_v29  ;;  %v1677_v37 = vmul.f32 %v1676_v30, %v3302_v4 }
 0x64e   : > { %v1552_v0 = vmax.f32 %v1545_v29, %v1550_v32 }
 0x64f   : > { %v1627_v53 = vsel %vm256_vm1, %v1623_v46, -inf  ;;  %v1626_v15 = vsel %vm246_vm0, %v1622_v11, -inf  ;;  %v1685_v46 = vstv %s1666_s27  ;;  %v1674_v11 = vadd.f32 %v1670_v63, %v2195_v20 }
 0x650   : > { %v1553_v45 = vmax.f32 %v1551_v41, %v1552_v0  ;;  %v1629_v58 = vmax.f32 %v1626_v15, %v1627_v53  ;;  %v1675_v41 = vadd.f32 %v1671_v13, %v2197_v21  ;;  %v1679_v0 = vmul.f32 %v1676_v30, %v2227_v7 }
 0x651   : > { %v1681_v24 = vadd.f32 %v1677_v37, %v1672_v62  ;;  %v1686_v38 = vmul.f32 %v1685_v46, %v2102_v16  ;;  %v1688_v63 = vmul.f32 %v1685_v46, %v2115_v18 }
 0x652   : > { %v1554_v43 = vrot.slane %v1553_v45, 4  ;;  %v1630_v54 = vmax.f32 %v1628_v61, %v1629_v58  ;;  %v1687_v61 = vmul.f32 %v1685_v46, %v2110_v17  ;;  %v1689_v58 = vmul.f32 %v1685_v46, %v2120_v19 }
 0x653   : > { %v1690_v30 = vsub.f32 %v1681_v24, %v1686_v38  ;;  %v833_v24 = vsel %vm246_vm0, %v2581_v28, -inf  ;;  %v3319_v38 = vld [vmem:[#allocation32_spill] sm:$0xff] }
 0x654   : > { %v1555_v59 = vmax.f32 %v1553_v45, %v1554_v43  ;;  %v1631_v14 = vrot.slane %v1630_v54, 4  ;;  %v1684_v45 = vadd.f32 %v1680_v40, %v1675_v41  ;;  %v1691_v4 = vsub.f32 %v1682_v51, %v1687_v61 }
 0x655   : > { %v350_v51 = vsel %vm246_vm0, %v2356_v56, -inf  ;;  %v672_v61 = vsel %vm246_vm0, %v2506_v42, -inf }
 0x656   : > { %v1556_v55 = vrot.slane %v1555_v59, 2  ;;  %v1632_v32 = vmax.f32 %v1630_v54, %v1631_v14  ;;  %v1683_v14 = vadd.f32 %v1679_v0, %v1674_v11 }
 0x658   : > { %v1557_v53 = vmax.f32 %v1555_v59, %v1556_v55  ;;  %v1633_v15 = vrot.slane %v1632_v32, 2  ;;  %v1693_v59 = vsub.f32 %v1684_v45, %v1689_v58  ;;  %v1692_v55 = vsub.f32 %v1683_v14, %v1688_v63  ;;  %v3320_v58 = vld [vmem:[#allocation30_spill] sm:$0xff] }
 0x659   : > { %v1155_v45 = vsel %vm246_vm0, %v3319_v38, -inf }
 0x65a   : > { %v1558_v13 = vrot.slane %v1557_v53, 1  ;;  %v1634_v43 = vmax.f32 %v1632_v32, %v1633_v15 }
 0x65c   : > { %v1559_v2 = vmax.f32 %v1557_v53, %v1558_v13  ;;  %v1635_v54 = vrot.slane %v1634_v43, 1  ;;  %v994_v13 = vsel %vm246_vm0, %v3320_v58, -inf }
 0x65e   : > { %vm1560_vm7 = vcmp.ge.f32.partialorder %v2917_v57, %v1559_v2  ;;  %vm1561_vm8 = vcmp.ge.f32.partialorder %v2915_v39, %v1559_v2  ;;  %vm1562_vm9 = vcmp.ge.f32.partialorder %v1545_v29, %v1559_v2  ;;  %vm1563_vm10 = vcmp.ge.f32.partialorder %v1548_v33, %v1559_v2 }
 0x65f   : > { %v1564_v23 = vsel %vm1560_vm7, %v2032_v1, 30  ;;  %v1565_v12 = vsel %vm1561_vm8, %v3300_v5, 30  ;;  %v1566_v62 = vsel %vm1562_vm9, %v2065_v9, 30  ;;  %v1567_v37 = vsel %vm1563_vm10, %v3308_v44, 30 }
 0x660   : > { %v1568_v41 = vsel %vm261_vm2, %v1567_v37, 2147483647  ;;  %vm1569_vm11 = vcmp.lt.s32.totalorder %v1564_v23, %v1565_v12  ;;  %v2956_v40 = vmax.f32 %v1634_v43, %v1635_v54  ;;  %v1477_v43 = vsel %vm246_vm0, %v2881_v60, -inf  ;;  %v3321_v54 = vld [vmem:[#allocation34_spill] sm:$0xff] }
 0x661   : > { %v1570_v32 = vsel %vm1569_vm11, %v1564_v23, %v1565_v12  ;;  %vm1571_vm12 = vcmp.lt.s32.totalorder %v1566_v62, %v1568_v41  ;;  %v1316_v14 = vsel %vm246_vm0, %v3321_v54, -inf  ;;  %v1763_v23 = vstv %s1748_s30 }
 0x662   : > { %v1572_v57 = vsel %vm1571_vm12, %v1566_v62, %v1568_v41  ;;  %v1695_v39 = vadd.f32 %v1691_v4, %v2956_v40  ;;  %v1694_v2 = vadd.f32 %v1690_v30, %v2956_v40  ;;  %v1697_v33 = vadd.f32 %v1693_v59, %v2956_v40 }
 0x663   : > { %vm1573_vm13 = vcmp.lt.s32.totalorder %v1570_v32, %v1572_v57  ;;  %v1696_v0 = vadd.f32 %v1692_v55, %v2956_v40  ;;  %v511_v4 = vsel %vm246_vm0, %v2431_v31, -inf  ;;  %v1638_v63 = vsel %vm246_vm0, %v2956_v40, -inf }
 0x664   : > { %v2961_v29 = vsel %vm1573_vm13, %v1570_v32, %v1572_v57  ;;  %v1701_v46 = vsel %vm246_vm0, %v1695_v39, -inf  ;;  %v1698_v11 = vsel %vm246_vm0, %v1694_v2, -inf  ;;  %v1707_v53 = vsel %vm256_vm1, %v1697_v33, -inf }
 0x665   : > { %1702 = vmax.xlane.f32.xlu1 %v1701_v46  ;;  %1699 = vmax.xlane.f32.xlu0 %v1698_v11  ;;  %v1704_v15 = vsel %vm246_vm0, %v1696_v0, -inf  ;;  %v1754_v30 = vstv %s1747_s29  ;;  %v1765_v37 = vmul.f32 %v1763_v23, %v2237_v35  ;;  %v1772_v55 = vstv %s1753_s2 }
 0x666   : > { %v1756_v59 = vmul.f32 %v1754_v30, %v2217_v48  ;;  %v1755_v12 = vmul.f32 %v1754_v30, %v2215_v47  ;;  %v1758_v41 = vmul.f32 %v1754_v30, %v3301_v3  ;;  %v1764_v57 = vmul.f32 %v1763_v23, %v2235_v34 }
 0x667   : > { %v1757_v39 = vmul.f32 %v1754_v30, %v2219_v49  ;;  %v1774_v33 = vmul.f32 %v1772_v55, %v2110_v17  ;;  %v1767_v11 = vmul.f32 %v1763_v23, %v2241_v50 }
 0x668   : > { %v1760_v62 = vadd.f32 %v1756_v59, %v2201_v25  ;;  %v1759_v32 = vadd.f32 %v1755_v12, %v2199_v22  ;;  %v1762_v46 = vadd.f32 %v1758_v41, %v2205_v27 }
 0x669   : > { %1708 = vmax.xlane.f32.xlu1 %v1707_v53  ;;  %1705 = vmax.xlane.f32.xlu0 %v1704_v15  ;;  %v1773_v53 = vmul.f32 %v1772_v55, %v2102_v16  ;;  %v1761_v15 = vadd.f32 %v1757_v39, %v2203_v26 }
 0x66a   : > { %v1769_v2 = vadd.f32 %v1765_v37, %v1760_v62  ;;  %v1768_v0 = vadd.f32 %v1764_v57, %v1759_v32 }
 0x66d   : > { %512 = vmax.xlane.f32.xlu1 %v511_v4  ;;  %351 = vmax.xlane.f32.xlu0 %v350_v51  ;;  %v1766_v4 = vmul.f32 %v1763_v23, %v2239_v36  ;;  %v1771_v51 = vadd.f32 %v1767_v11, %v1762_v46 }
 0x671   : > { %834 = vmax.xlane.f32.xlu1 %v833_v24  ;;  %673 = vmax.xlane.f32.xlu0 %v672_v61  ;;  %v1776_v24 = vmul.f32 %v1772_v55, %v2120_v19  ;;  %v1778_v61 = vsub.f32 %v1769_v2, %v1774_v33 }
 0x673   : > { %v1780_v30 = vsub.f32 %v1771_v51, %v1776_v24 }
 0x675   : > { %1156 = vmax.xlane.f32.xlu1 %v1155_v45  ;;  %995 = vmax.xlane.f32.xlu0 %v994_v13  ;;  %v1777_v45 = vsub.f32 %v1768_v0, %v1773_v53  ;;  %v1770_v13 = vadd.f32 %v1766_v4, %v1761_v15 }
 0x679   : > { %1478 = vmax.xlane.f32.xlu1 %v1477_v43  ;;  %1317 = vmax.xlane.f32.xlu0 %v1316_v14  ;;  %v1775_v43 = vmul.f32 %v1772_v55, %v2115_v18 }
 0x67b   : > { %v1779_v62 = vsub.f32 %v1770_v13, %v1775_v43 }
 0x67d   : > { %1639 = vmax.xlane.f32.xlu0 %v1638_v63 }
 0x6f2   : > { %v3005_v14 = vpop.xlane.xlu1 %1702  ;;  %v3007_v63 = vpop.xlane.xlu0 %1699 }
 0x6f3   : > { %v1782_v59 = vadd.f32 %v1778_v61, %v3005_v14  ;;  %v1712_v12 = vmax.f32 %v3007_v63, %v3005_v14  ;;  %v1781_v23 = vadd.f32 %v1777_v45, %v3007_v63  ;;  %v3322_v61 = vld [vmem:[#allocation15_spill] sm:$0xff] }
 0x6f5   : > { %v1786_v37 = vsel %vm246_vm0, %v1782_v59, -inf  ;;  %v1785_v57 = vsel %vm246_vm0, %v1781_v23, -inf }
 0x6f6   : > { %v1709_v41 = vpop.xlane.xlu1 %1708  ;;  %v1706_v32 = vpop.xlane.xlu0 %1705  ;;  %v1789_v0 = vmax.f32 %v1785_v57, %v1786_v37 }
 0x6f7   : > { %v1711_v55 = vsel %vm261_vm2, %v1709_v41, -inf  ;;  %v1784_v39 = vadd.f32 %v1780_v30, %v1709_v41  ;;  %v1783_v2 = vadd.f32 %v1779_v62, %v1706_v32 }
 0x6f8   : > { %v1713_v33 = vmax.f32 %v1706_v32, %v1711_v55 }
 0x6f9   : > { %v1788_v46 = vsel %vm256_vm1, %v1784_v39, -inf  ;;  %v1787_v11 = vsel %vm246_vm0, %v1783_v2, -inf }
 0x6fa   : > { %v1714_v53 = vmax.f32 %v1712_v12, %v1713_v33  ;;  %v1790_v15 = vmax.f32 %v1787_v11, %v1788_v46  ;;  %v352_v4 = vpop.xlane.xlu0 %351  ;;  %v513_v24 = vpop.xlane.xlu1 %512 }
 0x6fb   : > { %vm353_vm14 = vcmp.ge.f32.partialorder %v2356_v56, %v352_v4  ;;  %vm514_vm15 = vcmp.ge.f32.partialorder %v2431_v31, %v513_v24 }
 0x6fc   : > { %v1715_v51 = vrot.slane %v1714_v53, 4  ;;  %v354_v45 = vsel %vm353_vm14, %v3322_v61, 30  ;;  %v1791_v13 = vmax.f32 %v1789_v0, %v1790_v15 }
 0x6fd   : > { %v3021_v43 = vsel %vm246_vm0, %v354_v45, 2147483647  ;;  %v515_v45 = vsel %vm514_vm15, %v3322_v61, 30 }
 0x6fe   : > { %v1716_v30 = vmax.f32 %v1714_v53, %v1715_v51  ;;  %v674_v59 = vpop.xlane.xlu0 %673  ;;  %v357_v23 = vshra.s32 %v3021_v43, 16  ;;  %v1792_v62 = vrot.slane %v1791_v13, 4  ;;  %v835_v2 = vpop.xlane.xlu1 %834 }
 0x6ff   : > { %vm675_vm1 = vcmp.ge.f32.partialorder %v2506_v42, %v674_v59  ;;  %vm836_vm4 = vcmp.ge.f32.partialorder %v2581_v28, %v835_v2 }
 0x700   : > { %v1717_v12 = vrot.slane %v1716_v30, 2  ;;  %v676_v37 = vsel %vm675_vm1, %v3322_v61, 30  ;;  %v3026_v57 = vcvt.s32.f32 %v357_v23  ;;  %v1793_v55 = vmax.f32 %v1791_v13, %v1792_v62 }
 0x701   : > { %v3029_v56 = vsel %vm246_vm0, %v676_v37, 2147483647 }
 0x702   : > { %v1718_v39 = vmax.f32 %v1716_v30, %v1717_v12  ;;  %360 = vmin.xlane.f32.xlu0 %v3026_v57  ;;  %v996_v33 = vpop.xlane.xlu0 %995  ;;  %v679_v46 = vshra.s32 %v3029_v56, 16  ;;  %v1794_v42 = vrot.slane %v1793_v55, 2  ;;  %v1157_v24 = vpop.xlane.xlu1 %1156 }
 0x703   : > { %vm997_vm3 = vcmp.ge.f32.partialorder %v3320_v58, %v996_v33  ;;  %vm1158_vm12 = vcmp.ge.f32.partialorder %v3319_v38, %v1157_v24 }
 0x704   : > { %v1719_v11 = vrot.slane %v1718_v39, 1  ;;  %v998_v0 = vsel %vm997_vm3, %v3322_v61, 30  ;;  %v3036_v53 = vcvt.s32.f32 %v679_v46  ;;  %v1795_v4 = vmax.f32 %v1793_v55, %v1794_v42 }
 0x705   : > { %v3039_v15 = vsel %vm246_vm0, %v998_v0, 2147483647  ;;  %v837_v55 = vsel %vm836_vm4, %v3322_v61, 30 }
 0x706   : > { %v1720_v51 = vmax.f32 %v1718_v39, %v1719_v11  ;;  %682 = vmin.xlane.f32.xlu0 %v3036_v53  ;;  %v1318_v13 = vpop.xlane.xlu0 %1317  ;;  %v1001_v31 = vshra.s32 %v3039_v15, 16  ;;  %v1796_v58 = vrot.slane %v1795_v4, 1  ;;  %v1479_v11 = vpop.xlane.xlu1 %1478  ;;  %v3071_v28 = vsel %vm246_vm0, %v837_v55, 2147483647 }
 0x707   : > { %vm1319_vm5 = vcmp.ge.f32.partialorder %v3321_v54, %v1318_v13  ;;  %vm1480_vm14 = vcmp.ge.f32.partialorder %v2881_v60, %v1479_v11 }
 0x708   : > { %vm1721_vm6 = vcmp.ge.f32.partialorder %v3007_v63, %v1720_v51  ;;  %vm1722_vm7 = vcmp.ge.f32.partialorder %v3005_v14, %v1720_v51  ;;  %vm1723_vm8 = vcmp.ge.f32.partialorder %v1706_v32, %v1720_v51  ;;  %vm1724_vm9 = vcmp.ge.f32.partialorder %v1709_v41, %v1720_v51 }
 0x709   : > { %v1725_v30 = vsel %vm1721_vm6, %v2032_v1, 30  ;;  %v1726_v59 = vsel %vm1722_vm7, %v3300_v5, 30  ;;  %v1727_v23 = vsel %vm1723_vm8, %v2065_v9, 30  ;;  %v1728_v62 = vsel %vm1724_vm9, %v3308_v44, 30 }
 0x70a   : > { %v1729_v54 = vsel %vm261_vm2, %v1728_v62, 2147483647  ;;  %vm1730_vm10 = vcmp.lt.s32.totalorder %v1725_v30, %v1726_v59  ;;  %v1320_v12 = vsel %vm1319_vm5, %v3322_v61, 30  ;;  %v1640_v37 = vpop.xlane.xlu0 %1639  ;;  %v3055_v14 = vsel %vm246_vm0, %v515_v45, 2147483647 }
 0x70b   : > { %v1731_v63 = vsel %vm1730_vm10, %v1725_v30, %v1726_v59  ;;  %vm1732_vm11 = vcmp.lt.s32.totalorder %v1727_v23, %v1729_v54  ;;  %v3058_v41 = vsel %vm246_vm0, %v1320_v12, 2147483647  ;;  %v1003_v39 = vcvt.s32.f32 %v1001_v31 }
 0x70c   : > { %v1733_v32 = vsel %vm1732_vm11, %v1727_v23, %v1729_v54  ;;  %vm1641_vm13 = vcmp.ge.f32.partialorder %v2956_v40, %v1640_v37  ;;  %v1797_v33 = vmax.f32 %v1795_v4, %v1796_v58  ;;  %v1323_v46 = vshra.s32 %v3058_v41, 16 }
 0x70d   : > { %vm1734_vm2 = vcmp.lt.s32.totalorder %v1731_v63, %v1733_v32  ;;  %1004 = vmin.xlane.f32.xlu0 %v1003_v39  ;;  %v1642_v0 = vsel %vm1641_vm13, %v3322_v61, 30  ;;  %v518_v51 = vshra.s32 %v3055_v14, 16  ;;  %v1159_v40 = vsel %vm1158_vm12, %v3322_v61, 30 }
 0x70e   : > { %v3066_v42 = vsel %vm1734_vm2, %v1731_v63, %v1733_v32  ;;  %v1643_v38 = vsel %vm246_vm0, %v1642_v0, 2147483647  ;;  %v1799_v2 = vsel %vm246_vm0, %v1797_v33, -inf  ;;  %v1325_v45 = vcvt.s32.f32 %v1323_v46 }
 0x70f   : > { %1800 = vmax.xlane.f32.xlu1 %v1799_v2  ;;  %v1645_v4 = vshra.s32 %v1643_v38, 16  ;;  %v520_v13 = vcvt.s32.f32 %v518_v51  ;;  %v840_v58 = vshra.s32 %v3071_v28, 16  ;;  %v3079_v24 = vsel %vm246_vm0, %v1159_v40, 2147483647 }
 0x710   : > { %v1481_v30 = vsel %vm1480_vm14, %v3322_v61, 30  ;;  %v1162_v23 = vshra.s32 %v3079_v24, 16  ;;  %v356_v37 = vand.u32 65535, %v3021_v43  ;;  %v678_v63 = vand.u32 65535, %v3029_v56 }
 0x711   : > { %1326 = vmin.xlane.f32.xlu0 %v1325_v45  ;;  %v1647_v31 = vcvt.s32.f32 %v1645_v4  ;;  %v842_v59 = vcvt.s32.f32 %v840_v58  ;;  %v3084_v62 = vsel %vm246_vm0, %v1481_v30, 2147483647  ;;  %v1000_v43 = vand.u32 65535, %v3039_v15 }
 0x712   : > { %v1164_v60 = vcvt.s32.f32 %v1162_v23  ;;  %v1484_v54 = vshra.s32 %v3084_v62, 16  ;;  %v358_v55 = vcvt.s32.f32 %v356_v37  ;;  %v680_v0 = vcvt.s32.f32 %v678_v63 }
 0x713   : > { %521 = vmin.xlane.f32.xlu1 %v520_v13  ;;  %v1322_v56 = vand.u32 65535, %v3058_v41  ;;  %v1002_v40 = vcvt.s32.f32 %v1000_v43  ;;  %v1644_v58 = vand.u32 65535, %v1643_v38  ;;  %v517_v37 = vand.u32 65535, %v3055_v14 }
 0x714   : > { %v1486_v12 = vcvt.s32.f32 %v1484_v54  ;;  %v1161_v43 = vand.u32 65535, %v3079_v24  ;;  %v3324_v24 = vld [vmem:[#allocation27_spill] sm:$0xff] }
 0x715   : > { %1648 = vmin.xlane.f32.xlu0 %v1647_v31  ;;  %v1646_v63 = vcvt.s32.f32 %v1644_v58 }
 0x717   : > { %843 = vmin.xlane.f32.xlu1 %v842_v59 }
 0x71b   : > { %1165 = vmin.xlane.f32.xlu1 %v1164_v60 }
 0x71f   : > { %1487 = vmin.xlane.f32.xlu1 %v1486_v12 }
 0x78f   : > { %v3089_v32 = vpop.xlane.xlu0 %360 }
 0x790   : > { %vm362_vm1 = vcmp.eq.f32.partialorder %v3026_v57, %v3089_v32 }
 0x791   : > { %v363_v46 = vsel %vm362_vm1, %v358_v55, inf }
 0x792   : > { %364 = vmin.xlane.f32.xlu0 %v363_v46  ;;  %v839_v46 = vand.u32 65535, %v3071_v28  ;;  %v1163_v28 = vcvt.s32.f32 %v1161_v43  ;;  %v3327_v43 = vld [vmem:[#allocation31_spill] sm:$0xff] }
 0x793   : > { %v3093_v11 = vpop.xlane.xlu0 %682 }
 0x794   : > { %vm684_vm15 = vcmp.eq.f32.partialorder %v3036_v53, %v3093_v11  ;;  %v1324_v53 = vcvt.s32.f32 %v1322_v56 }
 0x795   : > { %v685_v51 = vsel %vm684_vm15, %v680_v0, inf  ;;  %v519_v0 = vcvt.s32.f32 %v517_v37 }
 0x796   : > { %686 = vmin.xlane.f32.xlu0 %v685_v51 }
 0x79a   : > { %v3099_v2 = vpop.xlane.xlu0 %1004 }
 0x79b   : > { %vm1006_vm3 = vcmp.eq.f32.partialorder %v1003_v39, %v3099_v2 }
 0x79c   : > { %v1801_v57 = vpop.xlane.xlu1 %1800  ;;  %v1007_v4 = vsel %vm1006_vm3, %v1002_v40, inf  ;;  %v1483_v40 = vand.u32 65535, %v3084_v62 }
 0x79d   : > { %vm1802_vm4 = vcmp.ge.f32.partialorder %v1797_v33, %v1801_v57  ;;  %1008 = vmin.xlane.f32.xlu0 %v1007_v4 }
 0x79e   : > { %v1803_v30 = vsel %vm1802_vm4, %v3322_v61, 30  ;;  %v3103_v23 = vpop.xlane.xlu0 %1326  ;;  %v1485_v4 = vcvt.s32.f32 %v1483_v40  ;;  %v3328_v40 = vld [vmem:[#allocation33_spill] sm:$0xff]  ;;  %vm260_vm4 = vcmp.eq.s32.totalorder %v3322_v61, 0 }
 0x79f   : > { %v3106_v54 = vsel %vm246_vm0, %v1803_v30, 2147483647  ;;  %vm1328_vm5 = vcmp.eq.f32.partialorder %v1325_v45, %v3103_v23 }
 0x7a0   : > { %v3109_v15 = vpop.xlane.xlu1 %521  ;;  %v1329_v41 = vsel %vm1328_vm5, %v1324_v53, inf  ;;  %v1806_v39 = vshra.s32 %v3106_v54, 16  ;;  %v448_v53 = vrot.slane %v3324_v24, 4 }
 0x7a1   : > { %1330 = vmin.xlane.f32.xlu0 %v1329_v41  ;;  %vm523_vm0 = vcmp.eq.f32.partialorder %v520_v13, %v3109_v15 }
 0x7a2   : > { %v3113_v33 = vpop.xlane.xlu0 %1648  ;;  %v3115_v38 = vcvt.s32.f32 %v1806_v39  ;;  %v524_v14 = vsel %vm523_vm0, %v519_v0, inf  ;;  %vm449_vm11 = vcmp.lt.s32.totalorder %v3324_v24, %v448_v53  ;;  %v3326_v0 = vld [vmem:[#allocation29_spill] sm:$0xff]  ;;  %vm349_vm0 = vcmp.eq.s32.totalorder %v3322_v61, 1 }
 0x7a3   : > { %vm1650_vm6 = vcmp.eq.f32.partialorder %v1647_v31, %v3113_v33  ;;  %v841_v31 = vcvt.s32.f32 %v839_v46  ;;  %v450_v41 = vsel %vm449_vm11, %v3324_v24, %v448_v53 }
 0x7a4   : > { %1809 = vmin.xlane.f32.xlu1 %v3115_v38  ;;  %v3119_v55 = vpop.xlane.xlu1 %843  ;;  %v1651_v45 = vsel %vm1650_vm6, %v1646_v63, inf  ;;  %v451_v39 = vrot.slane %v450_v41, 2 }
 0x7a5   : > { %1652 = vmin.xlane.f32.xlu0 %v1651_v45  ;;  %vm845_vm7 = vcmp.eq.f32.partialorder %v842_v59, %v3119_v55  ;;  %v3323_v59 = vld [vmem:[#allocation26_spill] sm:$0xff]  ;;  %v3325_v45 = vld [vmem:[#allocation28_spill] sm:$0xff] }
 0x7a6   : > { %v846_v56 = vsel %vm845_vm7, %v841_v31, inf  ;;  %v287_v30 = vrot.slane %v3323_v59, 4  ;;  %vm452_vm2 = vcmp.lt.s32.totalorder %v450_v41, %v451_v39  ;;  %v609_v46 = vrot.slane %v3325_v45, 4 }
 0x7a7   : > { %v453_v37 = vsel %vm452_vm2, %v450_v41, %v451_v39  ;;  %v931_v31 = vrot.slane %v3327_v43, 4  ;;  %v1414_v41 = vrot.slane %v2886_v52, 4  ;;  %vm422_vm7 = vcmp.eq.s32.totalorder %v3322_v61, 2 }
 0x7a8   : > { %525 = vmin.xlane.f32.xlu1 %v524_v14  ;;  %v3123_v51 = vpop.xlane.xlu1 %1165  ;;  %vm288_vm10 = vcmp.lt.s32.totalorder %v3323_v59, %v287_v30  ;;  %v770_v14 = vrot.slane %v3326_v0, 4  ;;  %vm610_vm14 = vcmp.lt.s32.totalorder %v3325_v45, %v609_v46 }
 0x7a9   : > { %vm1167_vm8 = vcmp.eq.f32.partialorder %v1164_v60, %v3123_v51  ;;  %v289_v60 = vsel %vm288_vm10, %v3323_v59, %v287_v30  ;;  %vm932_vm15 = vcmp.lt.s32.totalorder %v3327_v43, %v931_v31  ;;  %v611_v24 = vsel %vm610_vm14, %v3325_v45, %v609_v46 }
 0x7aa   : > { %v1168_v57 = vsel %vm1167_vm8, %v1163_v28, inf  ;;  %v290_v62 = vrot.slane %v289_v60, 2  ;;  %v1092_v28 = vrot.slane %v3328_v40, 4  ;;  %vm771_vm1 = vcmp.lt.s32.totalorder %v3326_v0, %v770_v14 }
 0x7ab   : > { %vm1415_vm8 = vcmp.lt.s32.totalorder %v2886_v52, %v1414_v41 }
 0x7ac   : > { %847 = vmin.xlane.f32.xlu1 %v846_v56  ;;  %v3129_v13 = vpop.xlane.xlu1 %1487  ;;  %vm291_vm12 = vcmp.lt.s32.totalorder %v289_v60, %v290_v62  ;;  %v454_v56 = vrot.slane %v453_v37, 1  ;;  %vm1093_vm3 = vcmp.lt.s32.totalorder %v3328_v40, %v1092_v28 }
 0x7ad   : > { %vm1489_vm9 = vcmp.eq.f32.partialorder %v1486_v12, %v3129_v13  ;;  %v292_v12 = vsel %vm291_vm12, %v289_v60, %v290_v62  ;;  %v933_v62 = vsel %vm932_vm15, %v3327_v43, %v931_v31  ;;  %v1094_v39 = vsel %vm1093_vm3, %v3328_v40, %v1092_v28 }
 0x7ae   : > { %v1490_v58 = vsel %vm1489_vm9, %v1485_v4, inf  ;;  %v293_v63 = vrot.slane %v292_v12, 1  ;;  %v3329_v4 = vld [vmem:[#allocation35_spill] sm:$0xff]  ;;  %vm455_vm5 = vcmp.lt.s32.totalorder %v453_v37, %v454_v56  ;;  %v1575_v43 = vrot.slane %v2961_v29, 4 }
 0x7af   : > { %v456_v46 = vsel %vm455_vm5, %v453_v37, %v454_v56  ;;  %v1416_v28 = vsel %vm1415_vm8, %v2886_v52, %v1414_v41  ;;  %v1736_v37 = vrot.slane %v3066_v42, 4  ;;  %v1805_v41 = vand.u32 65535, %v3106_v54 }
 0x7b0   : > { %1169 = vmin.xlane.f32.xlu1 %v1168_v57  ;;  %v367_v57 = vcvt.f32.s32 %v3089_v32  ;;  %vm294_vm13 = vcmp.lt.s32.totalorder %v292_v12, %v293_v63  ;;  %v772_v32 = vsel %vm771_vm1, %v3326_v0, %v770_v14  ;;  %v934_v0 = vrot.slane %v933_v62, 2 }
 0x7b1   : > { %v295_v30 = vsel %vm294_vm13, %v292_v12, %v293_v63  ;;  %v612_v12 = vrot.slane %v611_v24, 2  ;;  %v773_v63 = vrot.slane %v772_v32, 2  ;;  %vm1576_vm12 = vcmp.lt.s32.totalorder %v2961_v29, %v1575_v43 }
 0x7b2   : > { %v368_v53 = vshll.u32 %v367_v57, 16  ;;  %v296_v45 = vsel %vm260_vm4, %v295_v30, 0  ;;  %v1095_v57 = vrot.slane %v1094_v39, 2  ;;  %vm935_vm11 = vcmp.lt.s32.totalorder %v933_v62, %v934_v0 }
 0x7b3   : > { %vm613_vm9 = vcmp.lt.s32.totalorder %v611_v24, %v612_v12  ;;  %vm774_vm10 = vcmp.lt.s32.totalorder %v772_v32, %v773_v63  ;;  %v1577_v30 = vsel %vm1576_vm12, %v2961_v29, %v1575_v43  ;;  %vm1737_vm14 = vcmp.lt.s32.totalorder %v3066_v42, %v1736_v37 }
 0x7b4   : > { %1491 = vmin.xlane.f32.xlu1 %v1490_v58  ;;  %v1253_v58 = vrot.slane %v3329_v4, 4  ;;  %vm1096_vm2 = vcmp.lt.s32.totalorder %v1094_v39, %v1095_v57  ;;  %v614_v56 = vsel %vm613_vm9, %v611_v24, %v612_v12  ;;  %v1578_v52 = vrot.slane %v1577_v30, 2 }
 0x7b5   : > { %v1738_v24 = vsel %vm1737_vm14, %v3066_v42, %v1736_v37  ;;  %v1807_v12 = vcvt.s32.f32 %v1805_v41  ;;  %v850_v37 = vcvt.f32.s32 %v3119_v55  ;;  %vm510_vm9 = vcmp.eq.s32.totalorder %v3322_v61, 3 }
 0x7b6   : > { %vm1254_vm6 = vcmp.lt.s32.totalorder %v3329_v4, %v1253_v58  ;;  %vm1579_vm4 = vcmp.lt.s32.totalorder %v1577_v30, %v1578_v52  ;;  %v1739_v54 = vrot.slane %v1738_v24, 2  ;;  %vm671_vm12 = vcmp.eq.s32.totalorder %v3322_v61, 5 }
 0x7b7   : > { %v1255_v14 = vsel %vm1254_vm6, %v3329_v4, %v1253_v58  ;;  %v775_v4 = vsel %vm774_vm10, %v772_v32, %v773_v63  ;;  %v936_v58 = vsel %vm935_vm11, %v933_v62, %v934_v0  ;;  %v528_v0 = vcvt.f32.s32 %v3109_v15 }
 0x7b8   : > { %v1256_v40 = vrot.slane %v1255_v14, 2  ;;  %vm1740_vm8 = vcmp.lt.s32.totalorder %v1738_v24, %v1739_v54  ;;  %vm583_vm10 = vcmp.eq.s32.totalorder %v3322_v61, 4  ;;  %v1333_v62 = vcvt.f32.s32 %v3103_v23 }
 0x7b9   : > { %vm905_vm14 = vcmp.eq.s32.totalorder %v3322_v61, 8 }
 0x7ba   : > { %vm1257_vm13 = vcmp.lt.s32.totalorder %v1255_v14, %v1256_v40 }
 0x81f   : > { %v365_v59 = vpop.xlane.xlu0 %364 }
 0x820   : > { %v366_v60 = vcvt.f32.s32 %v365_v59 }
 0x822   : > { %v369_v3 = vadd.s32 %v368_v53, %v366_v60  ;;  %v1097_v53 = vsel %vm1096_vm2, %v1094_v39, %v1095_v57  ;;  %v615_v60 = vrot.slane %v614_v56, 1  ;;  %vm744_vm2 = vcmp.eq.s32.totalorder %v3322_v61, 6 }
 0x823   : > { %v687_v5 = vpop.xlane.xlu0 %686  ;;  %v1098_v6 = vrot.slane %v1097_v53, 1 }
 0x824   : > { %v370_v31 = vsel %vm349_vm0, %v369_v3, %v296_v45  ;;  %v1417_v3 = vrot.slane %v1416_v28, 2  ;;  %v776_v45 = vrot.slane %v775_v4, 1  ;;  %vm616_vm15 = vcmp.lt.s32.totalorder %v614_v56, %v615_v60 }
 0x825   : > { %v3162_v59 = vsel %vm422_vm7, %v456_v46, %v370_v31  ;;  %v937_v46 = vrot.slane %v936_v58, 1  ;;  %v1258_v31 = vsel %vm1257_vm13, %v1255_v14, %v1256_v40  ;;  %vm1099_vm0 = vcmp.lt.s32.totalorder %v1097_v53, %v1098_v6 }
 0x826   : > { %vm1418_vm1 = vcmp.lt.s32.totalorder %v1416_v28, %v1417_v3  ;;  %v1259_v32 = vrot.slane %v1258_v31, 1  ;;  %vm3171_vm3 = vcmp.lt.s32.totalorder %v775_v4, %v776_v45  ;;  %v617_v43 = vsel %vm616_vm15, %v614_v56, %v615_v60 }
 0x827   : > { %v3175_v29 = vsel %vm1418_vm1, %v1416_v28, %v1417_v3  ;;  %vm3179_vm5 = vcmp.lt.s32.totalorder %v936_v58, %v937_v46  ;;  %v3187_v40 = vsel %vm1579_vm4, %v1577_v30, %v1578_v52  ;;  %v689_v28 = vcvt.f32.s32 %v3093_v11 }
 0x828   : > { %v1420_v57 = vrot.slane %v3175_v29, 1  ;;  %vm1260_vm7 = vcmp.lt.s32.totalorder %v1258_v31, %v1259_v32  ;;  %v778_v15 = vsel %vm3171_vm3, %v775_v4, %v776_v45  ;;  %v1100_v41 = vsel %vm1099_vm0, %v1097_v53, %v1098_v6 }
 0x829   : > { %v529_v56 = vshll.u32 %v528_v0, 16  ;;  %v688_v60 = vcvt.f32.s32 %v687_v5  ;;  %v1581_v30 = vrot.slane %v3187_v40, 1  ;;  %v1011_v11 = vcvt.f32.s32 %v3099_v2 }
 0x82a   : > { %v1009_v42 = vpop.xlane.xlu0 %1008  ;;  %v1261_v52 = vsel %vm1260_vm7, %v1258_v31, %v1259_v32  ;;  %v690_v55 = vshll.u32 %v689_v28, 16  ;;  %vm3203_vm11 = vcmp.lt.s32.totalorder %v3175_v29, %v1420_v57  ;;  %v1741_v5 = vsel %vm1740_vm8, %v1738_v24, %v1739_v54 }
 0x82b   : > { %v1012_v32 = vshll.u32 %v1011_v11, 16  ;;  %vm832_vm13 = vcmp.eq.s32.totalorder %v3322_v61, 7  ;;  %v1494_v28 = vcvt.f32.s32 %v3129_v13  ;;  %vm993_vm1 = vcmp.eq.s32.totalorder %v3322_v61, 9 }
 0x82c   : > { %v691_v45 = vadd.s32 %v690_v55, %v688_v60  ;;  %vm1066_vm15 = vcmp.eq.s32.totalorder %v3322_v61, 10  ;;  %vm1154_vm3 = vcmp.eq.s32.totalorder %v3322_v61, 11  ;;  %v1742_v11 = vrot.slane %v1741_v5, 1 }
 0x82d   : > { %v1655_v55 = vcvt.f32.s32 %v3113_v33  ;;  %vm1227_vm4 = vcmp.eq.s32.totalorder %v3322_v61, 12  ;;  %v1422_v33 = vsel %vm3203_vm11, %v3175_v29, %v1420_v57  ;;  %vm1476_vm0 = vcmp.eq.s32.totalorder %v3322_v61, 15 }
 0x82e   : > { %v1331_v53 = vpop.xlane.xlu0 %1330  ;;  %vm1582_vm7 = vcmp.lt.s32.totalorder %v3187_v40, %v1581_v30  ;;  %vm1549_vm8 = vcmp.eq.s32.totalorder %v3322_v61, 16  ;;  %vm1710_vm11 = vcmp.eq.s32.totalorder %v3322_v61, 18 }
 0x82f   : > { %v1583_v29 = vsel %vm1582_vm7, %v3187_v40, %v1581_v30  ;;  %v3336_v40 = vld [vmem:[#allocation25_spill] sm:$0xff] }
 0x831   : > { %v3177_v39 = vpop.xlane.xlu1 %1809 }
 0x832   : > { %vm1811_vm6 = vcmp.eq.f32.partialorder %v3115_v38, %v3177_v39  ;;  %v939_v38 = vsel %vm3179_vm5, %v936_v58, %v937_v46  ;;  %v851_v58 = vshll.u32 %v850_v37, 16  ;;  %v1653_v60 = vpop.xlane.xlu0 %1652  ;;  %vm1315_vm5 = vcmp.eq.s32.totalorder %v3322_v61, 13 }
 0x833   : > { %v1812_v14 = vsel %vm1811_vm6, %v1807_v12, inf  ;;  %vm1388_vm6 = vcmp.eq.s32.totalorder %v3322_v61, 14 }
 0x834   : > { %1813 = vmin.xlane.f32.xlu1 %v1812_v14  ;;  %v1172_v14 = vcvt.f32.s32 %v3123_v51  ;;  %v1010_v51 = vcvt.f32.s32 %v1009_v42 }
 0x835   : > { %v526_v3 = vpop.xlane.xlu1 %525 }
 0x836   : > { %v527_v12 = vcvt.f32.s32 %v526_v3  ;;  %v1173_v0 = vshll.u32 %v1172_v14, 16  ;;  %v1013_v42 = vadd.s32 %v1012_v32, %v1010_v51  ;;  %v1332_v3 = vcvt.f32.s32 %v1331_v53 }
 0x837   : > { %v1495_v14 = vshll.u32 %v1494_v28, 16 }
 0x838   : > { %v530_v4 = vadd.s32 %v529_v56, %v527_v12 }
 0x839   : > { %v848_v2 = vpop.xlane.xlu1 %847 }
 0x83a   : > { %v531_v46 = vsel %vm510_vm9, %v530_v4, %v3162_v59  ;;  %v849_v31 = vcvt.f32.s32 %v848_v2  ;;  %vm1637_vm9 = vcmp.eq.s32.totalorder %v3322_v61, 17 }
 0x83b   : > { %v618_v63 = vsel %vm583_vm10, %v617_v43, %v531_v46  ;;  %v1334_v43 = vshll.u32 %v1333_v62, 16  ;;  %vm1743_vm10 = vcmp.lt.s32.totalorder %v1741_v5, %v1742_v11 }
 0x83c   : > { %v692_v24 = vsel %vm671_vm12, %v691_v45, %v618_v63  ;;  %v852_v54 = vadd.s32 %v851_v58, %v849_v31  ;;  %v1744_v62 = vsel %vm1743_vm10, %v1741_v5, %v1742_v11  ;;  %vm1798_vm12 = vcmp.eq.s32.totalorder %v3322_v61, 19 }
 0x83d   : > { %v779_v37 = vsel %vm744_vm2, %v778_v15, %v692_v24  ;;  %v1170_v59 = vpop.xlane.xlu1 %1169  ;;  %v1335_v53 = vadd.s32 %v1334_v43, %v1332_v3  ;;  %v1816_v24 = vcvt.f32.s32 %v3177_v39 }
 0x83e   : > { %v853_v56 = vsel %vm832_vm13, %v852_v54, %v779_v37  ;;  %v1171_v23 = vcvt.f32.s32 %v1170_v59  ;;  %v1820_v54 = vstv %s1975_s10  ;;  %s183_s10 = sadd.s32 1, %s1975_s10  }
 0x83f   : > { %v940_v12 = vsel %vm905_vm14, %v939_v38, %v853_v56  ;;  %v1654_v38 = vcvt.f32.s32 %v1653_v60  ;;  %v1817_v37 = vshll.u32 %v1816_v24, 16  ;;  %vm1821_vm2 = vcmp.eq.s32.totalorder %v2032_v1, %v1820_v54  ;;  %p180_p6 = scmp.ge.s32.totalorder %s183_s10, 5  }
 0x840   : > { %v1014_v13 = vsel %vm993_vm1, %v1013_v42, %v940_v12  ;;  %v1174_v15 = vadd.s32 %v1173_v0, %v1171_v23  ;;  %s1981_s25 = smov (%p180_p6), [#allocation10]  }
 0x841   : > { %v1101_v4 = vsel %vm1066_vm15, %v1100_v41, %v1014_v13  ;;  %v1492_v58 = vpop.xlane.xlu1 %1491  ;;  %v1656_v41 = vshll.u32 %v1655_v55, 16  ;;  %s1830_s11 = sshll.u32 (%p180_p6), %s1981_s25, 4  ;;  %s1831_s11 = int_to_ptr.vmem [resolvable:$true] %s1830_s11 }
 0x842   : > { %v1175_v2 = vsel %vm1154_vm3, %v1174_v15, %v1101_v4  ;;  %v1493_v45 = vcvt.f32.s32 %v1492_v58  ;;  %s1931_s16 = scalar_lea.vmem (%p180_p6), %s1831_s11, 128  ;;  %p1936_p8 = scmp.lt.s32.totalorder (%p180_p6), %s1831_s11, %s1831_s11 }
 0x843   : > { %v1262_v51 = vsel %vm1227_vm4, %v1261_v52, %v1175_v2  ;;  %v1657_v52 = vadd.s32 %v1656_v41, %v1654_v38  ;;  %p1932_p7 = scmp.ne.s32.totalorder (%p180_p6), %s1831_s11, %s1931_s16  ;;  %p1937_p9 = scmp.lt.s32.totalorder (%p180_p6), %s1931_s16, %s1931_s16 }
 0x844   : > { %v1336_v46 = vsel %vm1315_vm5, %v1335_v53, %v1262_v51  ;;  %v1496_v31 = vadd.s32 %v1495_v14, %v1493_v45 }
 0x845   : > { %v1423_v32 = vsel %vm1388_vm6, %v1422_v33, %v1336_v46  ;;  %p1938_p10 = por (%p180_p6), %p1937_p9, %p1936_p8 }
 0x846   : > { %v1497_v57 = vsel %vm1476_vm0, %v1496_v31, %v1423_v32 }
 0x847   : > { %v1584_v6 = vsel %vm1549_vm8, %v1583_v29, %v1497_v57  ;;  %p1939_p11 = pnand (%p180_p6), %p1938_p10, %p1932_p7 }
 0x848   : > { %v1658_v63 = vsel %vm1637_vm9, %v1657_v52, %v1584_v6 }
 0x849   : > { %v1745_v0 = vsel %vm1710_vm11, %v1744_v62, %v1658_v63 }
 0x8c1   : > { %v1814_v28 = vpop.xlane.xlu1 %1813 }
 0x8c2   : > { %v1815_v59 = vcvt.f32.s32 %v1814_v28  ;;  %182 = sbr.rel (!%p180_p6) target bundleno = 82 (0x52), region = 66 }
 0x8c4   : > { %v1818_v42 = vadd.s32 %v1817_v37, %v1815_v59 }
 0x8c6   : > { %v1819_v3 = vsel %vm1798_vm12, %v1818_v42, %v1745_v0 }
 0x8c7   : > { %v1822_v30 = vsel %vm1821_vm2, %v1819_v3, %v3336_v40  }
 0x8c8   : > { %v3337_v51 = vmov %v1822_v30  ;;  %1823 = vst [vmem:[#allocation10] sm:$0xff] (%p180_p6), %v1822_v30 }
 0x8c9   :  { %1942 = shalt.err (!%p1939_p11)
}
 0x8ca   :  { %s1943_s18 = scalar_lea.hbm %s3265_s5, 128 }
 0x8cb   :  { %p1944_p12 = scmp.ne.s32.totalorder %s3265_s5, %s1943_s18  ;;  %p1947_p13 = scmp.lt.u32.totalorder %s1943_s18, %s3265_s5 }
 0x8cd   :  { %p1949_p0 = pnand %p1947_p13, %p1944_p12 }
 0x8cf   :  { %1952 = shalt.err (!%p1949_p0)
}
 0x8d0   :  { %1833 = dma.vmem_to_hbm [thread:$0]  %s1831_s11, 128, %s3265_s5, [#allocation3]  }
 0x8d1   :  { %1967 = dma.done.wait [#allocation3], 128  }
 0x8d2   :  { %1968 = vsyncadd [#allocation3], 4294967168 }
 0x8d3   :  { %1837 = vsyncpa [#allocation3], 1 }
 0x8d4   :  { %1838 = vsyncpa [#allocation4], 1 }
 0x8d5   :  { %1839 = vsyncpa [#allocation6], 1 }
 0x8d6   :  { %1840 = vsyncpa [#allocation9], 1 }

</bundles_post_ra>
